<compile_context>
chip_gen: v7x
topology: tpu7x:2x2x1
jax: 0.10.0
libtpu: 0.0.40
codegen_flags: <defaults>
</compile_context>

<pallas_src>
import jax
import jax.numpy as jnp
from jax.experimental import pallas as pl
from jax.experimental.pallas import tpu as pltpu

# ----------------------------- small config ---------------------------------
BATCH = 2
CONTEXT_LEN = 8      # text_cfg.context_length
VOCAB = 64           # text_cfg.vocab_size
WIDTH = 32           # text_cfg.width
HEADS = 4            # text_cfg.heads
HEAD_DIM = WIDTH // HEADS
LAYERS = 2           # text_cfg.layers
EMBED_DIM = 32       # CLAP embed_dim (audio-branch embedding width)
JOINT = 32           # joint_embed_shape
EPS_LN = 1e-5

VMEM = pl.BlockSpec(memory_space=pltpu.MemorySpace.VMEM)


# --------------------------- in-kernel helpers -------------------------------
def _layer_norm(x, w, b):
    # statistics in f32 (correct on all TPU generations, incl. v5e)
    mu = jnp.mean(x, axis=-1, keepdims=True)
    xc = x - mu
    var = jnp.mean(xc * xc, axis=-1, keepdims=True)
    return xc * jax.lax.rsqrt(var + EPS_LN) * w + b


def _linear(x, w, b):
    # bf16 MXU matmul with f32 accumulation; bias add in f32.
    return jnp.dot(x.astype(w.dtype), w, preferred_element_type=jnp.float32) + b


def _l2_normalize(x):
    # F.normalize(dim=-1):  x / max(||x||, 1e-12)  ==  x * rsqrt(max(ss, 1e-24))
    ss = jnp.sum(x * x, axis=-1, keepdims=True)
    return x * jax.lax.rsqrt(jnp.maximum(ss, 1e-24))


# ------------------------------- kernel --------------------------------------
def clap_kernel(
        ids_ref, eot_ref, aemb_ref, tok_ref, pos_ref, mask_ref,
        ln1w_ref, ln1b_ref, wqkv_ref, bqkv_ref, woh_ref, bo_ref,
        ln2w_ref, ln2b_ref, wfc_ref, bfc_ref, wpj_ref, bpj_ref,
        lnfw_ref, lnfb_ref,
        tpw1_ref, tpb1_ref, tpw2_ref, tpb2_ref,
        ttw1_ref, ttb1_ref, ttw2_ref, ttb2_ref,
        apw1_ref, apb1_ref, apw2_ref, apb2_ref,
        atw1_ref, atb1_ref, atw2_ref, atb2_ref,
        out_ref):
    """Whole CLAP forward fused: audio head + full text branch.
    The (B, L, W) residual stream stays in VMEM/f32 for the whole kernel.
    Output is a single lane-dense (B, 4*JOINT) slab:
        [audio_feat | text_feat | audio_feat_mlp | text_feat_mlp]."""
    B = eot_ref.shape[0]
    L = mask_ref.shape[0]
    W = pos_ref.shape[-1]
    HD = W // HEADS
    mask = mask_ref[...]                                  # (L, L) additive causal

    # --------------------- audio head (projection + MLP) ---------------------
    ha = jnp.maximum(_linear(aemb_ref[...], apw1_ref[...], apb1_ref[...]), 0.0)
    afeat = _l2_normalize(_linear(ha, apw2_ref[...], apb2_ref[...]))
    ha2 = jnp.maximum(_linear(afeat, atw1_ref[...], atb1_ref[...]), 0.0)
    amlp = _linear(ha2, atw2_ref[...], atb2_ref[...])

    # --- token embedding: one-hot matmul == exact gather of the bf16 table ---
    ids = ids_ref[...]                                    # (B*L, 1) int32
    onehot = (jax.lax.broadcasted_iota(jnp.int32, (B * L, VOCAB), 1)
              == ids).astype(tok_ref.dtype)
    x = jnp.dot(onehot, tok_ref[...], preferred_element_type=jnp.float32)
    x = x.reshape(B, L, W) + pos_ref[...]                 # + positional embedding

    # --- transformer: static layer loop over weights stacked on a layer axis --
    for l in range(LAYERS):
        # fused QKV projection; 1/sqrt(head_dim) is already folded into the
        # Q columns of wqkv (init time), so no per-layer scale multiply here.
        y = _layer_norm(x, ln1w_ref[l], ln1b_ref[l])
        qkv = _linear(y.reshape(B * L, W), wqkv_ref[l], bqkv_ref[l])
        qkv = qkv.reshape(B, L, 3 * W)

        # per-head attention with the output projection fused per head:
        # each head's context goes straight through its (HD, W) slice of the
        # out-proj weight and accumulates into `attn` — no jnp.concatenate /
        # lane re-assembly of the per-head contexts.
        attn = jnp.zeros((B * L, W), jnp.float32)
        for h in range(HEADS):
            q_h = qkv[:, :, h * HD:(h + 1) * HD]
            k_h = qkv[:, :, W + h * HD:W + (h + 1) * HD]
            v_h = qkv[:, :, 2 * W + h * HD:2 * W + (h + 1) * HD]
            s = jnp.einsum('bld,bmd->blm', q_h, k_h,
                           preferred_element_type=jnp.float32) + mask
            s = s - jnp.max(s, axis=-1, keepdims=True)
            p = jnp.exp(s)
            p = p * pl.reciprocal(jnp.sum(p, axis=-1, keepdims=True), approx=True)
            ctx_h = jnp.einsum('blm,bmd->bld', p, v_h,
                               preferred_element_type=jnp.float32)
            attn = attn + jnp.dot(
                ctx_h.reshape(B * L, HD).astype(woh_ref.dtype), woh_ref[l, h],
                preferred_element_type=jnp.float32)
        x = x + (attn + bo_ref[l]).reshape(B, L, W)

        # MLP: c_fc -> QuickGELU -> c_proj   (quick_gelu=True config)
        y2 = _layer_norm(x, ln2w_ref[l], ln2b_ref[l]).reshape(B * L, W)
        h1 = _linear(y2, wfc_ref[l], bfc_ref[l])
        h1 = h1 * jax.nn.sigmoid(1.702 * h1)
        x = x + _linear(h1, wpj_ref[l], bpj_ref[l]).reshape(B, L, W)

    # --- ln_final + EOT pooling (vectorized one-hot row select, no loop) -----
    x2d = _layer_norm(x, lnfw_ref[...], lnfb_ref[...]).reshape(B * L, W)
    row_i = jax.lax.broadcasted_iota(jnp.int32, (B, B * L), 0)
    col_i = jax.lax.broadcasted_iota(jnp.int32, (B, B * L), 1)
    sel = (col_i == row_i * L + eot_ref[...]).astype(jnp.float32)   # (B, B*L)
    pooled = jnp.dot(sel, x2d, preferred_element_type=jnp.float32)  # (B, W)
    # TODO(synk): at training-scale batch, gather EOT rows with per-row pl.ds
    # slices on the ref instead of a (B, B*L) one-hot matmul.

    # --- text_projection: Linear -> ReLU -> Linear, then F.normalize ---------
    ht = jnp.maximum(_linear(pooled, tpw1_ref[...], tpb1_ref[...]), 0.0)
    tfeat = _l2_normalize(_linear(ht, tpw2_ref[...], tpb2_ref[...]))

    # --- text_transform (MLPLayers): Linear -> ReLU -> Linear (dropout = id) -
    ht2 = jnp.maximum(_linear(tfeat, ttw1_ref[...], ttb1_ref[...]), 0.0)
    tmlp = _linear(ht2, ttw2_ref[...], ttb2_ref[...])

    # --- single lane-dense (B, 4*JOINT = 128) store ---------------------------
    out_ref[...] = jnp.concatenate([afeat, tfeat, amlp, tmlp],
                                   axis=-1).astype(out_ref.dtype)


# ------------------------------ wrapper ---------------------------------------
def run_clap(params, audio_embedding, text):
    B, L = text.shape
    ids_col = text.reshape(B * L, 1).astype(jnp.int32)
    eot = jnp.argmax(text, axis=-1).astype(jnp.int32).reshape(B, 1)
    p = params
    args = (ids_col, eot, audio_embedding,
            p['token_embedding'], p['positional_embedding'], p['attn_mask'],
            p['ln1_w'], p['ln1_b'], p['wqkv'], p['bqkv'], p['wo_h'], p['bo'],
            p['ln2_w'], p['ln2_b'], p['wfc'], p['bfc'], p['wpj'], p['bpj'],
            p['lnf_w'], p['lnf_b'],
            p['tp_w1'], p['tp_b1'], p['tp_w2'], p['tp_b2'],
            p['tt_w1'], p['tt_b1'], p['tt_w2'], p['tt_b2'],
            p['ap_w1'], p['ap_b1'], p['ap_w2'], p['ap_b2'],
            p['at_w1'], p['at_b1'], p['at_w2'], p['at_b2'])
    # Single launch; grid-less (everything fits in VMEM at toy shapes).
    # At real scale: layer grid axis ('arbitrary') + parallel batch axis,
    # and pltpu.CompilerParams(vmem_limit_bytes=...) tuned per chip.
    return pl.pallas_call(
        clap_kernel,
        out_shape=jax.ShapeDtypeStruct((B, 4 * JOINT), jnp.float32),
        in_specs=[VMEM] * len(args),
        out_specs=VMEM,
    )(*args)


# --------------------------- parameter init -----------------------------------
def init_params(key):
    keys = jax.random.split(key, 64)
    kit = iter(keys)

    def nrm(shape, std):
        return std * jax.random.normal(next(kit), shape, dtype=jnp.float32)

    W = WIDTH
    attn_std = W ** -0.5
    proj_std = (W ** -0.5) * ((2 * LAYERS) ** -0.5)
    fc_std = (2 * W) ** -0.5
    bf16 = jnp.bfloat16

    # fold 1/sqrt(head_dim) into the Q columns of the fused QKV weight
    head_scale = HEAD_DIM ** -0.5
    qkv_col_scale = jnp.concatenate(
        [jnp.full((W,), head_scale, jnp.float32), jnp.ones((2 * W,), jnp.float32)])

    wqkv, wo_h, wfc, wpj = [], [], [], []
    for _ in range(LAYERS):
        in_proj = nrm((3 * W, W), attn_std)          # nn.MultiheadAttention in_proj_weight
        wqkv.append(in_proj.T * qkv_col_scale[None, :])   # x @ in_proj.T -> [q*s | k | v]
        # out_proj weight, pre-transposed and pre-split per head:
        # rows h*HD:(h+1)*HD of (W, W) correspond to head h's context columns.
        wo_h.append(nrm((W, W), proj_std).T.reshape(HEADS, HEAD_DIM, W))
        wfc.append(nrm((4 * W, W), fc_std).T)
        wpj.append(nrm((W, 4 * W), proj_std).T)

    def stack(lst):
        return jnp.stack(lst).astype(bf16)

    def mlp2(din, dhid, dout, std=0.02):
        # nn.Linear weights pre-transposed so the kernel computes x @ W (== x @ W_pt.T)
        return dict(w1=nrm((dhid, din), std).T.astype(bf16),
                    b1=jnp.zeros((1, dhid), jnp.float32),
                    w2=nrm((dout, dhid), std).T.astype(bf16),
                    b2=jnp.zeros((1, dout), jnp.float32))

    tp = mlp2(W, JOINT, JOINT)          # text_projection
    tt = mlp2(JOINT, JOINT, JOINT)      # text_transform (MLPLayers)
    ap = mlp2(EMBED_DIM, JOINT, JOINT)  # audio_projection
    at = mlp2(JOINT, JOINT, JOINT)      # audio_transform (MLPLayers)

    params = dict(
        token_embedding=nrm((VOCAB, W), 0.02).astype(bf16),
        positional_embedding=nrm((CONTEXT_LEN, W), 0.01),
        # build_attention_mask(): -inf above diagonal, 0 elsewhere
        attn_mask=jnp.triu(
            jnp.full((CONTEXT_LEN, CONTEXT_LEN), -jnp.inf, dtype=jnp.float32), 1),
        # per-layer weights stacked on a leading `layer` axis
        ln1_w=jnp.ones((LAYERS, 1, W), jnp.float32),
        ln1_b=jnp.zeros((LAYERS, 1, W), jnp.float32),
        wqkv=stack(wqkv),
        # NOTE: q bias is zero; if loading real weights, scale its q-part by
        # head_scale too (the fold applies to the whole q = x Wq^T + bq term).
        bqkv=jnp.zeros((LAYERS, 1, 3 * W), jnp.float32),
        wo_h=stack(wo_h), bo=jnp.zeros((LAYERS, 1, W), jnp.float32),
        ln2_w=jnp.ones((LAYERS, 1, W), jnp.float32),
        ln2_b=jnp.zeros((LAYERS, 1, W), jnp.float32),
        wfc=stack(wfc), bfc=jnp.zeros((LAYERS, 1, 4 * W), jnp.float32),
        wpj=stack(wpj), bpj=jnp.zeros((LAYERS, 1, W), jnp.float32),
        lnf_w=jnp.ones((1, W), jnp.float32),
        lnf_b=jnp.zeros((1, W), jnp.float32),
        tp_w1=tp['w1'], tp_b1=tp['b1'], tp_w2=tp['w2'], tp_b2=tp['b2'],
        tt_w1=tt['w1'], tt_b1=tt['b1'], tt_w2=tt['w2'], tt_b2=tt['b2'],
        ap_w1=ap['w1'], ap_b1=ap['b1'], ap_w2=ap['w2'], ap_b2=ap['b2'],
        at_w1=at['w1'], at_b1=at['b1'], at_w2=at['w2'], at_b2=at['b2'],
        logit_scale_a=jnp.float32(jnp.log(1.0 / 0.07)),
        logit_scale_t=jnp.float32(jnp.log(1.0 / 0.07)),
    )
    return params


# ------------------------------ forward ---------------------------------------
def clap_forward(params, audio_embedding, text):
    # TODO(synk): the PANN Cnn14 audio branch (create_pann_model) lives outside
    # model.py; `audio_embedding` stands in for encode_audio(audio)['embedding'].
    packed = run_clap(params, audio_embedding, text)
    audio_features = packed[:, 0 * JOINT:1 * JOINT]
    text_features = packed[:, 1 * JOINT:2 * JOINT]
    audio_features_mlp = packed[:, 2 * JOINT:3 * JOINT]
    text_features_mlp = packed[:, 3 * JOINT:4 * JOINT]
    return (audio_features, text_features, audio_features_mlp, text_features_mlp,
            jnp.exp(params['logit_scale_a']), jnp.exp(params['logit_scale_t']))


# -------------------------------- main -----------------------------------------
if __name__ == "__main__":
    key = jax.random.PRNGKey(0)
    kp, ka, kt = jax.random.split(key, 3)
    params = init_params(kp)

    audio_embedding = jax.random.normal(ka, (BATCH, EMBED_DIM), dtype=jnp.float32)
    text = jax.random.randint(kt, (BATCH, CONTEXT_LEN), 0, VOCAB, dtype=jnp.int32)

    out = jax.jit(clap_forward)(params, audio_embedding, text)
    jax.block_until_ready(out)

    a_f, t_f, a_mlp, t_mlp, ls_a, ls_t = out
    assert a_f.shape == (BATCH, JOINT) and t_f.shape == (BATCH, JOINT)
    assert a_mlp.shape == (BATCH, JOINT) and t_mlp.shape == (BATCH, JOINT)
    assert bool(jnp.all(jnp.isfinite(a_f))) and bool(jnp.all(jnp.isfinite(t_f)))
    assert bool(jnp.all(jnp.isfinite(a_mlp))) and bool(jnp.all(jnp.isfinite(t_mlp)))
    print("KERNEL_OK")
</pallas_src>

<mosaic_0001>
module attributes {stable_mosaic.version = 11 : i64} {
  func.func @clap_kernel(%arg0: memref<16x1xi32, #tpu.memory_space<vmem>>, %arg1: memref<2x1xi32, #tpu.memory_space<vmem>>, %arg2: memref<2x32xf32, #tpu.memory_space<vmem>>, %arg3: memref<64x32xbf16, #tpu.memory_space<vmem>>, %arg4: memref<8x32xf32, #tpu.memory_space<vmem>>, %arg5: memref<8x8xf32, #tpu.memory_space<vmem>>, %arg6: memref<2x1x32xf32, #tpu.memory_space<vmem>>, %arg7: memref<2x1x32xf32, #tpu.memory_space<vmem>>, %arg8: memref<2x32x96xbf16, #tpu.memory_space<vmem>>, %arg9: memref<2x1x96xf32, #tpu.memory_space<vmem>>, %arg10: memref<2x4x8x32xbf16, #tpu.memory_space<vmem>>, %arg11: memref<2x1x32xf32, #tpu.memory_space<vmem>>, %arg12: memref<2x1x32xf32, #tpu.memory_space<vmem>>, %arg13: memref<2x1x32xf32, #tpu.memory_space<vmem>>, %arg14: memref<2x32x128xbf16, #tpu.memory_space<vmem>>, %arg15: memref<2x1x128xf32, #tpu.memory_space<vmem>>, %arg16: memref<2x128x32xbf16, #tpu.memory_space<vmem>>, %arg17: memref<2x1x32xf32, #tpu.memory_space<vmem>>, %arg18: memref<1x32xf32, #tpu.memory_space<vmem>>, %arg19: memref<1x32xf32, #tpu.memory_space<vmem>>, %arg20: memref<32x32xbf16, #tpu.memory_space<vmem>>, %arg21: memref<1x32xf32, #tpu.memory_space<vmem>>, %arg22: memref<32x32xbf16, #tpu.memory_space<vmem>>, %arg23: memref<1x32xf32, #tpu.memory_space<vmem>>, %arg24: memref<32x32xbf16, #tpu.memory_space<vmem>>, %arg25: memref<1x32xf32, #tpu.memory_space<vmem>>, %arg26: memref<32x32xbf16, #tpu.memory_space<vmem>>, %arg27: memref<1x32xf32, #tpu.memory_space<vmem>>, %arg28: memref<32x32xbf16, #tpu.memory_space<vmem>>, %arg29: memref<1x32xf32, #tpu.memory_space<vmem>>, %arg30: memref<32x32xbf16, #tpu.memory_space<vmem>>, %arg31: memref<1x32xf32, #tpu.memory_space<vmem>>, %arg32: memref<32x32xbf16, #tpu.memory_space<vmem>>, %arg33: memref<1x32xf32, #tpu.memory_space<vmem>>, %arg34: memref<32x32xbf16, #tpu.memory_space<vmem>>, %arg35: memref<1x32xf32, #tpu.memory_space<vmem>>, %arg36: memref<2x128xf32, #tpu.memory_space<vmem>>) attributes {dimension_semantics = [], scalar_prefetch = 0 : i64, scratch_operands = 0 : i64, tpu.core_type = #tpu.core_type<tc>} {
    %c0 = arith.constant 0 : index
    %c0_0 = arith.constant 0 : index
    %0 = vector.load %arg5[%c0, %c0_0] : memref<8x8xf32, #tpu.memory_space<vmem>>, vector<8x8xf32>
    %c0_1 = arith.constant 0 : index
    %c0_2 = arith.constant 0 : index
    %1 = vector.load %arg2[%c0_1, %c0_2] : memref<2x32xf32, #tpu.memory_space<vmem>>, vector<2x32xf32>
    %c0_3 = arith.constant 0 : index
    %c0_4 = arith.constant 0 : index
    %2 = vector.load %arg28[%c0_3, %c0_4] : memref<32x32xbf16, #tpu.memory_space<vmem>>, vector<32x32xbf16>
    %c0_5 = arith.constant 0 : index
    %c0_6 = arith.constant 0 : index
    %3 = vector.load %arg29[%c0_5, %c0_6] : memref<1x32xf32, #tpu.memory_space<vmem>>, vector<1x32xf32>
    %4 = arith.truncf %1 : vector<2x32xf32> to vector<2x32xbf16>
    %cst = arith.constant dense<0.000000e+00> : vector<2x32xf32>
    %5 = tpu.matmul %4, %2, %cst {dimension_numbers = #tpu.dot_dimension_numbers<[1], [0], [0], [1], [0, 0, 1, 1], [], []>} : vector<2x32xbf16>, vector<32x32xbf16>, vector<2x32xf32> -> vector<2x32xf32>
    %6 = vector.broadcast %3 : vector<1x32xf32> to vector<2x32xf32>
    %7 = arith.addf %5, %6 : vector<2x32xf32>
    %cst_7 = arith.constant 0.000000e+00 : f32
    %8 = vector.broadcast %cst_7 : f32 to vector<2x32xf32>
    %9 = arith.maximumf %7, %8 : vector<2x32xf32>
    %c0_8 = arith.constant 0 : index
    %c0_9 = arith.constant 0 : index
    %10 = vector.load %arg30[%c0_8, %c0_9] : memref<32x32xbf16, #tpu.memory_space<vmem>>, vector<32x32xbf16>
    %c0_10 = arith.constant 0 : index
    %c0_11 = arith.constant 0 : index
    %11 = vector.load %arg31[%c0_10, %c0_11] : memref<1x32xf32, #tpu.memory_space<vmem>>, vector<1x32xf32>
    %12 = arith.truncf %9 : vector<2x32xf32> to vector<2x32xbf16>
    %cst_12 = arith.constant dense<0.000000e+00> : vector<2x32xf32>
    %13 = tpu.matmul %12, %10, %cst_12 {dimension_numbers = #tpu.dot_dimension_numbers<[1], [0], [0], [1], [0, 0, 1, 1], [], []>} : vector<2x32xbf16>, vector<32x32xbf16>, vector<2x32xf32> -> vector<2x32xf32>
    %14 = vector.broadcast %11 : vector<1x32xf32> to vector<2x32xf32>
    %15 = arith.addf %13, %14 : vector<2x32xf32>
    %16 = arith.mulf %15, %15 : vector<2x32xf32>
    %cst_13 = arith.constant dense<0.000000e+00> : vector<2xf32>
    %17 = vector.multi_reduction <add>, %16, %cst_13 [1] : vector<2x32xf32> to vector<2xf32>
    %18 = vector.shape_cast %17 : vector<2xf32> to vector<2x1xf32>
    %cst_14 = arith.constant 1.000000e-24 : f32
    %19 = vector.broadcast %cst_14 : f32 to vector<2x1xf32>
    %20 = arith.maximumf %18, %19 : vector<2x1xf32>
    %21 = math.rsqrt %20 : vector<2x1xf32>
    %22 = vector.broadcast %21 : vector<2x1xf32> to vector<2x32xf32>
    %23 = arith.mulf %15, %22 : vector<2x32xf32>
    %c0_15 = arith.constant 0 : index
    %c0_16 = arith.constant 0 : index
    %24 = vector.load %arg32[%c0_15, %c0_16] : memref<32x32xbf16, #tpu.memory_space<vmem>>, vector<32x32xbf16>
    %c0_17 = arith.constant 0 : index
    %c0_18 = arith.constant 0 : index
    %25 = vector.load %arg33[%c0_17, %c0_18] : memref<1x32xf32, #tpu.memory_space<vmem>>, vector<1x32xf32>
    %26 = arith.truncf %23 : vector<2x32xf32> to vector<2x32xbf16>
    %cst_19 = arith.constant dense<0.000000e+00> : vector<2x32xf32>
    %27 = tpu.matmul %26, %24, %cst_19 {dimension_numbers = #tpu.dot_dimension_numbers<[1], [0], [0], [1], [0, 0, 1, 1], [], []>} : vector<2x32xbf16>, vector<32x32xbf16>, vector<2x32xf32> -> vector<2x32xf32>
    %28 = vector.broadcast %25 : vector<1x32xf32> to vector<2x32xf32>
    %29 = arith.addf %27, %28 : vector<2x32xf32>
    %cst_20 = arith.constant 0.000000e+00 : f32
    %30 = vector.broadcast %cst_20 : f32 to vector<2x32xf32>
    %31 = arith.maximumf %29, %30 : vector<2x32xf32>
    %c0_21 = arith.constant 0 : index
    %c0_22 = arith.constant 0 : index
    %32 = vector.load %arg34[%c0_21, %c0_22] : memref<32x32xbf16, #tpu.memory_space<vmem>>, vector<32x32xbf16>
    %c0_23 = arith.constant 0 : index
    %c0_24 = arith.constant 0 : index
    %33 = vector.load %arg35[%c0_23, %c0_24] : memref<1x32xf32, #tpu.memory_space<vmem>>, vector<1x32xf32>
    %34 = arith.truncf %31 : vector<2x32xf32> to vector<2x32xbf16>
    %cst_25 = arith.constant dense<0.000000e+00> : vector<2x32xf32>
    %35 = tpu.matmul %34, %32, %cst_25 {dimension_numbers = #tpu.dot_dimension_numbers<[1], [0], [0], [1], [0, 0, 1, 1], [], []>} : vector<2x32xbf16>, vector<32x32xbf16>, vector<2x32xf32> -> vector<2x32xf32>
    %36 = vector.broadcast %33 : vector<1x32xf32> to vector<2x32xf32>
    %37 = arith.addf %35, %36 : vector<2x32xf32>
    %c0_26 = arith.constant 0 : index
    %c0_27 = arith.constant 0 : index
    %38 = vector.load %arg0[%c0_26, %c0_27] : memref<16x1xi32, #tpu.memory_space<vmem>>, vector<16x1xi32>
    %39 = tpu.iota {dimensions = array<i32: 1>} : vector<16x64xi32>
    %40 = vector.broadcast %38 : vector<16x1xi32> to vector<16x64xi32>
    %41 = arith.cmpi eq, %39, %40 : vector<16x64xi32>
    %42 = arith.extui %41 : vector<16x64xi1> to vector<16x64xi32>
    %43 = arith.sitofp %42 : vector<16x64xi32> to vector<16x64xf32>
    %44 = arith.truncf %43 : vector<16x64xf32> to vector<16x64xbf16>
    %c0_28 = arith.constant 0 : index
    %c0_29 = arith.constant 0 : index
    %45 = vector.load %arg3[%c0_28, %c0_29] : memref<64x32xbf16, #tpu.memory_space<vmem>>, vector<64x32xbf16>
    %cst_30 = arith.constant dense<0.000000e+00> : vector<16x32xf32>
    %46 = tpu.matmul %44, %45, %cst_30 {dimension_numbers = #tpu.dot_dimension_numbers<[1], [0], [0], [1], [0, 0, 1, 1], [], []>} : vector<16x64xbf16>, vector<64x32xbf16>, vector<16x32xf32> -> vector<16x32xf32>
    %47 = vector.shape_cast %46 : vector<16x32xf32> to vector<2x8x32xf32>
    %c0_31 = arith.constant 0 : index
    %c0_32 = arith.constant 0 : index
    %48 = vector.load %arg4[%c0_31, %c0_32] : memref<8x32xf32, #tpu.memory_space<vmem>>, vector<8x32xf32>
    %49 = vector.shape_cast %48 : vector<8x32xf32> to vector<1x8x32xf32>
    %50 = vector.broadcast %49 : vector<1x8x32xf32> to vector<2x8x32xf32>
    %51 = arith.addf %47, %50 : vector<2x8x32xf32>
    %c0_33 = arith.constant 0 : index
    %c0_34 = arith.constant 0 : index
    %c0_35 = arith.constant 0 : index
    %52 = vector.load %arg6[%c0_33, %c0_34, %c0_35] : memref<2x1x32xf32, #tpu.memory_space<vmem>>, vector<1x1x32xf32>
    %53 = vector.shape_cast %52 : vector<1x1x32xf32> to vector<1x32xf32>
    %c0_36 = arith.constant 0 : index
    %c0_37 = arith.constant 0 : index
    %c0_38 = arith.constant 0 : index
    %54 = vector.load %arg7[%c0_36, %c0_37, %c0_38] : memref<2x1x32xf32, #tpu.memory_space<vmem>>, vector<1x1x32xf32>
    %55 = vector.shape_cast %54 : vector<1x1x32xf32> to vector<1x32xf32>
    %cst_39 = arith.constant dense<0.000000e+00> : vector<2x8xf32>
    %56 = vector.multi_reduction <add>, %51, %cst_39 [2] : vector<2x8x32xf32> to vector<2x8xf32>
    %57 = vector.shape_cast %56 : vector<2x8xf32> to vector<2x8x1xf32>
    %cst_40 = arith.constant 3.200000e+01 : f32
    %58 = vector.broadcast %cst_40 : f32 to vector<2x8x1xf32>
    %59 = arith.divf %57, %58 : vector<2x8x1xf32>
    %60 = vector.broadcast %59 : vector<2x8x1xf32> to vector<2x8x32xf32>
    %61 = arith.subf %51, %60 : vector<2x8x32xf32>
    %62 = arith.mulf %61, %61 : vector<2x8x32xf32>
    %cst_41 = arith.constant dense<0.000000e+00> : vector<2x8xf32>
    %63 = vector.multi_reduction <add>, %62, %cst_41 [2] : vector<2x8x32xf32> to vector<2x8xf32>
    %64 = vector.shape_cast %63 : vector<2x8xf32> to vector<2x8x1xf32>
    %cst_42 = arith.constant 3.200000e+01 : f32
    %65 = vector.broadcast %cst_42 : f32 to vector<2x8x1xf32>
    %66 = arith.divf %64, %65 : vector<2x8x1xf32>
    %cst_43 = arith.constant 9.99999974E-6 : f32
    %67 = vector.broadcast %cst_43 : f32 to vector<2x8x1xf32>
    %68 = arith.addf %66, %67 : vector<2x8x1xf32>
    %69 = math.rsqrt %68 : vector<2x8x1xf32>
    %70 = vector.broadcast %69 : vector<2x8x1xf32> to vector<2x8x32xf32>
    %71 = arith.mulf %61, %70 : vector<2x8x32xf32>
    %72 = vector.shape_cast %53 : vector<1x32xf32> to vector<1x1x32xf32>
    %73 = vector.broadcast %72 : vector<1x1x32xf32> to vector<2x8x32xf32>
    %74 = arith.mulf %71, %73 : vector<2x8x32xf32>
    %75 = vector.shape_cast %55 : vector<1x32xf32> to vector<1x1x32xf32>
    %76 = vector.broadcast %75 : vector<1x1x32xf32> to vector<2x8x32xf32>
    %77 = arith.addf %74, %76 : vector<2x8x32xf32>
    %78 = vector.shape_cast %77 : vector<2x8x32xf32> to vector<16x32xf32>
    %c0_44 = arith.constant 0 : index
    %c0_45 = arith.constant 0 : index
    %c0_46 = arith.constant 0 : index
    %79 = vector.load %arg8[%c0_44, %c0_45, %c0_46] : memref<2x32x96xbf16, #tpu.memory_space<vmem>>, vector<1x32x96xbf16>
    %80 = vector.shape_cast %79 : vector<1x32x96xbf16> to vector<32x96xbf16>
    %c0_47 = arith.constant 0 : index
    %c0_48 = arith.constant 0 : index
    %c0_49 = arith.constant 0 : index
    %81 = vector.load %arg9[%c0_47, %c0_48, %c0_49] : memref<2x1x96xf32, #tpu.memory_space<vmem>>, vector<1x1x96xf32>
    %82 = vector.shape_cast %81 : vector<1x1x96xf32> to vector<1x96xf32>
    %83 = arith.truncf %78 : vector<16x32xf32> to vector<16x32xbf16>
    %cst_50 = arith.constant dense<0.000000e+00> : vector<16x96xf32>
    %84 = tpu.matmul %83, %80, %cst_50 {dimension_numbers = #tpu.dot_dimension_numbers<[1], [0], [0], [1], [0, 0, 1, 1], [], []>} : vector<16x32xbf16>, vector<32x96xbf16>, vector<16x96xf32> -> vector<16x96xf32>
    %85 = vector.broadcast %82 : vector<1x96xf32> to vector<16x96xf32>
    %86 = arith.addf %84, %85 : vector<16x96xf32>
    %87 = vector.shape_cast %86 : vector<16x96xf32> to vector<2x8x96xf32>
    %cst_51 = arith.constant 0.000000e+00 : f32
    %88 = vector.broadcast %cst_51 : f32 to vector<16x32xf32>
    %89 = vector.extract_strided_slice %87 {offsets = [0, 0, 0], sizes = [2, 8, 8], strides = [1, 1, 1]} : vector<2x8x96xf32> to vector<2x8x8xf32>
    %90 = vector.extract_strided_slice %87 {offsets = [0, 0, 32], sizes = [2, 8, 8], strides = [1, 1, 1]} : vector<2x8x96xf32> to vector<2x8x8xf32>
    %91 = vector.extract_strided_slice %87 {offsets = [0, 0, 64], sizes = [2, 8, 8], strides = [1, 1, 1]} : vector<2x8x96xf32> to vector<2x8x8xf32>
    "tpu.trace_start"() <{level = 10 : i32, message = "bld,bmd->blm"}> : () -> ()
    %cst_52 = arith.constant dense<0.000000e+00> : vector<2x8x8xf32>
    %92 = tpu.matmul %89, %90, %cst_52 {dimension_numbers = #tpu.dot_dimension_numbers<[2], [2], [1], [1], [0, 0, 0, 1, 1, 1], [0], [0]>} : vector<2x8x8xf32>, vector<2x8x8xf32>, vector<2x8x8xf32> -> vector<2x8x8xf32>
    "tpu.trace_stop"() : () -> ()
    %93 = vector.shape_cast %0 : vector<8x8xf32> to vector<1x8x8xf32>
    %94 = vector.broadcast %93 : vector<1x8x8xf32> to vector<2x8x8xf32>
    %95 = arith.addf %92, %94 : vector<2x8x8xf32>
    %cst_53 = arith.constant dense<0xFF800000> : vector<2x8xf32>
    %96 = vector.multi_reduction <maximumf>, %95, %cst_53 [2] : vector<2x8x8xf32> to vector<2x8xf32>
    %97 = vector.shape_cast %96 : vector<2x8xf32> to vector<2x8x1xf32>
    %98 = vector.broadcast %97 : vector<2x8x1xf32> to vector<2x8x8xf32>
    %99 = arith.subf %95, %98 : vector<2x8x8xf32>
    %100 = math.exp %99 : vector<2x8x8xf32>
    %cst_54 = arith.constant dense<0.000000e+00> : vector<2x8xf32>
    %101 = vector.multi_reduction <add>, %100, %cst_54 [2] : vector<2x8x8xf32> to vector<2x8xf32>
    %102 = vector.shape_cast %101 : vector<2x8xf32> to vector<2x8x1xf32>
    %103 = tpu.reciprocal %102 {approx = true} : vector<2x8x1xf32> -> vector<2x8x1xf32>
    %104 = vector.broadcast %103 : vector<2x8x1xf32> to vector<2x8x8xf32>
    %105 = arith.mulf %100, %104 : vector<2x8x8xf32>
    "tpu.trace_start"() <{level = 10 : i32, message = "blm,bmd->bld"}> : () -> ()
    %cst_55 = arith.constant dense<0.000000e+00> : vector<2x8x8xf32>
    %106 = tpu.matmul %105, %91, %cst_55 {dimension_numbers = #tpu.dot_dimension_numbers<[2], [1], [1], [2], [0, 0, 0, 1, 1, 2], [0], [0]>} : vector<2x8x8xf32>, vector<2x8x8xf32>, vector<2x8x8xf32> -> vector<2x8x8xf32>
    "tpu.trace_stop"() : () -> ()
    %107 = vector.shape_cast %106 : vector<2x8x8xf32> to vector<16x8xf32>
    %108 = arith.truncf %107 : vector<16x8xf32> to vector<16x8xbf16>
    %c0_56 = arith.constant 0 : index
    %c0_57 = arith.constant 0 : index
    %c0_58 = arith.constant 0 : index
    %c0_59 = arith.constant 0 : index
    %109 = vector.load %arg10[%c0_56, %c0_57, %c0_58, %c0_59] : memref<2x4x8x32xbf16, #tpu.memory_space<vmem>>, vector<1x1x8x32xbf16>
    %110 = vector.shape_cast %109 : vector<1x1x8x32xbf16> to vector<8x32xbf16>
    %cst_60 = arith.constant dense<0.000000e+00> : vector<16x32xf32>
    %111 = tpu.matmul %108, %110, %cst_60 {dimension_numbers = #tpu.dot_dimension_numbers<[1], [0], [0], [1], [0, 0, 1, 1], [], []>} : vector<16x8xbf16>, vector<8x32xbf16>, vector<16x32xf32> -> vector<16x32xf32>
    %112 = arith.addf %88, %111 : vector<16x32xf32>
    %113 = vector.extract_strided_slice %87 {offsets = [0, 0, 8], sizes = [2, 8, 8], strides = [1, 1, 1]} : vector<2x8x96xf32> to vector<2x8x8xf32>
    %114 = vector.extract_strided_slice %87 {offsets = [0, 0, 40], sizes = [2, 8, 8], strides = [1, 1, 1]} : vector<2x8x96xf32> to vector<2x8x8xf32>
    %115 = vector.extract_strided_slice %87 {offsets = [0, 0, 72], sizes = [2, 8, 8], strides = [1, 1, 1]} : vector<2x8x96xf32> to vector<2x8x8xf32>
    "tpu.trace_start"() <{level = 10 : i32, message = "bld,bmd->blm"}> : () -> ()
    %cst_61 = arith.constant dense<0.000000e+00> : vector<2x8x8xf32>
    %116 = tpu.matmul %113, %114, %cst_61 {dimension_numbers = #tpu.dot_dimension_numbers<[2], [2], [1], [1], [0, 0, 0, 1, 1, 1], [0], [0]>} : vector<2x8x8xf32>, vector<2x8x8xf32>, vector<2x8x8xf32> -> vector<2x8x8xf32>
    "tpu.trace_stop"() : () -> ()
    %117 = vector.shape_cast %0 : vector<8x8xf32> to vector<1x8x8xf32>
    %118 = vector.broadcast %117 : vector<1x8x8xf32> to vector<2x8x8xf32>
    %119 = arith.addf %116, %118 : vector<2x8x8xf32>
    %cst_62 = arith.constant dense<0xFF800000> : vector<2x8xf32>
    %120 = vector.multi_reduction <maximumf>, %119, %cst_62 [2] : vector<2x8x8xf32> to vector<2x8xf32>
    %121 = vector.shape_cast %120 : vector<2x8xf32> to vector<2x8x1xf32>
    %122 = vector.broadcast %121 : vector<2x8x1xf32> to vector<2x8x8xf32>
    %123 = arith.subf %119, %122 : vector<2x8x8xf32>
    %124 = math.exp %123 : vector<2x8x8xf32>
    %cst_63 = arith.constant dense<0.000000e+00> : vector<2x8xf32>
    %125 = vector.multi_reduction <add>, %124, %cst_63 [2] : vector<2x8x8xf32> to vector<2x8xf32>
    %126 = vector.shape_cast %125 : vector<2x8xf32> to vector<2x8x1xf32>
    %127 = tpu.reciprocal %126 {approx = true} : vector<2x8x1xf32> -> vector<2x8x1xf32>
    %128 = vector.broadcast %127 : vector<2x8x1xf32> to vector<2x8x8xf32>
    %129 = arith.mulf %124, %128 : vector<2x8x8xf32>
    "tpu.trace_start"() <{level = 10 : i32, message = "blm,bmd->bld"}> : () -> ()
    %cst_64 = arith.constant dense<0.000000e+00> : vector<2x8x8xf32>
    %130 = tpu.matmul %129, %115, %cst_64 {dimension_numbers = #tpu.dot_dimension_numbers<[2], [1], [1], [2], [0, 0, 0, 1, 1, 2], [0], [0]>} : vector<2x8x8xf32>, vector<2x8x8xf32>, vector<2x8x8xf32> -> vector<2x8x8xf32>
    "tpu.trace_stop"() : () -> ()
    %131 = vector.shape_cast %130 : vector<2x8x8xf32> to vector<16x8xf32>
    %132 = arith.truncf %131 : vector<16x8xf32> to vector<16x8xbf16>
    %c0_65 = arith.constant 0 : index
    %c1 = arith.constant 1 : index
    %c0_66 = arith.constant 0 : index
    %c0_67 = arith.constant 0 : index
    %133 = vector.load %arg10[%c0_65, %c1, %c0_66, %c0_67] : memref<2x4x8x32xbf16, #tpu.memory_space<vmem>>, vector<1x1x8x32xbf16>
    %134 = vector.shape_cast %133 : vector<1x1x8x32xbf16> to vector<8x32xbf16>
    %cst_68 = arith.constant dense<0.000000e+00> : vector<16x32xf32>
    %135 = tpu.matmul %132, %134, %cst_68 {dimension_numbers = #tpu.dot_dimension_numbers<[1], [0], [0], [1], [0, 0, 1, 1], [], []>} : vector<16x8xbf16>, vector<8x32xbf16>, vector<16x32xf32> -> vector<16x32xf32>
    %136 = arith.addf %112, %135 : vector<16x32xf32>
    %137 = vector.extract_strided_slice %87 {offsets = [0, 0, 16], sizes = [2, 8, 8], strides = [1, 1, 1]} : vector<2x8x96xf32> to vector<2x8x8xf32>
    %138 = vector.extract_strided_slice %87 {offsets = [0, 0, 48], sizes = [2, 8, 8], strides = [1, 1, 1]} : vector<2x8x96xf32> to vector<2x8x8xf32>
    %139 = vector.extract_strided_slice %87 {offsets = [0, 0, 80], sizes = [2, 8, 8], strides = [1, 1, 1]} : vector<2x8x96xf32> to vector<2x8x8xf32>
    "tpu.trace_start"() <{level = 10 : i32, message = "bld,bmd->blm"}> : () -> ()
    %cst_69 = arith.constant dense<0.000000e+00> : vector<2x8x8xf32>
    %140 = tpu.matmul %137, %138, %cst_69 {dimension_numbers = #tpu.dot_dimension_numbers<[2], [2], [1], [1], [0, 0, 0, 1, 1, 1], [0], [0]>} : vector<2x8x8xf32>, vector<2x8x8xf32>, vector<2x8x8xf32> -> vector<2x8x8xf32>
    "tpu.trace_stop"() : () -> ()
    %141 = vector.shape_cast %0 : vector<8x8xf32> to vector<1x8x8xf32>
    %142 = vector.broadcast %141 : vector<1x8x8xf32> to vector<2x8x8xf32>
    %143 = arith.addf %140, %142 : vector<2x8x8xf32>
    %cst_70 = arith.constant dense<0xFF800000> : vector<2x8xf32>
    %144 = vector.multi_reduction <maximumf>, %143, %cst_70 [2] : vector<2x8x8xf32> to vector<2x8xf32>
    %145 = vector.shape_cast %144 : vector<2x8xf32> to vector<2x8x1xf32>
    %146 = vector.broadcast %145 : vector<2x8x1xf32> to vector<2x8x8xf32>
    %147 = arith.subf %143, %146 : vector<2x8x8xf32>
    %148 = math.exp %147 : vector<2x8x8xf32>
    %cst_71 = arith.constant dense<0.000000e+00> : vector<2x8xf32>
    %149 = vector.multi_reduction <add>, %148, %cst_71 [2] : vector<2x8x8xf32> to vector<2x8xf32>
    %150 = vector.shape_cast %149 : vector<2x8xf32> to vector<2x8x1xf32>
    %151 = tpu.reciprocal %150 {approx = true} : vector<2x8x1xf32> -> vector<2x8x1xf32>
    %152 = vector.broadcast %151 : vector<2x8x1xf32> to vector<2x8x8xf32>
    %153 = arith.mulf %148, %152 : vector<2x8x8xf32>
    "tpu.trace_start"() <{level = 10 : i32, message = "blm,bmd->bld"}> : () -> ()
    %cst_72 = arith.constant dense<0.000000e+00> : vector<2x8x8xf32>
    %154 = tpu.matmul %153, %139, %cst_72 {dimension_numbers = #tpu.dot_dimension_numbers<[2], [1], [1], [2], [0, 0, 0, 1, 1, 2], [0], [0]>} : vector<2x8x8xf32>, vector<2x8x8xf32>, vector<2x8x8xf32> -> vector<2x8x8xf32>
    "tpu.trace_stop"() : () -> ()
    %155 = vector.shape_cast %154 : vector<2x8x8xf32> to vector<16x8xf32>
    %156 = arith.truncf %155 : vector<16x8xf32> to vector<16x8xbf16>
    %c0_73 = arith.constant 0 : index
    %c2 = arith.constant 2 : index
    %c0_74 = arith.constant 0 : index
    %c0_75 = arith.constant 0 : index
    %157 = vector.load %arg10[%c0_73, %c2, %c0_74, %c0_75] : memref<2x4x8x32xbf16, #tpu.memory_space<vmem>>, vector<1x1x8x32xbf16>
    %158 = vector.shape_cast %157 : vector<1x1x8x32xbf16> to vector<8x32xbf16>
    %cst_76 = arith.constant dense<0.000000e+00> : vector<16x32xf32>
    %159 = tpu.matmul %156, %158, %cst_76 {dimension_numbers = #tpu.dot_dimension_numbers<[1], [0], [0], [1], [0, 0, 1, 1], [], []>} : vector<16x8xbf16>, vector<8x32xbf16>, vector<16x32xf32> -> vector<16x32xf32>
    %160 = arith.addf %136, %159 : vector<16x32xf32>
    %161 = vector.extract_strided_slice %87 {offsets = [0, 0, 24], sizes = [2, 8, 8], strides = [1, 1, 1]} : vector<2x8x96xf32> to vector<2x8x8xf32>
    %162 = vector.extract_strided_slice %87 {offsets = [0, 0, 56], sizes = [2, 8, 8], strides = [1, 1, 1]} : vector<2x8x96xf32> to vector<2x8x8xf32>
    %163 = vector.extract_strided_slice %87 {offsets = [0, 0, 88], sizes = [2, 8, 8], strides = [1, 1, 1]} : vector<2x8x96xf32> to vector<2x8x8xf32>
    "tpu.trace_start"() <{level = 10 : i32, message = "bld,bmd->blm"}> : () -> ()
    %cst_77 = arith.constant dense<0.000000e+00> : vector<2x8x8xf32>
    %164 = tpu.matmul %161, %162, %cst_77 {dimension_numbers = #tpu.dot_dimension_numbers<[2], [2], [1], [1], [0, 0, 0, 1, 1, 1], [0], [0]>} : vector<2x8x8xf32>, vector<2x8x8xf32>, vector<2x8x8xf32> -> vector<2x8x8xf32>
    "tpu.trace_stop"() : () -> ()
    %165 = vector.shape_cast %0 : vector<8x8xf32> to vector<1x8x8xf32>
    %166 = vector.broadcast %165 : vector<1x8x8xf32> to vector<2x8x8xf32>
    %167 = arith.addf %164, %166 : vector<2x8x8xf32>
    %cst_78 = arith.constant dense<0xFF800000> : vector<2x8xf32>
    %168 = vector.multi_reduction <maximumf>, %167, %cst_78 [2] : vector<2x8x8xf32> to vector<2x8xf32>
    %169 = vector.shape_cast %168 : vector<2x8xf32> to vector<2x8x1xf32>
    %170 = vector.broadcast %169 : vector<2x8x1xf32> to vector<2x8x8xf32>
    %171 = arith.subf %167, %170 : vector<2x8x8xf32>
    %172 = math.exp %171 : vector<2x8x8xf32>
    %cst_79 = arith.constant dense<0.000000e+00> : vector<2x8xf32>
    %173 = vector.multi_reduction <add>, %172, %cst_79 [2] : vector<2x8x8xf32> to vector<2x8xf32>
    %174 = vector.shape_cast %173 : vector<2x8xf32> to vector<2x8x1xf32>
    %175 = tpu.reciprocal %174 {approx = true} : vector<2x8x1xf32> -> vector<2x8x1xf32>
    %176 = vector.broadcast %175 : vector<2x8x1xf32> to vector<2x8x8xf32>
    %177 = arith.mulf %172, %176 : vector<2x8x8xf32>
    "tpu.trace_start"() <{level = 10 : i32, message = "blm,bmd->bld"}> : () -> ()
    %cst_80 = arith.constant dense<0.000000e+00> : vector<2x8x8xf32>
    %178 = tpu.matmul %177, %163, %cst_80 {dimension_numbers = #tpu.dot_dimension_numbers<[2], [1], [1], [2], [0, 0, 0, 1, 1, 2], [0], [0]>} : vector<2x8x8xf32>, vector<2x8x8xf32>, vector<2x8x8xf32> -> vector<2x8x8xf32>
    "tpu.trace_stop"() : () -> ()
    %179 = vector.shape_cast %178 : vector<2x8x8xf32> to vector<16x8xf32>
    %180 = arith.truncf %179 : vector<16x8xf32> to vector<16x8xbf16>
    %c0_81 = arith.constant 0 : index
    %c3 = arith.constant 3 : index
    %c0_82 = arith.constant 0 : index
    %c0_83 = arith.constant 0 : index
    %181 = vector.load %arg10[%c0_81, %c3, %c0_82, %c0_83] : memref<2x4x8x32xbf16, #tpu.memory_space<vmem>>, vector<1x1x8x32xbf16>
    %182 = vector.shape_cast %181 : vector<1x1x8x32xbf16> to vector<8x32xbf16>
    %cst_84 = arith.constant dense<0.000000e+00> : vector<16x32xf32>
    %183 = tpu.matmul %180, %182, %cst_84 {dimension_numbers = #tpu.dot_dimension_numbers<[1], [0], [0], [1], [0, 0, 1, 1], [], []>} : vector<16x8xbf16>, vector<8x32xbf16>, vector<16x32xf32> -> vector<16x32xf32>
    %184 = arith.addf %160, %183 : vector<16x32xf32>
    %c0_85 = arith.constant 0 : index
    %c0_86 = arith.constant 0 : index
    %c0_87 = arith.constant 0 : index
    %185 = vector.load %arg11[%c0_85, %c0_86, %c0_87] : memref<2x1x32xf32, #tpu.memory_space<vmem>>, vector<1x1x32xf32>
    %186 = vector.shape_cast %185 : vector<1x1x32xf32> to vector<1x32xf32>
    %187 = vector.broadcast %186 : vector<1x32xf32> to vector<16x32xf32>
    %188 = arith.addf %184, %187 : vector<16x32xf32>
    %189 = vector.shape_cast %188 : vector<16x32xf32> to vector<2x8x32xf32>
    %190 = arith.addf %51, %189 : vector<2x8x32xf32>
    %c0_88 = arith.constant 0 : index
    %c0_89 = arith.constant 0 : index
    %c0_90 = arith.constant 0 : index
    %191 = vector.load %arg12[%c0_88, %c0_89, %c0_90] : memref<2x1x32xf32, #tpu.memory_space<vmem>>, vector<1x1x32xf32>
    %192 = vector.shape_cast %191 : vector<1x1x32xf32> to vector<1x32xf32>
    %c0_91 = arith.constant 0 : index
    %c0_92 = arith.constant 0 : index
    %c0_93 = arith.constant 0 : index
    %193 = vector.load %arg13[%c0_91, %c0_92, %c0_93] : memref<2x1x32xf32, #tpu.memory_space<vmem>>, vector<1x1x32xf32>
    %194 = vector.shape_cast %193 : vector<1x1x32xf32> to vector<1x32xf32>
    %cst_94 = arith.constant dense<0.000000e+00> : vector<2x8xf32>
    %195 = vector.multi_reduction <add>, %190, %cst_94 [2] : vector<2x8x32xf32> to vector<2x8xf32>
    %196 = vector.shape_cast %195 : vector<2x8xf32> to vector<2x8x1xf32>
    %cst_95 = arith.constant 3.200000e+01 : f32
    %197 = vector.broadcast %cst_95 : f32 to vector<2x8x1xf32>
    %198 = arith.divf %196, %197 : vector<2x8x1xf32>
    %199 = vector.broadcast %198 : vector<2x8x1xf32> to vector<2x8x32xf32>
    %200 = arith.subf %190, %199 : vector<2x8x32xf32>
    %201 = arith.mulf %200, %200 : vector<2x8x32xf32>
    %cst_96 = arith.constant dense<0.000000e+00> : vector<2x8xf32>
    %202 = vector.multi_reduction <add>, %201, %cst_96 [2] : vector<2x8x32xf32> to vector<2x8xf32>
    %203 = vector.shape_cast %202 : vector<2x8xf32> to vector<2x8x1xf32>
    %cst_97 = arith.constant 3.200000e+01 : f32
    %204 = vector.broadcast %cst_97 : f32 to vector<2x8x1xf32>
    %205 = arith.divf %203, %204 : vector<2x8x1xf32>
    %cst_98 = arith.constant 9.99999974E-6 : f32
    %206 = vector.broadcast %cst_98 : f32 to vector<2x8x1xf32>
    %207 = arith.addf %205, %206 : vector<2x8x1xf32>
    %208 = math.rsqrt %207 : vector<2x8x1xf32>
    %209 = vector.broadcast %208 : vector<2x8x1xf32> to vector<2x8x32xf32>
    %210 = arith.mulf %200, %209 : vector<2x8x32xf32>
    %211 = vector.shape_cast %192 : vector<1x32xf32> to vector<1x1x32xf32>
    %212 = vector.broadcast %211 : vector<1x1x32xf32> to vector<2x8x32xf32>
    %213 = arith.mulf %210, %212 : vector<2x8x32xf32>
    %214 = vector.shape_cast %194 : vector<1x32xf32> to vector<1x1x32xf32>
    %215 = vector.broadcast %214 : vector<1x1x32xf32> to vector<2x8x32xf32>
    %216 = arith.addf %213, %215 : vector<2x8x32xf32>
    %217 = vector.shape_cast %216 : vector<2x8x32xf32> to vector<16x32xf32>
    %c0_99 = arith.constant 0 : index
    %c0_100 = arith.constant 0 : index
    %c0_101 = arith.constant 0 : index
    %218 = vector.load %arg14[%c0_99, %c0_100, %c0_101] : memref<2x32x128xbf16, #tpu.memory_space<vmem>>, vector<1x32x128xbf16>
    %219 = vector.shape_cast %218 : vector<1x32x128xbf16> to vector<32x128xbf16>
    %c0_102 = arith.constant 0 : index
    %c0_103 = arith.constant 0 : index
    %c0_104 = arith.constant 0 : index
    %220 = vector.load %arg15[%c0_102, %c0_103, %c0_104] : memref<2x1x128xf32, #tpu.memory_space<vmem>>, vector<1x1x128xf32>
    %221 = vector.shape_cast %220 : vector<1x1x128xf32> to vector<1x128xf32>
    %222 = arith.truncf %217 : vector<16x32xf32> to vector<16x32xbf16>
    %cst_105 = arith.constant dense<0.000000e+00> : vector<16x128xf32>
    %223 = tpu.matmul %222, %219, %cst_105 {dimension_numbers = #tpu.dot_dimension_numbers<[1], [0], [0], [1], [0, 0, 1, 1], [], []>} : vector<16x32xbf16>, vector<32x128xbf16>, vector<16x128xf32> -> vector<16x128xf32>
    %224 = vector.broadcast %221 : vector<1x128xf32> to vector<16x128xf32>
    %225 = arith.addf %223, %224 : vector<16x128xf32>
    %cst_106 = arith.constant 1.702000e+00 : f32
    %226 = vector.broadcast %cst_106 : f32 to vector<16x128xf32>
    %227 = arith.mulf %226, %225 : vector<16x128xf32>
    %228 = arith.negf %227 : vector<16x128xf32>
    %229 = math.exp %228 : vector<16x128xf32>
    %cst_107 = arith.constant 1.000000e+00 : f32
    %230 = vector.broadcast %cst_107 : f32 to vector<16x128xf32>
    %231 = arith.addf %230, %229 : vector<16x128xf32>
    %232 = arith.divf %230, %231 : vector<16x128xf32>
    %233 = arith.mulf %225, %232 : vector<16x128xf32>
    %c0_108 = arith.constant 0 : index
    %c0_109 = arith.constant 0 : index
    %c0_110 = arith.constant 0 : index
    %234 = vector.load %arg16[%c0_108, %c0_109, %c0_110] : memref<2x128x32xbf16, #tpu.memory_space<vmem>>, vector<1x128x32xbf16>
    %235 = vector.shape_cast %234 : vector<1x128x32xbf16> to vector<128x32xbf16>
    %c0_111 = arith.constant 0 : index
    %c0_112 = arith.constant 0 : index
    %c0_113 = arith.constant 0 : index
    %236 = vector.load %arg17[%c0_111, %c0_112, %c0_113] : memref<2x1x32xf32, #tpu.memory_space<vmem>>, vector<1x1x32xf32>
    %237 = vector.shape_cast %236 : vector<1x1x32xf32> to vector<1x32xf32>
    %238 = arith.truncf %233 : vector<16x128xf32> to vector<16x128xbf16>
    %cst_114 = arith.constant dense<0.000000e+00> : vector<16x32xf32>
    %239 = tpu.matmul %238, %235, %cst_114 {dimension_numbers = #tpu.dot_dimension_numbers<[1], [0], [0], [1], [0, 0, 1, 1], [], []>} : vector<16x128xbf16>, vector<128x32xbf16>, vector<16x32xf32> -> vector<16x32xf32>
    %240 = vector.broadcast %237 : vector<1x32xf32> to vector<16x32xf32>
    %241 = arith.addf %239, %240 : vector<16x32xf32>
    %242 = vector.shape_cast %241 : vector<16x32xf32> to vector<2x8x32xf32>
    %243 = arith.addf %190, %242 : vector<2x8x32xf32>
    %c1_115 = arith.constant 1 : index
    %c0_116 = arith.constant 0 : index
    %c0_117 = arith.constant 0 : index
    %244 = vector.load %arg6[%c1_115, %c0_116, %c0_117] : memref<2x1x32xf32, #tpu.memory_space<vmem>>, vector<1x1x32xf32>
    %245 = vector.shape_cast %244 : vector<1x1x32xf32> to vector<1x32xf32>
    %c1_118 = arith.constant 1 : index
    %c0_119 = arith.constant 0 : index
    %c0_120 = arith.constant 0 : index
    %246 = vector.load %arg7[%c1_118, %c0_119, %c0_120] : memref<2x1x32xf32, #tpu.memory_space<vmem>>, vector<1x1x32xf32>
    %247 = vector.shape_cast %246 : vector<1x1x32xf32> to vector<1x32xf32>
    %cst_121 = arith.constant dense<0.000000e+00> : vector<2x8xf32>
    %248 = vector.multi_reduction <add>, %243, %cst_121 [2] : vector<2x8x32xf32> to vector<2x8xf32>
    %249 = vector.shape_cast %248 : vector<2x8xf32> to vector<2x8x1xf32>
    %cst_122 = arith.constant 3.200000e+01 : f32
    %250 = vector.broadcast %cst_122 : f32 to vector<2x8x1xf32>
    %251 = arith.divf %249, %250 : vector<2x8x1xf32>
    %252 = vector.broadcast %251 : vector<2x8x1xf32> to vector<2x8x32xf32>
    %253 = arith.subf %243, %252 : vector<2x8x32xf32>
    %254 = arith.mulf %253, %253 : vector<2x8x32xf32>
    %cst_123 = arith.constant dense<0.000000e+00> : vector<2x8xf32>
    %255 = vector.multi_reduction <add>, %254, %cst_123 [2] : vector<2x8x32xf32> to vector<2x8xf32>
    %256 = vector.shape_cast %255 : vector<2x8xf32> to vector<2x8x1xf32>
    %cst_124 = arith.constant 3.200000e+01 : f32
    %257 = vector.broadcast %cst_124 : f32 to vector<2x8x1xf32>
    %258 = arith.divf %256, %257 : vector<2x8x1xf32>
    %cst_125 = arith.constant 9.99999974E-6 : f32
    %259 = vector.broadcast %cst_125 : f32 to vector<2x8x1xf32>
    %260 = arith.addf %258, %259 : vector<2x8x1xf32>
    %261 = math.rsqrt %260 : vector<2x8x1xf32>
    %262 = vector.broadcast %261 : vector<2x8x1xf32> to vector<2x8x32xf32>
    %263 = arith.mulf %253, %262 : vector<2x8x32xf32>
    %264 = vector.shape_cast %245 : vector<1x32xf32> to vector<1x1x32xf32>
    %265 = vector.broadcast %264 : vector<1x1x32xf32> to vector<2x8x32xf32>
    %266 = arith.mulf %263, %265 : vector<2x8x32xf32>
    %267 = vector.shape_cast %247 : vector<1x32xf32> to vector<1x1x32xf32>
    %268 = vector.broadcast %267 : vector<1x1x32xf32> to vector<2x8x32xf32>
    %269 = arith.addf %266, %268 : vector<2x8x32xf32>
    %270 = vector.shape_cast %269 : vector<2x8x32xf32> to vector<16x32xf32>
    %c1_126 = arith.constant 1 : index
    %c0_127 = arith.constant 0 : index
    %c0_128 = arith.constant 0 : index
    %271 = vector.load %arg8[%c1_126, %c0_127, %c0_128] : memref<2x32x96xbf16, #tpu.memory_space<vmem>>, vector<1x32x96xbf16>
    %272 = vector.shape_cast %271 : vector<1x32x96xbf16> to vector<32x96xbf16>
    %c1_129 = arith.constant 1 : index
    %c0_130 = arith.constant 0 : index
    %c0_131 = arith.constant 0 : index
    %273 = vector.load %arg9[%c1_129, %c0_130, %c0_131] : memref<2x1x96xf32, #tpu.memory_space<vmem>>, vector<1x1x96xf32>
    %274 = vector.shape_cast %273 : vector<1x1x96xf32> to vector<1x96xf32>
    %275 = arith.truncf %270 : vector<16x32xf32> to vector<16x32xbf16>
    %cst_132 = arith.constant dense<0.000000e+00> : vector<16x96xf32>
    %276 = tpu.matmul %275, %272, %cst_132 {dimension_numbers = #tpu.dot_dimension_numbers<[1], [0], [0], [1], [0, 0, 1, 1], [], []>} : vector<16x32xbf16>, vector<32x96xbf16>, vector<16x96xf32> -> vector<16x96xf32>
    %277 = vector.broadcast %274 : vector<1x96xf32> to vector<16x96xf32>
    %278 = arith.addf %276, %277 : vector<16x96xf32>
    %279 = vector.shape_cast %278 : vector<16x96xf32> to vector<2x8x96xf32>
    %cst_133 = arith.constant 0.000000e+00 : f32
    %280 = vector.broadcast %cst_133 : f32 to vector<16x32xf32>
    %281 = vector.extract_strided_slice %279 {offsets = [0, 0, 0], sizes = [2, 8, 8], strides = [1, 1, 1]} : vector<2x8x96xf32> to vector<2x8x8xf32>
    %282 = vector.extract_strided_slice %279 {offsets = [0, 0, 32], sizes = [2, 8, 8], strides = [1, 1, 1]} : vector<2x8x96xf32> to vector<2x8x8xf32>
    %283 = vector.extract_strided_slice %279 {offsets = [0, 0, 64], sizes = [2, 8, 8], strides = [1, 1, 1]} : vector<2x8x96xf32> to vector<2x8x8xf32>
    "tpu.trace_start"() <{level = 10 : i32, message = "bld,bmd->blm"}> : () -> ()
    %cst_134 = arith.constant dense<0.000000e+00> : vector<2x8x8xf32>
    %284 = tpu.matmul %281, %282, %cst_134 {dimension_numbers = #tpu.dot_dimension_numbers<[2], [2], [1], [1], [0, 0, 0, 1, 1, 1], [0], [0]>} : vector<2x8x8xf32>, vector<2x8x8xf32>, vector<2x8x8xf32> -> vector<2x8x8xf32>
    "tpu.trace_stop"() : () -> ()
    %285 = vector.shape_cast %0 : vector<8x8xf32> to vector<1x8x8xf32>
    %286 = vector.broadcast %285 : vector<1x8x8xf32> to vector<2x8x8xf32>
    %287 = arith.addf %284, %286 : vector<2x8x8xf32>
    %cst_135 = arith.constant dense<0xFF800000> : vector<2x8xf32>
    %288 = vector.multi_reduction <maximumf>, %287, %cst_135 [2] : vector<2x8x8xf32> to vector<2x8xf32>
    %289 = vector.shape_cast %288 : vector<2x8xf32> to vector<2x8x1xf32>
    %290 = vector.broadcast %289 : vector<2x8x1xf32> to vector<2x8x8xf32>
    %291 = arith.subf %287, %290 : vector<2x8x8xf32>
    %292 = math.exp %291 : vector<2x8x8xf32>
    %cst_136 = arith.constant dense<0.000000e+00> : vector<2x8xf32>
    %293 = vector.multi_reduction <add>, %292, %cst_136 [2] : vector<2x8x8xf32> to vector<2x8xf32>
    %294 = vector.shape_cast %293 : vector<2x8xf32> to vector<2x8x1xf32>
    %295 = tpu.reciprocal %294 {approx = true} : vector<2x8x1xf32> -> vector<2x8x1xf32>
    %296 = vector.broadcast %295 : vector<2x8x1xf32> to vector<2x8x8xf32>
    %297 = arith.mulf %292, %296 : vector<2x8x8xf32>
    "tpu.trace_start"() <{level = 10 : i32, message = "blm,bmd->bld"}> : () -> ()
    %cst_137 = arith.constant dense<0.000000e+00> : vector<2x8x8xf32>
    %298 = tpu.matmul %297, %283, %cst_137 {dimension_numbers = #tpu.dot_dimension_numbers<[2], [1], [1], [2], [0, 0, 0, 1, 1, 2], [0], [0]>} : vector<2x8x8xf32>, vector<2x8x8xf32>, vector<2x8x8xf32> -> vector<2x8x8xf32>
    "tpu.trace_stop"() : () -> ()
    %299 = vector.shape_cast %298 : vector<2x8x8xf32> to vector<16x8xf32>
    %300 = arith.truncf %299 : vector<16x8xf32> to vector<16x8xbf16>
    %c1_138 = arith.constant 1 : index
    %c0_139 = arith.constant 0 : index
    %c0_140 = arith.constant 0 : index
    %c0_141 = arith.constant 0 : index
    %301 = vector.load %arg10[%c1_138, %c0_139, %c0_140, %c0_141] : memref<2x4x8x32xbf16, #tpu.memory_space<vmem>>, vector<1x1x8x32xbf16>
    %302 = vector.shape_cast %301 : vector<1x1x8x32xbf16> to vector<8x32xbf16>
    %cst_142 = arith.constant dense<0.000000e+00> : vector<16x32xf32>
    %303 = tpu.matmul %300, %302, %cst_142 {dimension_numbers = #tpu.dot_dimension_numbers<[1], [0], [0], [1], [0, 0, 1, 1], [], []>} : vector<16x8xbf16>, vector<8x32xbf16>, vector<16x32xf32> -> vector<16x32xf32>
    %304 = arith.addf %280, %303 : vector<16x32xf32>
    %305 = vector.extract_strided_slice %279 {offsets = [0, 0, 8], sizes = [2, 8, 8], strides = [1, 1, 1]} : vector<2x8x96xf32> to vector<2x8x8xf32>
    %306 = vector.extract_strided_slice %279 {offsets = [0, 0, 40], sizes = [2, 8, 8], strides = [1, 1, 1]} : vector<2x8x96xf32> to vector<2x8x8xf32>
    %307 = vector.extract_strided_slice %279 {offsets = [0, 0, 72], sizes = [2, 8, 8], strides = [1, 1, 1]} : vector<2x8x96xf32> to vector<2x8x8xf32>
    "tpu.trace_start"() <{level = 10 : i32, message = "bld,bmd->blm"}> : () -> ()
    %cst_143 = arith.constant dense<0.000000e+00> : vector<2x8x8xf32>
    %308 = tpu.matmul %305, %306, %cst_143 {dimension_numbers = #tpu.dot_dimension_numbers<[2], [2], [1], [1], [0, 0, 0, 1, 1, 1], [0], [0]>} : vector<2x8x8xf32>, vector<2x8x8xf32>, vector<2x8x8xf32> -> vector<2x8x8xf32>
    "tpu.trace_stop"() : () -> ()
    %309 = vector.shape_cast %0 : vector<8x8xf32> to vector<1x8x8xf32>
    %310 = vector.broadcast %309 : vector<1x8x8xf32> to vector<2x8x8xf32>
    %311 = arith.addf %308, %310 : vector<2x8x8xf32>
    %cst_144 = arith.constant dense<0xFF800000> : vector<2x8xf32>
    %312 = vector.multi_reduction <maximumf>, %311, %cst_144 [2] : vector<2x8x8xf32> to vector<2x8xf32>
    %313 = vector.shape_cast %312 : vector<2x8xf32> to vector<2x8x1xf32>
    %314 = vector.broadcast %313 : vector<2x8x1xf32> to vector<2x8x8xf32>
    %315 = arith.subf %311, %314 : vector<2x8x8xf32>
    %316 = math.exp %315 : vector<2x8x8xf32>
    %cst_145 = arith.constant dense<0.000000e+00> : vector<2x8xf32>
    %317 = vector.multi_reduction <add>, %316, %cst_145 [2] : vector<2x8x8xf32> to vector<2x8xf32>
    %318 = vector.shape_cast %317 : vector<2x8xf32> to vector<2x8x1xf32>
    %319 = tpu.reciprocal %318 {approx = true} : vector<2x8x1xf32> -> vector<2x8x1xf32>
    %320 = vector.broadcast %319 : vector<2x8x1xf32> to vector<2x8x8xf32>
    %321 = arith.mulf %316, %320 : vector<2x8x8xf32>
    "tpu.trace_start"() <{level = 10 : i32, message = "blm,bmd->bld"}> : () -> ()
    %cst_146 = arith.constant dense<0.000000e+00> : vector<2x8x8xf32>
    %322 = tpu.matmul %321, %307, %cst_146 {dimension_numbers = #tpu.dot_dimension_numbers<[2], [1], [1], [2], [0, 0, 0, 1, 1, 2], [0], [0]>} : vector<2x8x8xf32>, vector<2x8x8xf32>, vector<2x8x8xf32> -> vector<2x8x8xf32>
    "tpu.trace_stop"() : () -> ()
    %323 = vector.shape_cast %322 : vector<2x8x8xf32> to vector<16x8xf32>
    %324 = arith.truncf %323 : vector<16x8xf32> to vector<16x8xbf16>
    %c1_147 = arith.constant 1 : index
    %c1_148 = arith.constant 1 : index
    %c0_149 = arith.constant 0 : index
    %c0_150 = arith.constant 0 : index
    %325 = vector.load %arg10[%c1_147, %c1_148, %c0_149, %c0_150] : memref<2x4x8x32xbf16, #tpu.memory_space<vmem>>, vector<1x1x8x32xbf16>
    %326 = vector.shape_cast %325 : vector<1x1x8x32xbf16> to vector<8x32xbf16>
    %cst_151 = arith.constant dense<0.000000e+00> : vector<16x32xf32>
    %327 = tpu.matmul %324, %326, %cst_151 {dimension_numbers = #tpu.dot_dimension_numbers<[1], [0], [0], [1], [0, 0, 1, 1], [], []>} : vector<16x8xbf16>, vector<8x32xbf16>, vector<16x32xf32> -> vector<16x32xf32>
    %328 = arith.addf %304, %327 : vector<16x32xf32>
    %329 = vector.extract_strided_slice %279 {offsets = [0, 0, 16], sizes = [2, 8, 8], strides = [1, 1, 1]} : vector<2x8x96xf32> to vector<2x8x8xf32>
    %330 = vector.extract_strided_slice %279 {offsets = [0, 0, 48], sizes = [2, 8, 8], strides = [1, 1, 1]} : vector<2x8x96xf32> to vector<2x8x8xf32>
    %331 = vector.extract_strided_slice %279 {offsets = [0, 0, 80], sizes = [2, 8, 8], strides = [1, 1, 1]} : vector<2x8x96xf32> to vector<2x8x8xf32>
    "tpu.trace_start"() <{level = 10 : i32, message = "bld,bmd->blm"}> : () -> ()
    %cst_152 = arith.constant dense<0.000000e+00> : vector<2x8x8xf32>
    %332 = tpu.matmul %329, %330, %cst_152 {dimension_numbers = #tpu.dot_dimension_numbers<[2], [2], [1], [1], [0, 0, 0, 1, 1, 1], [0], [0]>} : vector<2x8x8xf32>, vector<2x8x8xf32>, vector<2x8x8xf32> -> vector<2x8x8xf32>
    "tpu.trace_stop"() : () -> ()
    %333 = vector.shape_cast %0 : vector<8x8xf32> to vector<1x8x8xf32>
    %334 = vector.broadcast %333 : vector<1x8x8xf32> to vector<2x8x8xf32>
    %335 = arith.addf %332, %334 : vector<2x8x8xf32>
    %cst_153 = arith.constant dense<0xFF800000> : vector<2x8xf32>
    %336 = vector.multi_reduction <maximumf>, %335, %cst_153 [2] : vector<2x8x8xf32> to vector<2x8xf32>
    %337 = vector.shape_cast %336 : vector<2x8xf32> to vector<2x8x1xf32>
    %338 = vector.broadcast %337 : vector<2x8x1xf32> to vector<2x8x8xf32>
    %339 = arith.subf %335, %338 : vector<2x8x8xf32>
    %340 = math.exp %339 : vector<2x8x8xf32>
    %cst_154 = arith.constant dense<0.000000e+00> : vector<2x8xf32>
    %341 = vector.multi_reduction <add>, %340, %cst_154 [2] : vector<2x8x8xf32> to vector<2x8xf32>
    %342 = vector.shape_cast %341 : vector<2x8xf32> to vector<2x8x1xf32>
    %343 = tpu.reciprocal %342 {approx = true} : vector<2x8x1xf32> -> vector<2x8x1xf32>
    %344 = vector.broadcast %343 : vector<2x8x1xf32> to vector<2x8x8xf32>
    %345 = arith.mulf %340, %344 : vector<2x8x8xf32>
    "tpu.trace_start"() <{level = 10 : i32, message = "blm,bmd->bld"}> : () -> ()
    %cst_155 = arith.constant dense<0.000000e+00> : vector<2x8x8xf32>
    %346 = tpu.matmul %345, %331, %cst_155 {dimension_numbers = #tpu.dot_dimension_numbers<[2], [1], [1], [2], [0, 0, 0, 1, 1, 2], [0], [0]>} : vector<2x8x8xf32>, vector<2x8x8xf32>, vector<2x8x8xf32> -> vector<2x8x8xf32>
    "tpu.trace_stop"() : () -> ()
    %347 = vector.shape_cast %346 : vector<2x8x8xf32> to vector<16x8xf32>
    %348 = arith.truncf %347 : vector<16x8xf32> to vector<16x8xbf16>
    %c1_156 = arith.constant 1 : index
    %c2_157 = arith.constant 2 : index
    %c0_158 = arith.constant 0 : index
    %c0_159 = arith.constant 0 : index
    %349 = vector.load %arg10[%c1_156, %c2_157, %c0_158, %c0_159] : memref<2x4x8x32xbf16, #tpu.memory_space<vmem>>, vector<1x1x8x32xbf16>
    %350 = vector.shape_cast %349 : vector<1x1x8x32xbf16> to vector<8x32xbf16>
    %cst_160 = arith.constant dense<0.000000e+00> : vector<16x32xf32>
    %351 = tpu.matmul %348, %350, %cst_160 {dimension_numbers = #tpu.dot_dimension_numbers<[1], [0], [0], [1], [0, 0, 1, 1], [], []>} : vector<16x8xbf16>, vector<8x32xbf16>, vector<16x32xf32> -> vector<16x32xf32>
    %352 = arith.addf %328, %351 : vector<16x32xf32>
    %353 = vector.extract_strided_slice %279 {offsets = [0, 0, 24], sizes = [2, 8, 8], strides = [1, 1, 1]} : vector<2x8x96xf32> to vector<2x8x8xf32>
    %354 = vector.extract_strided_slice %279 {offsets = [0, 0, 56], sizes = [2, 8, 8], strides = [1, 1, 1]} : vector<2x8x96xf32> to vector<2x8x8xf32>
    %355 = vector.extract_strided_slice %279 {offsets = [0, 0, 88], sizes = [2, 8, 8], strides = [1, 1, 1]} : vector<2x8x96xf32> to vector<2x8x8xf32>
    "tpu.trace_start"() <{level = 10 : i32, message = "bld,bmd->blm"}> : () -> ()
    %cst_161 = arith.constant dense<0.000000e+00> : vector<2x8x8xf32>
    %356 = tpu.matmul %353, %354, %cst_161 {dimension_numbers = #tpu.dot_dimension_numbers<[2], [2], [1], [1], [0, 0, 0, 1, 1, 1], [0], [0]>} : vector<2x8x8xf32>, vector<2x8x8xf32>, vector<2x8x8xf32> -> vector<2x8x8xf32>
    "tpu.trace_stop"() : () -> ()
    %357 = vector.shape_cast %0 : vector<8x8xf32> to vector<1x8x8xf32>
    %358 = vector.broadcast %357 : vector<1x8x8xf32> to vector<2x8x8xf32>
    %359 = arith.addf %356, %358 : vector<2x8x8xf32>
    %cst_162 = arith.constant dense<0xFF800000> : vector<2x8xf32>
    %360 = vector.multi_reduction <maximumf>, %359, %cst_162 [2] : vector<2x8x8xf32> to vector<2x8xf32>
    %361 = vector.shape_cast %360 : vector<2x8xf32> to vector<2x8x1xf32>
    %362 = vector.broadcast %361 : vector<2x8x1xf32> to vector<2x8x8xf32>
    %363 = arith.subf %359, %362 : vector<2x8x8xf32>
    %364 = math.exp %363 : vector<2x8x8xf32>
    %cst_163 = arith.constant dense<0.000000e+00> : vector<2x8xf32>
    %365 = vector.multi_reduction <add>, %364, %cst_163 [2] : vector<2x8x8xf32> to vector<2x8xf32>
    %366 = vector.shape_cast %365 : vector<2x8xf32> to vector<2x8x1xf32>
    %367 = tpu.reciprocal %366 {approx = true} : vector<2x8x1xf32> -> vector<2x8x1xf32>
    %368 = vector.broadcast %367 : vector<2x8x1xf32> to vector<2x8x8xf32>
    %369 = arith.mulf %364, %368 : vector<2x8x8xf32>
    "tpu.trace_start"() <{level = 10 : i32, message = "blm,bmd->bld"}> : () -> ()
    %cst_164 = arith.constant dense<0.000000e+00> : vector<2x8x8xf32>
    %370 = tpu.matmul %369, %355, %cst_164 {dimension_numbers = #tpu.dot_dimension_numbers<[2], [1], [1], [2], [0, 0, 0, 1, 1, 2], [0], [0]>} : vector<2x8x8xf32>, vector<2x8x8xf32>, vector<2x8x8xf32> -> vector<2x8x8xf32>
    "tpu.trace_stop"() : () -> ()
    %371 = vector.shape_cast %370 : vector<2x8x8xf32> to vector<16x8xf32>
    %372 = arith.truncf %371 : vector<16x8xf32> to vector<16x8xbf16>
    %c1_165 = arith.constant 1 : index
    %c3_166 = arith.constant 3 : index
    %c0_167 = arith.constant 0 : index
    %c0_168 = arith.constant 0 : index
    %373 = vector.load %arg10[%c1_165, %c3_166, %c0_167, %c0_168] : memref<2x4x8x32xbf16, #tpu.memory_space<vmem>>, vector<1x1x8x32xbf16>
    %374 = vector.shape_cast %373 : vector<1x1x8x32xbf16> to vector<8x32xbf16>
    %cst_169 = arith.constant dense<0.000000e+00> : vector<16x32xf32>
    %375 = tpu.matmul %372, %374, %cst_169 {dimension_numbers = #tpu.dot_dimension_numbers<[1], [0], [0], [1], [0, 0, 1, 1], [], []>} : vector<16x8xbf16>, vector<8x32xbf16>, vector<16x32xf32> -> vector<16x32xf32>
    %376 = arith.addf %352, %375 : vector<16x32xf32>
    %c1_170 = arith.constant 1 : index
    %c0_171 = arith.constant 0 : index
    %c0_172 = arith.constant 0 : index
    %377 = vector.load %arg11[%c1_170, %c0_171, %c0_172] : memref<2x1x32xf32, #tpu.memory_space<vmem>>, vector<1x1x32xf32>
    %378 = vector.shape_cast %377 : vector<1x1x32xf32> to vector<1x32xf32>
    %379 = vector.broadcast %378 : vector<1x32xf32> to vector<16x32xf32>
    %380 = arith.addf %376, %379 : vector<16x32xf32>
    %381 = vector.shape_cast %380 : vector<16x32xf32> to vector<2x8x32xf32>
    %382 = arith.addf %243, %381 : vector<2x8x32xf32>
    %c1_173 = arith.constant 1 : index
    %c0_174 = arith.constant 0 : index
    %c0_175 = arith.constant 0 : index
    %383 = vector.load %arg12[%c1_173, %c0_174, %c0_175] : memref<2x1x32xf32, #tpu.memory_space<vmem>>, vector<1x1x32xf32>
    %384 = vector.shape_cast %383 : vector<1x1x32xf32> to vector<1x32xf32>
    %c1_176 = arith.constant 1 : index
    %c0_177 = arith.constant 0 : index
    %c0_178 = arith.constant 0 : index
    %385 = vector.load %arg13[%c1_176, %c0_177, %c0_178] : memref<2x1x32xf32, #tpu.memory_space<vmem>>, vector<1x1x32xf32>
    %386 = vector.shape_cast %385 : vector<1x1x32xf32> to vector<1x32xf32>
    %cst_179 = arith.constant dense<0.000000e+00> : vector<2x8xf32>
    %387 = vector.multi_reduction <add>, %382, %cst_179 [2] : vector<2x8x32xf32> to vector<2x8xf32>
    %388 = vector.shape_cast %387 : vector<2x8xf32> to vector<2x8x1xf32>
    %cst_180 = arith.constant 3.200000e+01 : f32
    %389 = vector.broadcast %cst_180 : f32 to vector<2x8x1xf32>
    %390 = arith.divf %388, %389 : vector<2x8x1xf32>
    %391 = vector.broadcast %390 : vector<2x8x1xf32> to vector<2x8x32xf32>
    %392 = arith.subf %382, %391 : vector<2x8x32xf32>
    %393 = arith.mulf %392, %392 : vector<2x8x32xf32>
    %cst_181 = arith.constant dense<0.000000e+00> : vector<2x8xf32>
    %394 = vector.multi_reduction <add>, %393, %cst_181 [2] : vector<2x8x32xf32> to vector<2x8xf32>
    %395 = vector.shape_cast %394 : vector<2x8xf32> to vector<2x8x1xf32>
    %cst_182 = arith.constant 3.200000e+01 : f32
    %396 = vector.broadcast %cst_182 : f32 to vector<2x8x1xf32>
    %397 = arith.divf %395, %396 : vector<2x8x1xf32>
    %cst_183 = arith.constant 9.99999974E-6 : f32
    %398 = vector.broadcast %cst_183 : f32 to vector<2x8x1xf32>
    %399 = arith.addf %397, %398 : vector<2x8x1xf32>
    %400 = math.rsqrt %399 : vector<2x8x1xf32>
    %401 = vector.broadcast %400 : vector<2x8x1xf32> to vector<2x8x32xf32>
    %402 = arith.mulf %392, %401 : vector<2x8x32xf32>
    %403 = vector.shape_cast %384 : vector<1x32xf32> to vector<1x1x32xf32>
    %404 = vector.broadcast %403 : vector<1x1x32xf32> to vector<2x8x32xf32>
    %405 = arith.mulf %402, %404 : vector<2x8x32xf32>
    %406 = vector.shape_cast %386 : vector<1x32xf32> to vector<1x1x32xf32>
    %407 = vector.broadcast %406 : vector<1x1x32xf32> to vector<2x8x32xf32>
    %408 = arith.addf %405, %407 : vector<2x8x32xf32>
    %409 = vector.shape_cast %408 : vector<2x8x32xf32> to vector<16x32xf32>
    %c1_184 = arith.constant 1 : index
    %c0_185 = arith.constant 0 : index
    %c0_186 = arith.constant 0 : index
    %410 = vector.load %arg14[%c1_184, %c0_185, %c0_186] : memref<2x32x128xbf16, #tpu.memory_space<vmem>>, vector<1x32x128xbf16>
    %411 = vector.shape_cast %410 : vector<1x32x128xbf16> to vector<32x128xbf16>
    %c1_187 = arith.constant 1 : index
    %c0_188 = arith.constant 0 : index
    %c0_189 = arith.constant 0 : index
    %412 = vector.load %arg15[%c1_187, %c0_188, %c0_189] : memref<2x1x128xf32, #tpu.memory_space<vmem>>, vector<1x1x128xf32>
    %413 = vector.shape_cast %412 : vector<1x1x128xf32> to vector<1x128xf32>
    %414 = arith.truncf %409 : vector<16x32xf32> to vector<16x32xbf16>
    %cst_190 = arith.constant dense<0.000000e+00> : vector<16x128xf32>
    %415 = tpu.matmul %414, %411, %cst_190 {dimension_numbers = #tpu.dot_dimension_numbers<[1], [0], [0], [1], [0, 0, 1, 1], [], []>} : vector<16x32xbf16>, vector<32x128xbf16>, vector<16x128xf32> -> vector<16x128xf32>
    %416 = vector.broadcast %413 : vector<1x128xf32> to vector<16x128xf32>
    %417 = arith.addf %415, %416 : vector<16x128xf32>
    %cst_191 = arith.constant 1.702000e+00 : f32
    %418 = vector.broadcast %cst_191 : f32 to vector<16x128xf32>
    %419 = arith.mulf %418, %417 : vector<16x128xf32>
    %420 = arith.negf %419 : vector<16x128xf32>
    %421 = math.exp %420 : vector<16x128xf32>
    %cst_192 = arith.constant 1.000000e+00 : f32
    %422 = vector.broadcast %cst_192 : f32 to vector<16x128xf32>
    %423 = arith.addf %422, %421 : vector<16x128xf32>
    %424 = arith.divf %422, %423 : vector<16x128xf32>
    %425 = arith.mulf %417, %424 : vector<16x128xf32>
    %c1_193 = arith.constant 1 : index
    %c0_194 = arith.constant 0 : index
    %c0_195 = arith.constant 0 : index
    %426 = vector.load %arg16[%c1_193, %c0_194, %c0_195] : memref<2x128x32xbf16, #tpu.memory_space<vmem>>, vector<1x128x32xbf16>
    %427 = vector.shape_cast %426 : vector<1x128x32xbf16> to vector<128x32xbf16>
    %c1_196 = arith.constant 1 : index
    %c0_197 = arith.constant 0 : index
    %c0_198 = arith.constant 0 : index
    %428 = vector.load %arg17[%c1_196, %c0_197, %c0_198] : memref<2x1x32xf32, #tpu.memory_space<vmem>>, vector<1x1x32xf32>
    %429 = vector.shape_cast %428 : vector<1x1x32xf32> to vector<1x32xf32>
    %430 = arith.truncf %425 : vector<16x128xf32> to vector<16x128xbf16>
    %cst_199 = arith.constant dense<0.000000e+00> : vector<16x32xf32>
    %431 = tpu.matmul %430, %427, %cst_199 {dimension_numbers = #tpu.dot_dimension_numbers<[1], [0], [0], [1], [0, 0, 1, 1], [], []>} : vector<16x128xbf16>, vector<128x32xbf16>, vector<16x32xf32> -> vector<16x32xf32>
    %432 = vector.broadcast %429 : vector<1x32xf32> to vector<16x32xf32>
    %433 = arith.addf %431, %432 : vector<16x32xf32>
    %434 = vector.shape_cast %433 : vector<16x32xf32> to vector<2x8x32xf32>
    %435 = arith.addf %382, %434 : vector<2x8x32xf32>
    %c0_200 = arith.constant 0 : index
    %c0_201 = arith.constant 0 : index
    %436 = vector.load %arg18[%c0_200, %c0_201] : memref<1x32xf32, #tpu.memory_space<vmem>>, vector<1x32xf32>
    %c0_202 = arith.constant 0 : index
    %c0_203 = arith.constant 0 : index
    %437 = vector.load %arg19[%c0_202, %c0_203] : memref<1x32xf32, #tpu.memory_space<vmem>>, vector<1x32xf32>
    %cst_204 = arith.constant dense<0.000000e+00> : vector<2x8xf32>
    %438 = vector.multi_reduction <add>, %435, %cst_204 [2] : vector<2x8x32xf32> to vector<2x8xf32>
    %439 = vector.shape_cast %438 : vector<2x8xf32> to vector<2x8x1xf32>
    %cst_205 = arith.constant 3.200000e+01 : f32
    %440 = vector.broadcast %cst_205 : f32 to vector<2x8x1xf32>
    %441 = arith.divf %439, %440 : vector<2x8x1xf32>
    %442 = vector.broadcast %441 : vector<2x8x1xf32> to vector<2x8x32xf32>
    %443 = arith.subf %435, %442 : vector<2x8x32xf32>
    %444 = arith.mulf %443, %443 : vector<2x8x32xf32>
    %cst_206 = arith.constant dense<0.000000e+00> : vector<2x8xf32>
    %445 = vector.multi_reduction <add>, %444, %cst_206 [2] : vector<2x8x32xf32> to vector<2x8xf32>
    %446 = vector.shape_cast %445 : vector<2x8xf32> to vector<2x8x1xf32>
    %cst_207 = arith.constant 3.200000e+01 : f32
    %447 = vector.broadcast %cst_207 : f32 to vector<2x8x1xf32>
    %448 = arith.divf %446, %447 : vector<2x8x1xf32>
    %cst_208 = arith.constant 9.99999974E-6 : f32
    %449 = vector.broadcast %cst_208 : f32 to vector<2x8x1xf32>
    %450 = arith.addf %448, %449 : vector<2x8x1xf32>
    %451 = math.rsqrt %450 : vector<2x8x1xf32>
    %452 = vector.broadcast %451 : vector<2x8x1xf32> to vector<2x8x32xf32>
    %453 = arith.mulf %443, %452 : vector<2x8x32xf32>
    %454 = vector.shape_cast %436 : vector<1x32xf32> to vector<1x1x32xf32>
    %455 = vector.broadcast %454 : vector<1x1x32xf32> to vector<2x8x32xf32>
    %456 = arith.mulf %453, %455 : vector<2x8x32xf32>
    %457 = vector.shape_cast %437 : vector<1x32xf32> to vector<1x1x32xf32>
    %458 = vector.broadcast %457 : vector<1x1x32xf32> to vector<2x8x32xf32>
    %459 = arith.addf %456, %458 : vector<2x8x32xf32>
    %460 = vector.shape_cast %459 : vector<2x8x32xf32> to vector<16x32xf32>
    %461 = tpu.iota {dimensions = array<i32: 0>} : vector<2x16xi32>
    %462 = tpu.iota {dimensions = array<i32: 1>} : vector<2x16xi32>
    %c8_i32 = arith.constant 8 : i32
    %463 = vector.broadcast %c8_i32 : i32 to vector<2x16xi32>
    %464 = arith.muli %461, %463 : vector<2x16xi32>
    %c0_209 = arith.constant 0 : index
    %c0_210 = arith.constant 0 : index
    %465 = vector.load %arg1[%c0_209, %c0_210] : memref<2x1xi32, #tpu.memory_space<vmem>>, vector<2x1xi32>
    %466 = vector.broadcast %465 : vector<2x1xi32> to vector<2x16xi32>
    %467 = arith.addi %464, %466 : vector<2x16xi32>
    %468 = arith.cmpi eq, %462, %467 : vector<2x16xi32>
    %469 = arith.extui %468 : vector<2x16xi1> to vector<2x16xi32>
    %470 = arith.sitofp %469 : vector<2x16xi32> to vector<2x16xf32>
    %cst_211 = arith.constant dense<0.000000e+00> : vector<2x32xf32>
    %471 = tpu.matmul %470, %460, %cst_211 {dimension_numbers = #tpu.dot_dimension_numbers<[1], [0], [0], [1], [0, 0, 1, 1], [], []>} : vector<2x16xf32>, vector<16x32xf32>, vector<2x32xf32> -> vector<2x32xf32>
    %c0_212 = arith.constant 0 : index
    %c0_213 = arith.constant 0 : index
    %472 = vector.load %arg20[%c0_212, %c0_213] : memref<32x32xbf16, #tpu.memory_space<vmem>>, vector<32x32xbf16>
    %c0_214 = arith.constant 0 : index
    %c0_215 = arith.constant 0 : index
    %473 = vector.load %arg21[%c0_214, %c0_215] : memref<1x32xf32, #tpu.memory_space<vmem>>, vector<1x32xf32>
    %474 = arith.truncf %471 : vector<2x32xf32> to vector<2x32xbf16>
    %cst_216 = arith.constant dense<0.000000e+00> : vector<2x32xf32>
    %475 = tpu.matmul %474, %472, %cst_216 {dimension_numbers = #tpu.dot_dimension_numbers<[1], [0], [0], [1], [0, 0, 1, 1], [], []>} : vector<2x32xbf16>, vector<32x32xbf16>, vector<2x32xf32> -> vector<2x32xf32>
    %476 = vector.broadcast %473 : vector<1x32xf32> to vector<2x32xf32>
    %477 = arith.addf %475, %476 : vector<2x32xf32>
    %cst_217 = arith.constant 0.000000e+00 : f32
    %478 = vector.broadcast %cst_217 : f32 to vector<2x32xf32>
    %479 = arith.maximumf %477, %478 : vector<2x32xf32>
    %c0_218 = arith.constant 0 : index
    %c0_219 = arith.constant 0 : index
    %480 = vector.load %arg22[%c0_218, %c0_219] : memref<32x32xbf16, #tpu.memory_space<vmem>>, vector<32x32xbf16>
    %c0_220 = arith.constant 0 : index
    %c0_221 = arith.constant 0 : index
    %481 = vector.load %arg23[%c0_220, %c0_221] : memref<1x32xf32, #tpu.memory_space<vmem>>, vector<1x32xf32>
    %482 = arith.truncf %479 : vector<2x32xf32> to vector<2x32xbf16>
    %cst_222 = arith.constant dense<0.000000e+00> : vector<2x32xf32>
    %483 = tpu.matmul %482, %480, %cst_222 {dimension_numbers = #tpu.dot_dimension_numbers<[1], [0], [0], [1], [0, 0, 1, 1], [], []>} : vector<2x32xbf16>, vector<32x32xbf16>, vector<2x32xf32> -> vector<2x32xf32>
    %484 = vector.broadcast %481 : vector<1x32xf32> to vector<2x32xf32>
    %485 = arith.addf %483, %484 : vector<2x32xf32>
    %486 = arith.mulf %485, %485 : vector<2x32xf32>
    %cst_223 = arith.constant dense<0.000000e+00> : vector<2xf32>
    %487 = vector.multi_reduction <add>, %486, %cst_223 [1] : vector<2x32xf32> to vector<2xf32>
    %488 = vector.shape_cast %487 : vector<2xf32> to vector<2x1xf32>
    %cst_224 = arith.constant 1.000000e-24 : f32
    %489 = vector.broadcast %cst_224 : f32 to vector<2x1xf32>
    %490 = arith.maximumf %488, %489 : vector<2x1xf32>
    %491 = math.rsqrt %490 : vector<2x1xf32>
    %492 = vector.broadcast %491 : vector<2x1xf32> to vector<2x32xf32>
    %493 = arith.mulf %485, %492 : vector<2x32xf32>
    %c0_225 = arith.constant 0 : index
    %c0_226 = arith.constant 0 : index
    %494 = vector.load %arg24[%c0_225, %c0_226] : memref<32x32xbf16, #tpu.memory_space<vmem>>, vector<32x32xbf16>
    %c0_227 = arith.constant 0 : index
    %c0_228 = arith.constant 0 : index
    %495 = vector.load %arg25[%c0_227, %c0_228] : memref<1x32xf32, #tpu.memory_space<vmem>>, vector<1x32xf32>
    %496 = arith.truncf %493 : vector<2x32xf32> to vector<2x32xbf16>
    %cst_229 = arith.constant dense<0.000000e+00> : vector<2x32xf32>
    %497 = tpu.matmul %496, %494, %cst_229 {dimension_numbers = #tpu.dot_dimension_numbers<[1], [0], [0], [1], [0, 0, 1, 1], [], []>} : vector<2x32xbf16>, vector<32x32xbf16>, vector<2x32xf32> -> vector<2x32xf32>
    %498 = vector.broadcast %495 : vector<1x32xf32> to vector<2x32xf32>
    %499 = arith.addf %497, %498 : vector<2x32xf32>
    %cst_230 = arith.constant 0.000000e+00 : f32
    %500 = vector.broadcast %cst_230 : f32 to vector<2x32xf32>
    %501 = arith.maximumf %499, %500 : vector<2x32xf32>
    %c0_231 = arith.constant 0 : index
    %c0_232 = arith.constant 0 : index
    %502 = vector.load %arg26[%c0_231, %c0_232] : memref<32x32xbf16, #tpu.memory_space<vmem>>, vector<32x32xbf16>
    %c0_233 = arith.constant 0 : index
    %c0_234 = arith.constant 0 : index
    %503 = vector.load %arg27[%c0_233, %c0_234] : memref<1x32xf32, #tpu.memory_space<vmem>>, vector<1x32xf32>
    %504 = arith.truncf %501 : vector<2x32xf32> to vector<2x32xbf16>
    %cst_235 = arith.constant dense<0.000000e+00> : vector<2x32xf32>
    %505 = tpu.matmul %504, %502, %cst_235 {dimension_numbers = #tpu.dot_dimension_numbers<[1], [0], [0], [1], [0, 0, 1, 1], [], []>} : vector<2x32xbf16>, vector<32x32xbf16>, vector<2x32xf32> -> vector<2x32xf32>
    %506 = vector.broadcast %503 : vector<1x32xf32> to vector<2x32xf32>
    %507 = arith.addf %505, %506 : vector<2x32xf32>
    %508 = tpu.concatenate %23, %493, %37, %507 in 1 : vector<2x32xf32>, vector<2x32xf32>, vector<2x32xf32>, vector<2x32xf32> -> vector<2x128xf32>
    %c0_236 = arith.constant 0 : index
    %c0_237 = arith.constant 0 : index
    %509 = vector.load %arg36[%c0_236, %c0_237] : memref<2x128xf32, #tpu.memory_space<vmem>>, vector<2x128xf32>
    tpu.vector_store %arg36[%c0_236, %c0_237], %508 {strides = array<i32>} : memref<2x128xf32, #tpu.memory_space<vmem>>, vector<2x128xf32>,
    return
  }
}

</mosaic_0001>

<bundles_post_ra>
// kernel: clap_forward.1
= control target key start
LH: loop header
LB: loop body
LE: loop exit
PB: predicated region body
PF: predicated region fallthrough
CT: control target
= control target key end

     0   :  { %s5860_s6 = smov 1   ;;  %s5861_s10 = smov 2   ;;  %s6738_s0 = inlined_call_operand.smem [shape: u32[37], index: -1, kind: input, shape index: {}] }
   0x1   :  { %s5925_s5 = sld [smem:[%s6738_s0]]   ;;  %s5862_s14 = smov 3  }
   0x2   :  { %s5930_s9 = sld [smem:[%s6738_s0 + %s5860_s6]]   ;;  %s5863_s18 = smov 4  }
   0x3   :  { %s5935_s13 = sld [smem:[%s6738_s0 + %s5861_s10]]   ;;  %s5864_s22 = smov 5  }
   0x4   :  { %s5940_s17 = sld [smem:[%s6738_s0 + %s5862_s14]]   ;;  %s5865_s26 = smov 6  }
   0x5   :  { %s5945_s21 = sld [smem:[%s6738_s0 + %s5863_s18]]   ;;  %s5866_s30 = smov 7  }
   0x6   :  { %s5950_s25 = sld [smem:[%s6738_s0 + %s5864_s22]]   ;;  %s5867_s4 = smov 8  }
   0x7   :  { %s5955_s29 = sld [smem:[%s6738_s0 + %s5865_s26]]   ;;  %s5868_s10 = smov 9  }
   0x8   :  { %6756 = sst [smem:[#allocation13_spill]] %s5930_s9  ;;  %s5869_s15 = smov 10  }
   0x9   :  { %s5960_s3 = sld [smem:[%s6738_s0 + %s5866_s30]]   ;;  %s5870_s20 = smov 11  }
   0xa   :  { %s5965_s8 = sld [smem:[%s6738_s0 + %s5867_s4]]   ;;  %s5871_s26 = smov 12  }
   0xb   :  { %s5970_s14 = sld [smem:[%s6738_s0 + %s5868_s10]]   ;;  %s5872_s1 = smov 13  }
   0xc   :  { %6757 = sst [smem:[#allocation14_spill]] %s5950_s25  ;;  %s5873_s7 = smov 14  }
   0xd   :  { %6758 = sst [smem:[#allocation15_spill]] %s5955_s29  ;;  %s5875_s22 = smov 16  }
   0xe   :  { %s5975_s19 = sld [smem:[%s6738_s0 + %s5869_s15]]   ;;  %s5874_s15 = smov 15  }
   0xf   :  { %6759 = sst [smem:[#allocation16_spill]] %s5960_s3  ;;  %s5876_s28 = smov 17  }
  0x10   :  { %6760 = sst [smem:[#allocation17_spill]] %s5965_s8 }
  0x11   :  { %6761 = sst [smem:[#allocation18_spill]] %s5970_s14 }
  0x12   :  { %s5980_s24 = sld [smem:[%s6738_s0 + %s5870_s20]]  }
  0x13   :  { %s5985_s30 = sld [smem:[%s6738_s0 + %s5871_s26]]  }
  0x14   :  { %6762 = sst [smem:[#allocation19_spill]] %s5975_s19 }
  0x15   :  { %s5990_s6 = sld [smem:[%s6738_s0 + %s5872_s1]]  }
  0x16   :  { %s5995_s12 = sld [smem:[%s6738_s0 + %s5873_s7]]   ;;  %s5877_s7 = smov 18  }
  0x17   :  { %s6000_s20 = sld [smem:[%s6738_s0 + %s5874_s15]]   ;;  %s5878_s15 = smov 19  }
  0x18   :  { %6763 = sst [smem:[#allocation20_spill]] %s5980_s24 }
  0x19   :  { %6764 = sst [smem:[#allocation21_spill]] %s5985_s30 }
  0x1a   :  { %s6005_s27 = sld [smem:[%s6738_s0 + %s5875_s22]]   ;;  %s5879_s22 = smov 20  }
  0x1b   :  { %6765 = sst [smem:[#allocation22_spill]] %s5990_s6 }
  0x1c   :  { %6766 = sst [smem:[#allocation23_spill]] %s5995_s12 }
  0x1d   :  { %6767 = sst [smem:[#allocation24_spill]] %s6000_s20 }
  0x1e   :  { %s6010_s4 = sld [smem:[%s6738_s0 + %s5876_s28]]   ;;  %s5880_s28 = smov 21  }
  0x1f   :  { %s6015_s9 = sld [smem:[%s6738_s0 + %s5877_s7]]   ;;  %s5881_s7 = smov 22  }
  0x20   :  { %6768 = sst [smem:[#allocation25_spill]] %s6005_s27 }
  0x21   :  { %s6020_s20 = sld [smem:[%s6738_s0 + %s5878_s15]]   ;;  %s5882_s15 = smov 23  }
  0x22   :  { %s6025_s27 = sld [smem:[%s6738_s0 + %s5879_s22]]   ;;  %s5883_s22 = smov 24  }
  0x23   :  { %s6040_s6 = sld [smem:[%s6738_s0 + %s5882_s15]]   ;;  %s5886_s15 = smov 27  }
  0x24   :  { %6769 = sst [smem:[#allocation26_spill]] %s6010_s4 }
  0x25   :  { %6770 = sst [smem:[#allocation27_spill]] %s6015_s9 }
  0x26   :  { %s6030_s4 = sld [smem:[%s6738_s0 + %s5880_s28]]   ;;  %s5884_s28 = smov 25  }
  0x27   :  { %s6035_s9 = sld [smem:[%s6738_s0 + %s5881_s7]]   ;;  %s5885_s7 = smov 26  }
  0x28   :  { %6771 = sst [smem:[#allocation28_spill]] %s6025_s27 }
  0x29   :  { %s6045_s27 = sld [smem:[%s6738_s0 + %s5883_s22]]   ;;  %s5887_s22 = smov 28  }
  0x2a   :  { %s6050_s30 = sld [smem:[%s6738_s0 + %s5884_s28]]   ;;  %s5888_s28 = smov 29  }
  0x2b   :  { %s6060_s12 = sld [smem:[%s6738_s0 + %s5886_s15]]   ;;  %s5890_s15 = smov 31  }
  0x2c   :  { %s6070_s24 = sld [smem:[%s6738_s0 + %s5888_s28]]   ;;  %s5892_s28 = smov 33  }
  0x2d   :  { %6772 = sst [smem:[#allocation29_spill]] %s6035_s9 }
  0x2e   :  { %s6055_s9 = sld [smem:[%s6738_s0 + %s5885_s7]]   ;;  %s5889_s7 = smov 30  }
  0x2f   :  { %6773 = sst [smem:[#allocation30_spill]] %s6045_s27 }
  0x30   :  { %s6065_s27 = sld [smem:[%s6738_s0 + %s5887_s22]]   ;;  %s5891_s22 = smov 32  }
  0x31   :  { %s6080_s19 = sld [smem:[%s6738_s0 + %s5890_s15]]   ;;  %s5894_s15 = smov 35  }
  0x32   :  { %s6085_s25 = sld [smem:[%s6738_s0 + %s5891_s22]]   ;;  %s5895_s22 = smov 36  }
  0x33   :  { %s6090_s14 = sld [smem:[%s6738_s0 + %s5892_s28]]  }
  0x34   :  { %6774 = sst [smem:[#allocation31_spill]] %s6055_s9 }
  0x35   :  { %s6075_s9 = sld [smem:[%s6738_s0 + %s5889_s7]]   ;;  %s5893_s7 = smov 34  }
  0x36   :  { %s6095_s3 = sld [smem:[%s6738_s0 + %s5893_s7]]  }
  0x37   :  { %s6100_s29 = sld [smem:[%s6738_s0 + %s5894_s15]]  }
  0x38   :  { %s6105_s8 = sld [smem:[%s6738_s0 + %s5895_s22]]  }
  0x39   :  { %78 = vsyncpa [#allocation3], 0 }
  0x3a   :  { %79 = vsyncpa [#allocation5], 0 }
  0x3b   :  { %80 = vsyncpa [#allocation8], 0  ;;  %s5896_s28 = smov [#allocation4]   ;;  %s5897_s2 = smov [#allocation7]  }
  0x3c   :  { %s137_s1 = sshll.u32 %s5896_s28, 4  ;;  %s161_s7 = sshll.u32 %s5897_s2, 4  ;;  %s138_s1 = int_to_ptr.vmem [resolvable:$true] %s137_s1  ;;  %s162_s7 = int_to_ptr.vmem [resolvable:$true] %s161_s7 }
  0x3d   :  { %s5744_s10 = scalar_lea.hbm %s6030_s4, 16 }
  0x3e   :  { %p5745_p0 = scmp.ne.s32.totalorder %s6030_s4, %s5744_s10  ;;  %p5748_p1 = scmp.lt.u32.totalorder %s5744_s10, %s6030_s4 }
  0x40   :  { %p5750_p2 = pnand %p5748_p1, %p5745_p0 }
  0x42   :  { %5753 = shalt.err (!%p5750_p2)
}
  0x43   :  { %s5754_s11 = scalar_lea.vmem %s138_s1, 16  ;;  %s5758_s0 = scalar_lea.vmem %s138_s1, 32 }
  0x44   :  { %p5755_p3 = scmp.ne.s32.totalorder %s138_s1, %s5754_s11  ;;  %p5759_p4 = scmp.lt.s32.totalorder %s138_s1, %s138_s1 }
  0x45   :  { %p5760_p5 = scmp.lt.s32.totalorder %s5758_s0, %s5754_s11 }
  0x47   :  { %p5761_p6 = por %p5760_p5, %p5759_p4 }
  0x49   :  { %p5762_p7 = pnand %p5761_p6, %p5755_p3 }
  0x4b   :  { %5765 = shalt.err (!%p5762_p7)
}
  0x4c   :  { %140 = dma.hbm_to_vmem [thread:$0]  %s6030_s4, 16, %s138_s1, [#allocation5]  }
  0x4d   :  { %s5766_s15 = scalar_lea.hbm %s6050_s30, 16 }
  0x4e   :  { %p5767_p8 = scmp.ne.s32.totalorder %s6050_s30, %s5766_s15  ;;  %p5770_p9 = scmp.lt.u32.totalorder %s5766_s15, %s6050_s30 }
  0x50   :  { %p5772_p10 = pnand %p5770_p9, %p5767_p8 }
  0x52   :  { %5775 = shalt.err (!%p5772_p10)
}
  0x53   :  { %s5776_s16 = scalar_lea.vmem %s162_s7, 16  ;;  %s5780_s18 = scalar_lea.vmem %s162_s7, 32 }
  0x54   :  { %p5777_p11 = scmp.ne.s32.totalorder %s162_s7, %s5776_s16  ;;  %p5781_p12 = scmp.lt.s32.totalorder %s162_s7, %s162_s7 }
  0x55   :  { %p5782_p13 = scmp.lt.s32.totalorder %s5780_s18, %s5776_s16 }
  0x57   :  { %p5783_p0 = por %p5782_p13, %p5781_p12 }
  0x59   :  { %p5784_p1 = pnand %p5783_p0, %p5777_p11 }
  0x5b   :  { %5787 = shalt.err (!%p5784_p1)
}
  0x5c   :  { %164 = dma.hbm_to_vmem [thread:$0]  %s6050_s30, 16, %s162_s7, [#allocation8]  }
  0x5d   :  { %s5898_s22 = smov [#allocation2]   ;;  %s5899_s23 = smov [#allocation6]  }
  0x5e   :  { %s125_s4 = sshll.u32 %s5898_s22, 4  ;;  %s149_s26 = sshll.u32 %s5899_s23, 4  ;;  %s126_s4 = int_to_ptr.vmem [resolvable:$true] %s125_s4  ;;  %s150_s26 = int_to_ptr.vmem [resolvable:$true] %s149_s26 }
  0x5f   :  { %s5788_s28 = scalar_lea.hbm %s6020_s20, 16 }
  0x60   :  { %p5789_p2 = scmp.ne.s32.totalorder %s6020_s20, %s5788_s28  ;;  %p5792_p3 = scmp.lt.u32.totalorder %s5788_s28, %s6020_s20 }
  0x62   :  { %p5794_p4 = pnand %p5792_p3, %p5789_p2 }
  0x64   :  { %5797 = shalt.err (!%p5794_p4)
}
  0x65   :  { %s5798_s1 = scalar_lea.vmem %s126_s4, 16  ;;  %s5802_s2 = scalar_lea.vmem %s126_s4, 32 }
  0x66   :  { %p5799_p5 = scmp.ne.s32.totalorder %s126_s4, %s5798_s1  ;;  %p5803_p6 = scmp.lt.s32.totalorder %s126_s4, %s126_s4 }
  0x67   :  { %p5804_p7 = scmp.lt.s32.totalorder %s5802_s2, %s5798_s1 }
  0x69   :  { %p5805_p8 = por %p5804_p7, %p5803_p6 }
  0x6b   :  { %p5806_p9 = pnand %p5805_p8, %p5799_p5 }
  0x6d   :  { %5809 = shalt.err (!%p5806_p9)
}
  0x6e   :  { %128 = dma.hbm_to_vmem [thread:$0]  %s6020_s20, 16, %s126_s4, [#allocation3]  }
  0x6f   :  { %s5810_s30 = scalar_lea.hbm %s6040_s6, 16 }
  0x70   :  { %p5811_p10 = scmp.ne.s32.totalorder %s6040_s6, %s5810_s30  ;;  %p5814_p11 = scmp.lt.u32.totalorder %s5810_s30, %s6040_s6 }
  0x72   :  { %p5816_p12 = pnand %p5814_p11, %p5811_p10 }
  0x74   :  { %5819 = shalt.err (!%p5816_p12)
}
  0x75   :  { %s5820_s7 = scalar_lea.vmem %s150_s26, 16  ;;  %s5824_s10 = scalar_lea.vmem %s150_s26, 32 }
  0x76   :  { %p5821_p13 = scmp.ne.s32.totalorder %s150_s26, %s5820_s7  ;;  %p5825_p0 = scmp.lt.s32.totalorder %s150_s26, %s150_s26 }
  0x77   :  { %p5826_p1 = scmp.lt.s32.totalorder %s5824_s10, %s5820_s7 }
  0x79   :  { %p5827_p2 = por %p5826_p1, %p5825_p0 }
  0x7b   :  { %p5828_p3 = pnand %p5827_p2, %p5821_p13 }
  0x7d   :  { %5831 = shalt.err (!%p5828_p3)
}
  0x7e   :  { %152 = dma.hbm_to_vmem [thread:$0]  %s6040_s6, 16, %s150_s26, [#allocation5]  }
  0x7f   :  { %s5900_s11 = smov [#allocation9]   ;;  %s5832_s0 = scalar_lea.hbm %s6060_s12, 16 }
  0x80   :  { %s173_s20 = sshll.u32 %s5900_s11, 4  ;;  %p5833_p4 = scmp.ne.s32.totalorder %s6060_s12, %s5832_s0  ;;  %s174_s20 = int_to_ptr.vmem [resolvable:$true] %s173_s20 }
  0x81   :  { %p5836_p5 = scmp.lt.u32.totalorder %s5832_s0, %s6060_s12 }
  0x83   :  { %p5838_p6 = pnand %p5836_p5, %p5833_p4 }
  0x85   :  { %5841 = shalt.err (!%p5838_p6)
}
  0x86   :  { %s5842_s15 = scalar_lea.vmem %s174_s20, 16  ;;  %s5846_s16 = scalar_lea.vmem %s174_s20, 32 }
  0x87   :  { %p5843_p7 = scmp.ne.s32.totalorder %s174_s20, %s5842_s15  ;;  %p5847_p8 = scmp.lt.s32.totalorder %s174_s20, %s174_s20 }
  0x88   :  { %p5848_p9 = scmp.lt.s32.totalorder %s5846_s16, %s5842_s15 }
  0x8a   :  { %p5849_p10 = por %p5848_p9, %p5847_p8 }
  0x8c   :  { %p5850_p11 = pnand %p5849_p10, %p5843_p7 }
  0x8e   :  { %5853 = shalt.err (!%p5850_p11)
}
  0x8f   :  { %176 = dma.hbm_to_vmem [thread:$0]  %s6060_s12, 16, %s174_s20, [#allocation8]  }
  0x90   :  { %5854 = dma.done.wait [#allocation3], 16  }
  0x91   :  { %5855 = vsyncadd [#allocation3], 4294967280 }
  0x92   :  { %5856 = dma.done.wait [#allocation5], 32  }
  0x93   :  { %5857 = vsyncadd [#allocation5], 4294967264 }
  0x94   :  { %5858 = dma.done.wait [#allocation8], 32  }
  0x95   :  { %5859 = vsyncadd [#allocation8], 4294967264  ;;  %v5901_v0 = vmov 0.0   ;;  %vm5902_vm0 = vmmov 0   ;;  %v5595_v1 = vld [vmem:[%s6065_s27] sm:$0xff]   ;;  %v5596_v2 = vld [vmem:[%s6065_s27 + $0x8] sm:$0xff]   ;;  %v492_v34 = vlaneseq }
  0x96   :  { %5170 = vmatprep.subr.bf16.mxu0 %v5901_v0  ;;  %5174 = vmatprep.mubr.msk.bf16.mxu0 %vm5902_vm0, %v5901_v0  ;;  %v210_v3 = vld [vmem:[%s5935_s13] sm:$0x3]  ;;  %vm235_vm1 = vcmask 261120   ;;  %v5598_v6 = vld [vmem:[%s6075_s9 + $0x8] sm:$0xff]   ;;  %v5903_v16 = vmov 0   ;;  %vm348_vm2 = vcmask 254976  }
  0x97   :  { %5178 = vmatprep.subr.bf16.mxu1 %v5901_v0  ;;  %5182 = vmatprep.mubr.msk.bf16.mxu1 %vm5902_vm0, %v5901_v0  ;;  %v216_v4 = vpack.c.bf16 %v210_v3, %v210_v3  ;;  %v5597_v5 = vld [vmem:[%s6075_s9] sm:$0xff]   ;;  %v491_v15 = vld [vmem:[%s5925_s5 + $0x8] sm:$0xff]  ;;  %v6168_v36 = vand.u32 127, %v492_v34  ;;  %v5603_v39 = vld [vmem:[%s5940_s17 + $0x10] sm:$0xff]   ;;  %vm539_vm5 = vcmask 523264   ;;  %s6776_s9 = sld [smem:[#allocation15_spill]] }
  0x98   :  { %5171 = vmatpush3.bf16.msra.mxu0 %v5595_v1  ;;  %5179 = vmatpush3.bf16.msra.mxu1 %v5597_v5  ;;  %v4842_v7 = vld [vmem:[%s6070_s24] ss:$0 sm:$0xff]  ;;  %v5600_v27 = vld [vmem:[%s6085_s25 + $0x8] sm:$0xff]   ;;  %v5604_v42 = vld [vmem:[%s5940_s17 + $0x18] sm:$0xff]   ;;  %s6777_s13 = sld [smem:[#allocation16_spill]]  ;;  %vm703_vm6 = vcmask 64512  }
  0x99   :  { %5172 = vmatprep.subr.bf16.mxu0 %v5901_v0  ;;  %5180 = vmatprep.subr.bf16.mxu1 %v5901_v0  ;;  %v4846_v17 = vld [vmem:[%s6080_s19] ss:$0 sm:$0xff]  ;;  %v5602_v35 = vld [vmem:[%s5940_s17 + $0x8] sm:$0xff]   ;;  %s5907_s19 = smov 88   ;;  %s5908_s24 = smov 56   ;;  %vm1367_vm7 = vcmask 1043456  }
  0x9a   :  { %5594 = vset.pattern.permute.xlu1 %v5903_v16  ;;  %5593 = vset.pattern.permute.xlu0 %v5903_v16  ;;  %v490_v25 = vld [vmem:[%s5925_s5] sm:$0xff]  ;;  %v5606_v45 = vld [vmem:[%s6095_s3 + $0x8] sm:$0xff]   ;;  %s6775_s5 = sld [smem:[#allocation17_spill]]  ;;  %s5909_s6 = smov 80   ;;  %vm4431_vm9 = vcmask 130048   ;;  %vm4796_vm10 = vcmask 785408  }
  0x9b   :  { %498 = vperm.xlu1 %5594, %v491_v15   ;;  %v5599_v26 = vld [vmem:[%s6085_s25] sm:$0xff]   ;;  %s6779_s25 = sld [smem:[#allocation14_spill]]  ;;  %s5910_s12 = smov 112  }
  0x9c   :  { %5173 = vmatpush3.bf16.msra.mxu0 %v5596_v2  ;;  %5181 = vmatpush3.bf16.msra.mxu1 %v5598_v6  ;;  %v5601_v32 = vld [vmem:[%s5940_s17] sm:$0xff]   ;;  %s6778_s17 = sld [smem:[#allocation18_spill]]  ;;  %s5911_s27 = smov 72  }
  0x9d   :  { %5186 = vmatprep.subr.bf16.mxu0 %v5901_v0  ;;  %5194 = vmatprep.subr.bf16.mxu1 %v5901_v0  ;;  %v5605_v44 = vld [vmem:[%s6095_s3] sm:$0xff]   ;;  %s5905_s3 = smov 64   ;;  %s6780_s18 = sld [smem:[#allocation19_spill]] }
  0x9e   :  { %v4850_v46 = vld [vmem:[%s6090_s14] ss:$0 sm:$0xff]  ;;  %s5906_s14 = smov 120   ;;  %s5912_s22 = smov 48  }
  0x9f   :  { %5175 = vmatmul.mubr.msk.bf16.vlgmr.msra.gmra.mrb[0].mxu0 %vm235_vm1, %v216_v4  ;;  %v584_v54 = vld [vmem:[%s5945_s21] sm:$0xff]  ;;  %s5904_s21 = smov 96   ;;  %s5913_s4 = smov 104  }
  0xa0   :  { %5190 = vmatprep.mubr.msk.bf16.mxu0 %vm5902_vm0, %v5901_v0  ;;  %5187 = vmatpush3.bf16.msra.mxu0 %v5599_v26  ;;  %s5914_s23 = smov 40   ;;  %s6781_s26 = sld [smem:[#allocation20_spill]] }
  0xa1   :  { %5188 = vmatprep.subr.bf16.mxu0 %v5901_v0  ;;  %s6782_s28 = sld [smem:[#allocation23_spill]]  ;;  %s6783_s1 = sld [smem:[#allocation21_spill]] }
  0xa2   :  { %s6784_s2 = sld [smem:[#allocation22_spill]]  ;;  %s6785_s30 = sld [smem:[#allocation25_spill]] }
  0xa3   :  { %s6786_s7 = sld [smem:[#allocation24_spill]]  ;;  %s6787_s10 = sld [smem:[#allocation26_spill]] }
  0xa4   :  { %5189 = vmatpush3.bf16.msra.mxu0 %v5600_v27  ;;  %s6788_s11 = sld [smem:[#allocation13_spill]]  ;;  %s6789_s20 = sld [smem:[#allocation27_spill]] }
  0xa5   :  { %5202 = vmatprep.subr.bf16.mxu0 %v5901_v0  ;;  %s6791_s0 = sld [smem:[#allocation29_spill]]  ;;  %s6792_s15 = sld [smem:[#allocation30_spill]] }
  0xa6   :  { %s6793_s16 = sld [smem:[#allocation31_spill]] }
 0x11a   :  { %v499_v37 = vpop.permute.xlu1 %498 }
 0x11b   :  { %vm501_vm3 = vcmp.eq.s32.totalorder %v6168_v36, %v499_v37 }
 0x11c   :  { %v4859_v40 = vsel %vm501_vm3, 1.0, %v5901_v0 }
 0x172   :  { %v273_v8 = vpop.f32.mrb[0].mxu0 }
 0x173   :  { %v274_v9 = vadd.f32 %v4842_v7, %v273_v8  ;;  %v5176_v10 = vpop.f32.mrb[1].mxu0 }
 0x174   :  { %v276_v11 = vpop.f32.mrb[2].mxu0  ;;  %v5607_v10 = vld [vmem:[%s6775_s5] sm:$0xff]  }
 0x175   :  { %v279_v12 = vmax.f32 %v274_v9, 0.0  ;;  %v5177_v13 = vpop.f32.mrb[3].mxu0  ;;  %v5608_v11 = vld [vmem:[%s6775_s5 + $0x8] sm:$0xff]  }
 0x177   :  { %v285_v14 = vpack.c.bf16 %v279_v12, %v279_v12 }
 0x179   :  { %5183 = vmatmul.mubr.msk.bf16.vlgmr.msra.gmra.mrb[0].mxu1 %vm235_vm1, %v285_v14 }
 0x17a   :  { %5198 = vmatprep.mubr.msk.bf16.mxu1 %vm5902_vm0, %v5901_v0  ;;  %5195 = vmatpush3.bf16.msra.mxu1 %v5605_v44 }
 0x17b   :  { %5196 = vmatprep.subr.bf16.mxu1 %v5901_v0 }
 0x17e   :  { %5197 = vmatpush3.bf16.msra.mxu1 %v5606_v45  ;;  %v6236_v45 = vld [vmem:[%s6779_s25] sm:$0xff] }
 0x17f   :  { %5214 = vmatprep.subr.bf16.mxu1 %v5901_v0 }
 0x24c   :  { %v341_v18 = vpop.f32.mrb[0].mxu1 }
 0x24d   :  { %v342_v19 = vadd.f32 %v4846_v17, %v341_v18  ;;  %v5184_v20 = vpop.f32.mrb[1].mxu1 }
 0x24e   :  { %v344_v21 = vpop.f32.mrb[2].mxu1 }
 0x24f   :  { %v5185_v22 = vpop.f32.mrb[3].mxu1  ;;  %v347_v23 = vmul.f32 %v342_v19, %v342_v19 }
 0x251   :  { %v349_v24 = vsel %vm348_vm2, %v347_v23, 0.0 }
 0x252   :  { %350 = vadd.xlane.f32.xlu0 %v349_v24  ;;  %v4865_v24 = vld [vmem:[%s6776_s9] ss:$0 sm:$0xff] }
 0x268   :  { %495 = vperm.xlu0 %5593, %v490_v25  }
 0x2df   :  { %v351_v28 = vpop.xlane.xlu0 %350 }
 0x2e0   :  { %v352_v29 = vmax.f32 %v351_v28, 1e-24  ;;  %v4866_v28 = vld [vmem:[%s6777_s13] ss:$0 sm:$0xff] }
 0x2e2   :  { %5639 = vrsqrt.f32 %v352_v29 }
 0x2e7   :  { %v496_v38 = vpop.permute.xlu0 %495 }
 0x2e8   :  { %vm500_vm4 = vcmp.eq.s32.totalorder %v6168_v36, %v496_v38 }
 0x2e9   :  { %v4858_v41 = vsel %vm500_vm4, 1.0, %v5901_v0 }
 0x2ea   :  { %v506_v43 = vpack.c.bf16 %v4859_v40, %v4858_v41 }
 0x2ec   :  { %v5640_v30 = vpop.eup %5639 }
 0x2ed   :  { %v6157_v31 = vmul.f32 %v5640_v30, %v342_v19 }
 0x2ef   :  { %v360_v33 = vpack.c.bf16 %v6157_v31, %v6157_v31 }
 0x2f1   :  { %5191 = vmatmul.mubr.msk.bf16.vlgmr.msra.gmra.mrb[4].mxu0 %vm235_vm1, %v360_v33 }
 0x2f2   :  { %5203 = vmatpush3.bf16.msra.mxu0 %v5601_v32  ;;  %5210 = vmatprep.mubr.msk.bf16.mxu0 %vm5902_vm0, %v5901_v0 }
 0x2f3   :  { %5204 = vmatprep.subr.bf16.mxu0 %v5901_v0 }
 0x2f6   :  { %5205 = vmatpush3.bf16.msra.mxu0 %v5602_v35  ;;  %v4867_v35 = vld [vmem:[%s6778_s17] ss:$0 sm:$0xff] }
 0x2f7   :  { %5206 = vmatprep.subr.bf16.mxu0 %v5901_v0 }
 0x2fa   :  { %5207 = vmatpush3.bf16.msra.mxu0 %v5603_v39 }
 0x2fb   :  { %5208 = vmatprep.subr.bf16.mxu0 %v5901_v0 }
 0x2fe   :  { %5209 = vmatpush3.bf16.msra.mxu0 %v5604_v42 }
 0x2ff   :  { %5232 = vmatprep.subr.mxu0 %v5901_v0 }
 0x301   :  { %5211 = vmatmul.mubr.msk.bf16.vlgmr.msra.gmra.mrb[8].mxu0 %vm539_vm5, %v506_v43 }
 0x302   :  { %5234 = vmatprep.mubr.msk.f32.mxu0 %vm5902_vm0, %v5901_v0 }
 0x3c4   :  { %v416_v47 = vpop.f32.mrb[4].mxu0 }
 0x3c5   :  { %v417_v48 = vadd.f32 %v4850_v46, %v416_v47  ;;  %v5192_v49 = vpop.f32.mrb[5].mxu0 }
 0x3c6   :  { %v419_v50 = vpop.f32.mrb[6].mxu0 }
 0x3c7   :  { %v422_v51 = vmax.f32 %v417_v48, 0.0  ;;  %v5193_v52 = vpop.f32.mrb[7].mxu0 }
 0x3c9   :  { %v428_v53 = vpack.c.bf16 %v422_v51, %v422_v51 }
 0x3cb   :  { %5199 = vmatmul.mubr.msk.bf16.vlgmr.msra.gmra.mrb[4].mxu1 %vm235_vm1, %v428_v53 }
 0x3cc   :  { %5218 = vmatprep.mubr.msk.bf16.mxu1 %vm5902_vm0, %v5901_v0  ;;  %5215 = vmatpush3.bf16.msra.mxu1 %v5607_v10 }
 0x3cd   :  { %5216 = vmatprep.subr.bf16.mxu1 %v5901_v0 }
 0x3d0   :  { %5217 = vmatpush3.bf16.msra.mxu1 %v5608_v11 }
 0x3d1   :  { %5222 = vmatprep.subr.mxu1 %v5901_v0 }
 0x3d4   :  { %v577_v55 = vpop.f32.mrb[8].mxu0 }
 0x3d5   :  { %v6191_v56 = vadd.f32 %v584_v54, %v577_v55  ;;  %v5212_v57 = vpop.f32.mrb[9].mxu0 }
 0x3d6   :  { %v580_v58 = vpop.f32.mrb[10].mxu0 }
 0x3d7   :  { %v6193_v59 = vadd.f32 %v584_v54, %v580_v58  ;;  %v5213_v60 = vpop.f32.mrb[11].mxu0  ;;  %v589_v61 = vsel %vm235_vm1, %v6191_v56, 0.0 }
 0x3d8   :  { %590 = vadd.xlane.f32.xlu1 %v589_v61 }
 0x3d9   :  { %v592_v62 = vsel %vm235_vm1, %v6193_v59, 0.0 }
 0x3dc   :  { %593 = vadd.xlane.f32.xlu1 %v592_v62 }
 0x465   :  { %v591_v63 = vpop.xlane.xlu1 %590 }
 0x466   :  { %v596_v1 = vmul.f32 0.03125, %v591_v63 }
 0x468   :  { %v598_v2 = vsub.f32 %v6191_v56, %v596_v1 }
 0x469   :  { %v594_v3 = vpop.xlane.xlu1 %593 }
 0x46a   :  { %v597_v4 = vmul.f32 0.03125, %v594_v3  ;;  %v600_v5 = vmul.f32 %v598_v2, %v598_v2 }
 0x46c   :  { %v599_v6 = vsub.f32 %v6193_v59, %v597_v4  ;;  %v602_v7 = vsel %vm235_vm1, %v600_v5, 0.0 }
 0x46d   :  { %603 = vadd.xlane.f32.xlu1 %v602_v7 }
 0x46e   :  { %v601_v8 = vmul.f32 %v599_v6, %v599_v6 }
 0x470   :  { %v605_v9 = vsel %vm235_vm1, %v601_v8, 0.0 }
 0x471   :  { %606 = vadd.xlane.f32.xlu0 %v605_v9 }
 0x49e   :  { %v6207_v12 = vpop.f32.mrb[4].mxu1 }
 0x49f   :  { %v5200_v13 = vpop.f32.mrb[5].mxu1 }
 0x4a0   :  { %v487_v14 = vpop.f32.mrb[6].mxu1 }
 0x4a1   :  { %v5201_v15 = vpop.f32.mrb[7].mxu1 }
 0x4fa   :  { %v604_v16 = vpop.xlane.xlu1 %603 }
 0x4fb   :  { %v608_v17 = vmul.f32 0.03125, %v604_v16 }
 0x4fd   :  { %v610_v18 = vadd.f32 1e-05, %v608_v17 }
 0x4fe   :  { %v607_v19 = vpop.xlane.xlu0 %606 }
 0x4ff   :  { %5641 = vrsqrt.f32 %v610_v18  ;;  %v609_v20 = vmul.f32 0.03125, %v607_v19 }
 0x501   :  { %v611_v21 = vadd.f32 1e-05, %v609_v20 }
 0x503   :  { %5643 = vrsqrt.f32 %v611_v21 }
 0x509   :  { %v5642_v22 = vpop.eup %5641 }
 0x50a   :  { %v614_v23 = vmul.f32 %v5642_v22, %v598_v2 }
 0x50c   :  { %v622_v26 = vmul.f32 %v4865_v24, %v614_v23 }
 0x50d   :  { %v5644_v25 = vpop.eup %5643 }
 0x50e   :  { %v615_v27 = vmul.f32 %v5644_v25, %v599_v6  ;;  %v630_v30 = vadd.f32 %v4866_v28, %v622_v26 }
 0x510   :  { %v623_v29 = vmul.f32 %v4865_v24, %v615_v27 }
 0x512   :  { %v631_v32 = vadd.f32 %v4866_v28, %v623_v29 }
 0x514   :  { %v637_v33 = vpack.c.bf16 %v631_v32, %v630_v30 }
 0x516   :  { %5219 = vmatmul.mubr.msk.bf16.vlgmr.msra.gmra.mrb[8].mxu1 %vm235_vm1, %v637_v33 }
 0x517   :  { %5224 = vmatprep.mubr.msk.f32.mxu1 %vm5902_vm0, %v5901_v0 }
 0x5e9   :  { %v693_v37 = vpop.f32.mrb[8].mxu1 }
 0x5ea   :  { %v6215_v38 = vadd.f32 %v4867_v35, %v693_v37  ;;  %v5220_v39 = vpop.f32.mrb[9].mxu1 }
 0x5eb   :  { %v696_v40 = vpop.f32.mrb[10].mxu1 }
 0x5ec   :  { %701 = vrot.lane.b32.xlu1 %v6215_v38, %s5904_s21  ;;  %v5221_v41 = vpop.f32.mrb[11].mxu1  ;;  %v6219_v42 = vadd.f32 %v4867_v35, %v696_v40 }
 0x5f0   :  { %779 = vrot.lane.b32.xlu1 %v6219_v42, %s5904_s21 }
 0x65e   :  { %v702_v43 = vpop.permute.xlu1 %701 }
 0x65f   :  { %5223 = vmatpush3.xpose.msk.msra.mxu1 %vm703_vm6, %v702_v43 }
 0x660   :  { %5227 = vmatprep.subr.mxu1 %v5901_v0 }
 0x662   :  { %5225 = vmatmul.mubr.msk.f32.vlgmr.msra.gmra.mrb[12].mxu1 %vm703_vm6, %v6215_v38  ;;  %v780_v44 = vpop.permute.xlu1 %779 }
 0x663   :  { %5228 = vmatpush3.xpose.msk.msra.mxu1 %vm703_vm6, %v780_v44  ;;  %5229 = vmatprep.mubr.msk.f32.mxu1 %vm5902_vm0, %v5901_v0 }
 0x664   :  { %5237 = vmatprep.subr.mxu1 %v5901_v0 }
 0x666   :  { %5230 = vmatmul.mubr.msk.f32.vlgmr.msra.gmra.mrb[14].mxu1 %vm703_vm6, %v6219_v42 }
 0x667   :  { %5239 = vmatprep.mubr.msk.f32.mxu1 %vm5902_vm0, %v5901_v0 }
 0x735   :  { %v774_v46 = vpop.f32.mrb[12].mxu1 }
 0x736   :  { %v775_v47 = vadd.f32 %v774_v46, %v6236_v45  ;;  %v5226_v48 = vpop.f32.mrb[13].mxu1 }
 0x738   :  { %v855_v49 = vsel %vm703_vm6, %v775_v47, -inf }
 0x739   :  { %v851_v50 = vpop.f32.mrb[14].mxu1  ;;  %856 = vmax.xlane.f32.xlu1 %v855_v49  ;;  %v4883_v49 = vld [vmem:[%s6780_s18 + $0x4] sm:$0xf] }
 0x73a   :  { %v852_v51 = vadd.f32 %v851_v50, %v6236_v45  ;;  %v5231_v52 = vpop.f32.mrb[15].mxu1 }
 0x73b   :  { %v1369_v52 = vsel %vm1367_vm7, %v4883_v49, 0 }
 0x73c   :  { %v858_v53 = vsel %vm703_vm6, %v852_v51, -inf }
 0x73d   :  { %859 = vmax.xlane.f32.xlu0 %v858_v53  ;;  %v1030_v53 = vld [vmem:[%s6780_s18] sm:$0xf] }
 0x74a   :  { %953 = vrot.lane.b32.xlu1 %v6219_v42, %s5905_s3 }
 0x74e   :  { %1109 = vrot.lane.b32.xlu1 %v6219_v42, %s5906_s14 }
 0x753   :  { %877 = vrot.lane.b32.xlu0 %v6215_v38, %s5905_s3 }
 0x757   :  { %1033 = vrot.lane.b32.xlu0 %v6215_v38, %s5907_s19 }
 0x75b   :  { %1111 = vrot.lane.b32.xlu0 %v6219_v42, %s5907_s19 }
 0x7c6   :  { %v857_v54 = vpop.xlane.xlu1 %856 }
 0x7c7   :  { %v861_v55 = vsub.f32 %v775_v47, %v857_v54 }
 0x7c9   :  { %v863_v57 = vmul.f32 1.442695, %v861_v55 }
 0x7ca   :  { %v860_v58 = vpop.xlane.xlu0 %859  ;;  %v954_v60 = vpop.permute.xlu1 %953 }
 0x7cb   :  { %5645 = vpow2.f32 %v863_v57  ;;  %v862_v61 = vsub.f32 %v852_v51, %v860_v58  ;;  %5238 = vmatpush3.msra.mxu1 %v954_v60  ;;  %v1416_v57 = vsel %vm1367_vm7, %v1030_v53, 0 }
 0x7cc   :  { %5247 = vmatprep.subr.mxu1 %v5901_v0 }
 0x7cd   :  { %v865_v62 = vmul.f32 1.442695, %v862_v61 }
 0x7ce   :  { %v878_v63 = vpop.permute.xlu0 %877  ;;  %v1110_v15 = vpop.permute.xlu1 %1109 }
 0x7cf   :  { %5647 = vpow2.f32 %v865_v62  ;;  %5233 = vmatpush3.msra.mxu0 %v878_v63 }
 0x7d0   :  { %5242 = vmatprep.subr.mxu0 %v5901_v0 }
 0x7d2   :  { %v1034_v5 = vpop.permute.xlu0 %1033 }
 0x7d5   :  { %v5646_v1 = vpop.eup %5645 }
 0x7d6   :  { %v867_v2 = vsel %vm703_vm6, %v5646_v1, 0.0  ;;  %v1112_v6 = vpop.permute.xlu0 %1111 }
 0x7d7   :  { %868 = vadd.xlane.f32.xlu0 %v867_v2 }
 0x7d9   :  { %v5648_v3 = vpop.eup %5647 }
 0x7da   :  { %v870_v4 = vsel %vm703_vm6, %v5648_v3, 0.0 }
 0x7db   :  { %871 = vadd.xlane.f32.xlu0 %v870_v4 }
 0x7f1   :  { %1031 = vrot.lane.b32.xlu0 %v6215_v38, %s5906_s14 }
 0x864   :  { %v869_v7 = vpop.xlane.xlu0 %868 }
 0x865   :  { %5649 = vrcp.f32 %v869_v7 }
 0x868   :  { %v872_v8 = vpop.xlane.xlu0 %871 }
 0x869   :  { %5651 = vrcp.f32 %v872_v8 }
 0x86c   :  { %v1032_v14 = vpop.permute.xlu0 %1031 }
 0x86f   :  { %v5650_v9 = vpop.eup %5649 }
 0x870   :  { %v875_v10 = vmul.f32 %v5650_v9, %v5646_v1 }
 0x872   :  { %5235 = vmatmul.mubr.msk.f32.vlgmr.msra.gmra.mrb[12].mxu0 %vm703_vm6, %v875_v10 }
 0x873   :  { %v5652_v11 = vpop.eup %5651  ;;  %5243 = vmatpush3.xpose.msk.msra.mxu0 %vm703_vm6, %v1034_v5  ;;  %5244 = vmatprep.mubr.msk.f32.mxu0 %vm5902_vm0, %v5901_v0 }
 0x874   :  { %v876_v13 = vmul.f32 %v5652_v11, %v5648_v3  ;;  %5252 = vmatprep.subr.mxu0 %v5901_v0 }
 0x876   :  { %5240 = vmatmul.mubr.msk.f32.vlgmr.msra.gmra.mrb[16].mxu1 %vm703_vm6, %v876_v13  ;;  %5245 = vmatmul.mubr.msk.f32.vlgmr.msra.gmra.mrb[14].mxu0 %vm703_vm6, %v1032_v14 }
 0x877   :  { %5248 = vmatpush3.xpose.msk.msra.mxu1 %vm703_vm6, %v1112_v6  ;;  %5249 = vmatprep.mubr.msk.f32.mxu1 %vm5902_vm0, %v5901_v0 }
 0x878   :  { %5257 = vmatprep.subr.mxu1 %v5901_v0  ;;  %5254 = vmatprep.mubr.msk.f32.mxu0 %vm5902_vm0, %v5901_v0 }
 0x87a   :  { %5250 = vmatmul.mubr.msk.f32.vlgmr.msra.gmra.mrb[18].mxu1 %vm703_vm6, %v1110_v15 }
 0x87b   :  { %5259 = vmatprep.mubr.msk.f32.mxu1 %vm5902_vm0, %v5901_v0 }
 0x945   :  { %v6274_v16 = vpop.f32.mrb[12].mxu0 }
 0x946   :  { %v5236_v17 = vpop.f32.mrb[13].mxu0 }
 0x949   :  { %v6276_v18 = vpop.f32.mrb[16].mxu1  ;;  %v1105_v19 = vpop.f32.mrb[14].mxu0 }
 0x94a   :  { %v1029_v20 = vpack.c.bf16 %v6276_v18, %v6274_v16  ;;  %v1106_v21 = vadd.f32 %v1105_v19, %v6236_v45  ;;  %v5241_v22 = vpop.f32.mrb[17].mxu1  ;;  %v5246_v23 = vpop.f32.mrb[15].mxu0 }
 0x94c   :  { %v1187_v24 = vsel %vm703_vm6, %v1106_v21, -inf }
 0x94d   :  { %1188 = vmax.xlane.f32.xlu0 %v1187_v24  ;;  %v1183_v25 = vpop.f32.mrb[18].mxu1 }
 0x94e   :  { %v1184_v26 = vadd.f32 %v1183_v25, %v6236_v45  ;;  %v5251_v27 = vpop.f32.mrb[19].mxu1 }
 0x950   :  { %v1190_v28 = vsel %vm703_vm6, %v1184_v26, -inf }
 0x951   :  { %1191 = vmax.xlane.f32.xlu1 %v1190_v28 }
 0x962   :  { %1209 = vrot.lane.b32.xlu1 %v6215_v38, %s5908_s24 }
 0x966   :  { %1539 = vrot.lane.b32.xlu1 %v6219_v42, %s5909_s6 }
 0x96a   :  { %1537 = vrot.lane.b32.xlu1 %v6219_v42, %s5910_s12 }
 0x96e   :  { %1459 = vrot.lane.b32.xlu1 %v6215_v38, %s5910_s12 }
 0x972   :  { %1843 = vrot.lane.b32.xlu1 %v6215_v38, %s5911_s27 }
 0x9da   :  { %v1189_v29 = vpop.xlane.xlu0 %1188 }
 0x9db   :  { %v1193_v30 = vsub.f32 %v1106_v21, %v1189_v29 }
 0x9dd   :  { %v1195_v32 = vmul.f32 1.442695, %v1193_v30 }
 0x9de   :  { %v1192_v33 = vpop.xlane.xlu1 %1191 }
 0x9df   :  { %5653 = vpow2.f32 %v1195_v32  ;;  %v1194_v35 = vsub.f32 %v1184_v26, %v1192_v33 }
 0x9e1   :  { %v1197_v37 = vmul.f32 1.442695, %v1194_v35 }
 0x9e2   :  { %v1210_v39 = vpop.permute.xlu1 %1209 }
 0x9e3   :  { %5655 = vpow2.f32 %v1197_v37  ;;  %5253 = vmatpush3.msra.mxu0 %v1210_v39 }
 0x9e4   :  { %5262 = vmatprep.subr.bf16.mxu0 %v5901_v0 }
 0x9e6   :  { %v1540_v58 = vpop.permute.xlu1 %1539 }
 0x9e9   :  { %v5654_v40 = vpop.eup %5653 }
 0x9ea   :  { %v1199_v41 = vsel %vm703_vm6, %v5654_v40, 0.0  ;;  %v1538_v60 = vpop.permute.xlu1 %1537 }
 0x9eb   :  { %1200 = vadd.xlane.f32.xlu0 %v1199_v41 }
 0x9ed   :  { %v5656_v43 = vpop.eup %5655 }
 0x9ee   :  { %v1202_v44 = vsel %vm703_vm6, %v5656_v43, 0.0  ;;  %v1460_v8 = vpop.permute.xlu1 %1459 }
 0x9ef   :  { %1203 = vadd.xlane.f32.xlu0 %v1202_v44 }
 0x9f2   :  { %v1844_v30 = vpop.permute.xlu1 %1843 }
 0xa05   :  { %1285 = vrot.lane.b32.xlu0 %v6219_v42, %s5908_s24 }
 0xa09   :  { %1461 = vrot.lane.b32.xlu0 %v6215_v38, %s5909_s6 }
 0xa78   :  { %v1201_v46 = vpop.xlane.xlu0 %1200 }
 0xa79   :  { %5657 = vrcp.f32 %v1201_v46 }
 0xa7c   :  { %v1204_v47 = vpop.xlane.xlu0 %1203 }
 0xa7d   :  { %5659 = vrcp.f32 %v1204_v47 }
 0xa80   :  { %v1286_v48 = vpop.permute.xlu0 %1285 }
 0xa81   :  { %5258 = vmatpush3.msra.mxu1 %v1286_v48 }
 0xa82   :  { %5268 = vmatprep.subr.bf16.mxu1 %v5901_v0 }
 0xa83   :  { %v5658_v50 = vpop.eup %5657 }
 0xa84   :  { %v1207_v51 = vmul.f32 %v5658_v50, %v5654_v40  ;;  %v1462_v3 = vpop.permute.xlu0 %1461 }
 0xa86   :  { %5255 = vmatmul.mubr.msk.f32.vlgmr.msra.gmra.mrb[16].mxu0 %vm703_vm6, %v1207_v51 }
 0xa87   :  { %v5660_v54 = vpop.eup %5659  ;;  %5263 = vmatpush3.bf16.msra.mxu0 %v1369_v52  ;;  %5264 = vmatprep.mubr.msk.bf16.mxu0 %vm5902_vm0, %v5901_v0 }
 0xa88   :  { %v1208_v55 = vmul.f32 %v5660_v54, %v5656_v43  ;;  %5274 = vmatprep.subr.mxu0 %v5901_v0 }
 0xa8a   :  { %5260 = vmatmul.mubr.msk.f32.vlgmr.msra.gmra.mrb[20].mxu1 %vm703_vm6, %v1208_v55 }
 0xa8b   :  { %5269 = vmatpush3.bf16.msra.mxu1 %v1416_v57  ;;  %5270 = vmatprep.mubr.msk.bf16.mxu1 %vm5902_vm0, %v5901_v0 }
 0xa8c   :  { %5279 = vmatprep.subr.mxu1 %v5901_v0 }
 0xa8e   :  { %5271 = vmatmul.mubr.msk.bf16.vlgmr.msra.gmra.mrb[24].mxu1 %vm703_vm6, %v1029_v20 }
 0xa8f   :  { %5281 = vmatprep.mubr.msk.f32.mxu1 %vm5902_vm0, %v5901_v0 }
 0xa94   :  { %5280 = vmatpush3.xpose.msk.msra.mxu1 %vm703_vm6, %v1540_v58 }
 0xa95   :  { %5289 = vmatprep.subr.mxu1 %v5901_v0 }
 0xa97   :  { %5282 = vmatmul.mubr.msk.f32.vlgmr.msra.gmra.mrb[22].mxu1 %vm703_vm6, %v1538_v60 }
 0xa98   :  { %5291 = vmatprep.mubr.msk.f32.mxu1 %vm5902_vm0, %v5901_v0 }
 0xb59   :  { %v1281_v61 = vpop.f32.mrb[16].mxu0 }
 0xb5a   :  { %v5256_v62 = vpop.f32.mrb[17].mxu0 }
 0xb5d   :  { %v1357_v63 = vpop.f32.mrb[20].mxu1 }
 0xb5e   :  { %v1361_v1 = vpack.c.bf16 %v1357_v63, %v1281_v61  ;;  %v5261_v2 = vpop.f32.mrb[21].mxu1 }
 0xb60   :  { %5265 = vmatmul.mubr.msk.bf16.vlgmr.msra.gmra.mrb[20].mxu0 %vm703_vm6, %v1361_v1  ;;  %v4892_v1 = vld [vmem:[%s6780_s18 + $0x8] sm:$0xf] }
 0xb61   :  { %5275 = vmatpush3.xpose.msk.msra.mxu0 %vm703_vm6, %v1462_v3  ;;  %v1452_v4 = vpop.f32.mrb[24].mxu1  ;;  %5276 = vmatprep.mubr.msk.f32.mxu0 %vm5902_vm0, %v5901_v0  ;;  %v1796_v2 = vsel %vm1367_vm7, %v4892_v1, 0  ;;  %v5609_v1 = vld [vmem:[%s6782_s28] sm:$0xff]  }
 0xb62   :  { %v5272_v5 = vpop.f32.mrb[25].mxu1  ;;  %5284 = vmatprep.subr.mxu0 %v5901_v0 }
 0xb63   :  { %v1455_v6 = vpop.f32.mrb[26].mxu1 }
 0xb64   :  { %v5273_v7 = vpop.f32.mrb[27].mxu1 }
 0xb68   :  { %5277 = vmatmul.mubr.msk.f32.vlgmr.msra.gmra.mrb[18].mxu0 %vm703_vm6, %v1460_v8 }
 0xb69   :  { %5286 = vmatprep.mubr.msk.f32.mxu0 %vm5902_vm0, %v5901_v0 }
 0xb6a   :  { %v1611_v9 = vpop.f32.mrb[22].mxu1 }
 0xb6b   :  { %v1612_v10 = vadd.f32 %v1611_v9, %v6236_v45  ;;  %v5283_v11 = vpop.f32.mrb[23].mxu1 }
 0xb6d   :  { %v1618_v13 = vsel %vm703_vm6, %v1612_v10, -inf }
 0xb6e   :  { %1619 = vmax.xlane.f32.xlu0 %v1618_v13 }
 0xb84   :  { %1713 = vrot.lane.b32.xlu0 %v6219_v42, %s5912_s22 }
 0xb88   :  { %1841 = vrot.lane.b32.xlu0 %v6215_v38, %s5913_s4 }
 0xb8c   :  { %1919 = vrot.lane.b32.xlu0 %v6219_v42, %s5913_s4 }
 0xbfb   :  { %v1620_v14 = vpop.xlane.xlu0 %1619 }
 0xbfc   :  { %v1622_v15 = vsub.f32 %v1612_v10, %v1620_v14 }
 0xbfe   :  { %v1625_v16 = vmul.f32 1.442695, %v1622_v15 }
 0xbff   :  { %v1714_v17 = vpop.permute.xlu0 %1713 }
 0xc00   :  { %5661 = vpow2.f32 %v1625_v16  ;;  %5290 = vmatpush3.msra.mxu1 %v1714_v17 }
 0xc01   :  { %5300 = vmatprep.subr.mxu1 %v5901_v0 }
 0xc03   :  { %v1842_v37 = vpop.permute.xlu0 %1841 }
 0xc07   :  { %v1920_v40 = vpop.permute.xlu0 %1919 }
 0xc0a   :  { %v5662_v18 = vpop.eup %5661 }
 0xc0b   :  { %v1630_v19 = vsel %vm703_vm6, %v5662_v18, 0.0 }
 0xc0c   :  { %1631 = vadd.xlane.f32.xlu1 %v1630_v19 }
 0xc1d   :  { %1921 = vrot.lane.b32.xlu1 %v6219_v42, %s5911_s27 }
 0xc33   :  { %v1405_v20 = vpop.f32.mrb[20].mxu0 }
 0xc34   :  { %v6345_v21 = vadd.f32 %v1452_v4, %v1405_v20  ;;  %v5266_v22 = vpop.f32.mrb[21].mxu0 }
 0xc35   :  { %v1408_v23 = vpop.f32.mrb[22].mxu0 }
 0xc36   :  { %v6347_v24 = vadd.f32 %v1455_v6, %v1408_v23  ;;  %v5267_v25 = vpop.f32.mrb[23].mxu0 }
 0xc37   :  { %v4900_v25 = vld [vmem:[%s6780_s18 + $0xc] sm:$0xf] }
 0xc3b   :  { %v1533_v26 = vpop.f32.mrb[18].mxu0 }
 0xc3c   :  { %v1534_v27 = vadd.f32 %v1533_v26, %v6236_v45  ;;  %v5278_v28 = vpop.f32.mrb[19].mxu0  ;;  %v2178_v26 = vsel %vm1367_vm7, %v4900_v25, 0  ;;  %v5614_v25 = vld [vmem:[%s6785_s30 + $0x18] sm:$0xff]  }
 0xc3e   :  { %v1615_v29 = vsel %vm703_vm6, %v1534_v27, -inf }
 0xc41   :  { %1616 = vmax.xlane.f32.xlu1 %v1615_v29 }
 0xc99   :  { %v1632_v32 = vpop.xlane.xlu1 %1631 }
 0xc9a   :  { %5663 = vrcp.f32 %v1632_v32 }
 0xc9d   :  { %v1922_v39 = vpop.permute.xlu1 %1921 }
 0xca4   :  { %v5664_v33 = vpop.eup %5663 }
 0xca5   :  { %v1636_v35 = vmul.f32 %v5664_v33, %v5662_v18 }
 0xca7   :  { %5292 = vmatmul.mubr.msk.f32.vlgmr.msra.gmra.mrb[28].mxu1 %vm703_vm6, %v1636_v35 }
 0xca8   :  { %5301 = vmatpush3.xpose.msk.msra.mxu1 %vm703_vm6, %v1844_v30  ;;  %5302 = vmatprep.mubr.msk.f32.mxu1 %vm5902_vm0, %v5901_v0 }
 0xca9   :  { %5305 = vmatprep.subr.mxu1 %v5901_v0 }
 0xcab   :  { %5303 = vmatmul.mubr.msk.f32.vlgmr.msra.gmra.mrb[30].mxu1 %vm703_vm6, %v1842_v37 }
 0xcac   :  { %5306 = vmatpush3.xpose.msk.msra.mxu1 %vm703_vm6, %v1922_v39  ;;  %5307 = vmatprep.mubr.msk.f32.mxu1 %vm5902_vm0, %v5901_v0 }
 0xcad   :  { %5315 = vmatprep.subr.mxu1 %v5901_v0 }
 0xcaf   :  { %5308 = vmatmul.mubr.msk.f32.vlgmr.msra.gmra.mrb[32].mxu1 %vm703_vm6, %v1920_v40 }
 0xcb0   :  { %5317 = vmatprep.mubr.msk.f32.mxu1 %vm5902_vm0, %v5901_v0 }
 0xcce   :  { %v1617_v41 = vpop.xlane.xlu1 %1616 }
 0xccf   :  { %v1621_v43 = vsub.f32 %v1534_v27, %v1617_v41 }
 0xcd1   :  { %v1623_v44 = vmul.f32 1.442695, %v1621_v43 }
 0xcd3   :  { %5665 = vpow2.f32 %v1623_v44  ;;  %v4902_v44 = vld [vmem:[%s6781_s26] ss:$0 sm:$0xff] }
 0xcdd   :  { %v5666_v46 = vpop.eup %5665 }
 0xcde   :  { %v1627_v47 = vsel %vm703_vm6, %v5666_v46, 0.0 }
 0xcdf   :  { %1628 = vadd.xlane.f32.xlu0 %v1627_v47 }
 0xcf5   :  { %1637 = vrot.lane.b32.xlu0 %v6215_v38, %s5912_s22 }
 0xcf9   :  { %2095 = vrot.lane.b32.xlu0 %v6219_v42, %s5914_s23 }
 0xd6c   :  { %v1629_v48 = vpop.xlane.xlu0 %1628 }
 0xd6d   :  { %5667 = vrcp.f32 %v1629_v48 }
 0xd70   :  { %v1638_v49 = vpop.permute.xlu0 %1637 }
 0xd71   :  { %5285 = vmatpush3.msra.mxu0 %v1638_v49 }
 0xd72   :  { %5294 = vmatprep.subr.bf16.mxu0 %v5901_v0 }
 0xd74   :  { %v2096_v50 = vpop.permute.xlu0 %2095 }
 0xd75   :  { %5316 = vmatpush3.msra.mxu1 %v2096_v50 }
 0xd76   :  { %5326 = vmatprep.subr.bf16.mxu1 %v5901_v0 }
 0xd77   :  { %v5668_v51 = vpop.eup %5667 }
 0xd78   :  { %v1635_v52 = vmul.f32 %v5668_v51, %v5666_v46 }
 0xd7a   :  { %5287 = vmatmul.mubr.msk.f32.vlgmr.msra.gmra.mrb[24].mxu0 %vm703_vm6, %v1635_v52  ;;  %v1785_v53 = vpop.f32.mrb[28].mxu1 }
 0xd7b   :  { %v5293_v54 = vpop.f32.mrb[29].mxu1  ;;  %5296 = vmatprep.mubr.msk.bf16.mxu0 %vm5902_vm0, %v5901_v0  ;;  %5295 = vmatpush3.bf16.msra.mxu0 %v1796_v2  ;;  %v5610_v2 = vld [vmem:[%s6782_s28 + $0x8] sm:$0xff]  }
 0xd7c   :  { %5310 = vmatprep.subr.mxu0 %v5901_v0 }
 0xd7e   :  { %v1915_v42 = vpop.f32.mrb[30].mxu1 }
 0xd7f   :  { %v1916_v55 = vadd.f32 %v1915_v42, %v6236_v45  ;;  %v5304_v57 = vpop.f32.mrb[31].mxu1 }
 0xd81   :  { %v1997_v58 = vsel %vm703_vm6, %v1916_v55, -inf }
 0xd82   :  { %1998 = vmax.xlane.f32.xlu1 %v1997_v58  ;;  %v1993_v60 = vpop.f32.mrb[32].mxu1 }
 0xd83   :  { %v1994_v61 = vadd.f32 %v1993_v60, %v6236_v45  ;;  %v5309_v62 = vpop.f32.mrb[33].mxu1 }
 0xd85   :  { %v2000_v63 = vsel %vm703_vm6, %v1994_v61, -inf }
 0xd86   :  { %2001 = vmax.xlane.f32.xlu1 %v2000_v63 }
 0xe0f   :  { %v1999_v3 = vpop.xlane.xlu1 %1998 }
 0xe10   :  { %v2003_v4 = vsub.f32 %v1916_v55, %v1999_v3 }
 0xe12   :  { %v2005_v5 = vmul.f32 1.442695, %v2003_v4 }
 0xe13   :  { %v2002_v6 = vpop.xlane.xlu1 %2001 }
 0xe14   :  { %5669 = vpow2.f32 %v2005_v5  ;;  %v2004_v7 = vsub.f32 %v1994_v61, %v2002_v6 }
 0xe16   :  { %v2007_v8 = vmul.f32 1.442695, %v2004_v7 }
 0xe18   :  { %5671 = vpow2.f32 %v2007_v8 }
 0xe1e   :  { %v5670_v9 = vpop.eup %5669 }
 0xe1f   :  { %v2009_v10 = vsel %vm703_vm6, %v5670_v9, 0.0 }
 0xe20   :  { %2010 = vadd.xlane.f32.xlu1 %v2009_v10 }
 0xe22   :  { %v5672_v11 = vpop.eup %5671 }
 0xe23   :  { %v2012_v13 = vsel %vm703_vm6, %v5672_v11, 0.0 }
 0xe24   :  { %2013 = vadd.xlane.f32.xlu1 %v2012_v13 }
 0xe35   :  { %2019 = vrot.lane.b32.xlu1 %v6215_v38, %s5914_s23 }
 0xe4d   :  { %v1709_v14 = vpop.f32.mrb[24].mxu0 }
 0xe4e   :  { %v1789_v15 = vpack.c.bf16 %v1785_v53, %v1709_v14  ;;  %v5288_v16 = vpop.f32.mrb[25].mxu0 }
 0xe4f   :  { %v4904_v16 = vld [vmem:[%s6784_s2] ss:$0 sm:$0xff] }
 0xe50   :  { %5297 = vmatmul.mubr.msk.bf16.vlgmr.msra.gmra.mrb[28].mxu0 %vm703_vm6, %v1789_v15 }
 0xe51   :  { %5312 = vmatprep.mubr.msk.f32.mxu0 %vm5902_vm0, %v5901_v0 }
 0xead   :  { %v2011_v17 = vpop.xlane.xlu1 %2010 }
 0xeae   :  { %5673 = vrcp.f32 %v2011_v17 }
 0xeb1   :  { %v2014_v18 = vpop.xlane.xlu1 %2013 }
 0xeb2   :  { %5675 = vrcp.f32 %v2014_v18 }
 0xeb5   :  { %v2020_v19 = vpop.permute.xlu1 %2019 }
 0xeb6   :  { %5311 = vmatpush3.msra.mxu0 %v2020_v19 }
 0xeb7   :  { %5320 = vmatprep.subr.bf16.mxu0 %v5901_v0 }
 0xeb8   :  { %v5674_v20 = vpop.eup %5673 }
 0xeb9   :  { %v2017_v22 = vmul.f32 %v5674_v20, %v5670_v9 }
 0xebb   :  { %5313 = vmatmul.mubr.msk.f32.vlgmr.msra.gmra.mrb[26].mxu0 %vm703_vm6, %v2017_v22  ;;  %v5611_v22 = vld [vmem:[%s6785_s30] sm:$0xff]  }
 0xebc   :  { %v5676_v38 = vpop.eup %5675  ;;  %5322 = vmatprep.mubr.msk.bf16.mxu0 %vm5902_vm0, %v5901_v0  ;;  %5321 = vmatpush3.bf16.msra.mxu0 %v2178_v26  ;;  %v5615_v26 = vld [vmem:[%s6785_s30 + $0x20] sm:$0xff]  }
 0xebd   :  { %v2018_v23 = vmul.f32 %v5676_v38, %v5672_v11  ;;  %5334 = vmatprep.subr.bf16.mxu0 %v5901_v0  ;;  %v4903_v11 = vld [vmem:[%s6783_s1] ss:$0 sm:$0xff]  ;;  %v5612_v38 = vld [vmem:[%s6785_s30 + $0x8] sm:$0xff]  }
 0xebf   :  { %5318 = vmatmul.mubr.msk.f32.vlgmr.msra.gmra.mrb[34].mxu1 %vm703_vm6, %v2018_v23  ;;  %v5613_v23 = vld [vmem:[%s6785_s30 + $0x10] sm:$0xff]  }
 0xec0   :  { %5330 = vmatprep.mubr.msk.bf16.mxu1 %vm5902_vm0, %v5901_v0  ;;  %5327 = vmatpush3.bf16.msra.mxu1 %v5609_v1 }
 0xec1   :  { %5328 = vmatprep.subr.bf16.mxu1 %v5901_v0 }
 0xec4   :  { %5329 = vmatpush3.bf16.msra.mxu1 %v5610_v2 }
 0xec5   :  { %5354 = vmatprep.subr.bf16.mxu1 %v5901_v0 }
 0xf23   :  { %v1832_v27 = vpop.f32.mrb[28].mxu0 }
 0xf24   :  { %v1839_v28 = vadd.f32 %v1832_v27, %v6345_v21  ;;  %v5298_v29 = vpop.f32.mrb[29].mxu0  ;;  %v5616_v27 = vld [vmem:[%s6785_s30 + $0x28] sm:$0xff]  }
 0xf25   :  { %v1835_v30 = vpop.f32.mrb[30].mxu0  ;;  %v5618_v29 = vld [vmem:[%s6785_s30 + $0x38] sm:$0xff]  }
 0xf26   :  { %v1840_v32 = vadd.f32 %v1835_v30, %v6347_v24  ;;  %v5299_v33 = vpop.f32.mrb[31].mxu0  ;;  %v4905_v30 = vld [vmem:[%s6786_s7] ss:$0 sm:$0xff] }
 0xf8e   :  { %v2091_v35 = vpop.f32.mrb[26].mxu0 }
 0xf8f   :  { %v5314_v37 = vpop.f32.mrb[27].mxu0 }
 0xf92   :  { %v2167_v39 = vpop.f32.mrb[34].mxu1 }
 0xf93   :  { %v2171_v40 = vpack.c.bf16 %v2167_v39, %v2091_v35  ;;  %v5319_v41 = vpop.f32.mrb[35].mxu1 }
 0xf95   :  { %5323 = vmatmul.mubr.msk.bf16.vlgmr.msra.gmra.mrb[32].mxu0 %vm703_vm6, %v2171_v40 }
 0xf96   :  { %5350 = vmatprep.mubr.msk.bf16.mxu0 %vm5902_vm0, %v5901_v0  ;;  %5335 = vmatpush3.bf16.msra.mxu0 %v5611_v22 }
 0xf97   :  { %5336 = vmatprep.subr.bf16.mxu0 %v5901_v0 }
 0xf9a   :  { %5337 = vmatpush3.bf16.msra.mxu0 %v5612_v38  ;;  %v4922_v38 = vld [vmem:[%s6776_s9 + $0x1] ss:$0 sm:$0xff] }
 0xf9b   :  { %5338 = vmatprep.subr.bf16.mxu0 %v5901_v0 }
 0xf9e   :  { %5339 = vmatpush3.bf16.msra.mxu0 %v5613_v23 }
 0xf9f   :  { %5340 = vmatprep.subr.bf16.mxu0 %v5901_v0 }
 0xfa2   :  { %5341 = vmatpush3.bf16.msra.mxu0 %v5614_v25 }
 0xfa3   :  { %5342 = vmatprep.subr.bf16.mxu0 %v5901_v0 }
 0xfa6   :  { %5343 = vmatpush3.bf16.msra.mxu0 %v5615_v26 }
 0xfa7   :  { %5344 = vmatprep.subr.bf16.mxu0 %v5901_v0 }
 0xfaa   :  { %5345 = vmatpush3.bf16.msra.mxu0 %v5616_v27  ;;  %v4923_v27 = vld [vmem:[%s6777_s13 + $0x1] ss:$0 sm:$0xff] }
 0xfab   :  { %5346 = vmatprep.subr.bf16.mxu0 %v5901_v0 }
0x1068   :  { %v2214_v43 = vpop.f32.mrb[32].mxu0 }
0x1069   :  { %v2221_v46 = vadd.f32 %v2214_v43, %v1839_v28  ;;  %v5324_v47 = vpop.f32.mrb[33].mxu0  ;;  %v5617_v28 = vld [vmem:[%s6785_s30 + $0x30] sm:$0xff]  }
0x106a   :  { %v2217_v21 = vpop.f32.mrb[34].mxu0  ;;  %5347 = vmatpush3.bf16.msra.mxu0 %v5617_v28 }
0x106b   :  { %v2230_v48 = vadd.f32 %v4902_v44, %v2221_v46  ;;  %v2222_v49 = vadd.f32 %v2217_v21, %v1840_v32  ;;  %v5325_v50 = vpop.f32.mrb[35].mxu0  ;;  %5348 = vmatprep.subr.bf16.mxu0 %v5901_v0 }
0x106d   :  { %v6405_v24 = vadd.f32 %v2230_v48, %v6191_v56  ;;  %v2231_v51 = vadd.f32 %v4902_v44, %v2222_v49 }
0x106e   :  { %5349 = vmatpush3.bf16.msra.mxu0 %v5618_v29 }
0x106f   :  { %v6408_v52 = vadd.f32 %v2231_v51, %v6193_v59  ;;  %v2236_v53 = vsel %vm235_vm1, %v6405_v24, 0.0  ;;  %5387 = vmatprep.subr.mxu0 %v5901_v0 }
0x1070   :  { %2237 = vadd.xlane.f32.xlu0 %v2236_v53 }
0x1071   :  { %v2239_v54 = vsel %vm235_vm1, %v6408_v52, 0.0 }
0x1072   :  { %2240 = vadd.xlane.f32.xlu1 %v2239_v54 }
0x10fd   :  { %v2238_v42 = vpop.xlane.xlu0 %2237 }
0x10fe   :  { %v2242_v55 = vmul.f32 0.03125, %v2238_v42 }
0x10ff   :  { %v2241_v57 = vpop.xlane.xlu1 %2240 }
0x1100   :  { %v2244_v56 = vsub.f32 %v6405_v24, %v2242_v55  ;;  %v2243_v58 = vmul.f32 0.03125, %v2241_v57  ;;  %v4911_v55 = vld [vmem:[%s6787_s10] ss:$0 sm:$0xff] }
0x1102   :  { %v2245_v60 = vsub.f32 %v6408_v52, %v2243_v58  ;;  %v2246_v59 = vmul.f32 %v2244_v56, %v2244_v56 }
0x1104   :  { %v2248_v61 = vsel %vm235_vm1, %v2246_v59, 0.0  ;;  %v2247_v62 = vmul.f32 %v2245_v60, %v2245_v60 }
0x1105   :  { %2249 = vadd.xlane.f32.xlu0 %v2248_v61 }
0x1106   :  { %v2251_v63 = vsel %vm235_vm1, %v2247_v62, 0.0 }
0x1109   :  { %2252 = vadd.xlane.f32.xlu0 %v2251_v63 }
0x1192   :  { %v2250_v3 = vpop.xlane.xlu0 %2249 }
0x1193   :  { %v2254_v4 = vmul.f32 0.03125, %v2250_v3 }
0x1195   :  { %v2256_v5 = vadd.f32 1e-05, %v2254_v4 }
0x1196   :  { %v2253_v6 = vpop.xlane.xlu0 %2252 }
0x1197   :  { %5677 = vrsqrt.f32 %v2256_v5  ;;  %v2255_v7 = vmul.f32 0.03125, %v2253_v6 }
0x1199   :  { %v2257_v8 = vadd.f32 1e-05, %v2255_v7 }
0x119b   :  { %5679 = vrsqrt.f32 %v2257_v8 }
0x11a1   :  { %v5678_v9 = vpop.eup %5677 }
0x11a2   :  { %v2260_v10 = vmul.f32 %v5678_v9, %v2244_v56 }
0x11a4   :  { %v2268_v14 = vmul.f32 %v4903_v11, %v2260_v10 }
0x11a5   :  { %v5680_v13 = vpop.eup %5679 }
0x11a6   :  { %v2261_v15 = vmul.f32 %v5680_v13, %v2245_v60  ;;  %v2276_v18 = vadd.f32 %v4904_v16, %v2268_v14  ;;  %v5620_v13 = vld [vmem:[%s6775_s5 + $0x18] sm:$0xff]  }
0x11a8   :  { %v2269_v17 = vmul.f32 %v4903_v11, %v2261_v15  ;;  %v5619_v11 = vld [vmem:[%s6775_s5 + $0x10] sm:$0xff]   ;;  %s5916_s5 = smov 32  }
0x11aa   :  { %v2277_v19 = vadd.f32 %v4904_v16, %v2269_v17 }
0x11ac   :  { %v2283_v20 = vpack.c.bf16 %v2277_v19, %v2276_v18 }
0x11ae   :  { %5331 = vmatmul.mubr.msk.bf16.vlgmr.msra.gmra.mrb[36].mxu1 %vm235_vm1, %v2283_v20 }
0x11af   :  { %5358 = vmatprep.mubr.msk.bf16.mxu1 %vm5902_vm0, %v5901_v0  ;;  %5355 = vmatpush3.bf16.msra.mxu1 %v5619_v11 }
0x11b0   :  { %5356 = vmatprep.subr.bf16.mxu1 %v5901_v0 }
0x11b3   :  { %5357 = vmatpush3.bf16.msra.mxu1 %v5620_v13 }
0x11b4   :  { %5362 = vmatprep.subr.mxu1 %v5901_v0 }
0x1281   :  { %v2339_v32 = vpop.f32.mrb[36].mxu1 }
0x1282   :  { %v2340_v33 = vadd.f32 %v4905_v30, %v2339_v32  ;;  %v5332_v35 = vpop.f32.mrb[37].mxu1 }
0x1283   :  { %v2342_v37 = vpop.f32.mrb[38].mxu1 }
0x1284   :  { %v4909_v39 = vmul.f32 -1.702, %v2340_v33  ;;  %v2343_v40 = vadd.f32 %v4905_v30, %v2342_v37  ;;  %v5333_v41 = vpop.f32.mrb[39].mxu1 }
0x1286   :  { %v2350_v43 = vmul.f32 1.442695, %v4909_v39  ;;  %v4910_v44 = vmul.f32 -1.702, %v2343_v40 }
0x1288   :  { %5681 = vpow2.f32 %v2350_v43  ;;  %v2352_v46 = vmul.f32 1.442695, %v4910_v44 }
0x128a   :  { %5683 = vpow2.f32 %v2352_v46 }
0x1292   :  { %v5682_v47 = vpop.eup %5681 }
0x1293   :  { %v2354_v21 = vadd.f32 1.0, %v5682_v47 }
0x1294   :  { %v5684_v48 = vpop.eup %5683 }
0x1295   :  { %5685 = vrcp.f32 %v2354_v21  ;;  %v2355_v49 = vadd.f32 1.0, %v5684_v48 }
0x1297   :  { %5687 = vrcp.f32 %v2355_v49 }
0x129f   :  { %v5686_v50 = vpop.eup %5685 }
0x12a0   :  { %v2360_v53 = vmul.f32 %v5686_v50, %v2340_v33  ;;  %v4929_v33 = vld [vmem:[%s6778_s17 + $0x1] ss:$0 sm:$0xff] }
0x12a1   :  { %v5688_v51 = vpop.eup %5687 }
0x12a2   :  { %v2361_v54 = vmul.f32 %v5688_v51, %v2343_v40 }
0x12a4   :  { %v2379_v42 = vpack.c.bf16 %v2361_v54, %v2360_v53 }
0x12a6   :  { %5351 = vmatmul.mubr.bf16.vlgmr.msra.gmra.mrb[36].mxu0 %v2379_v42 }
0x12a7   :  { %5389 = vmatprep.mubr.msk.f32.mxu0 %vm5902_vm0, %v5901_v0 }
0x1379   :  { %v2468_v57 = vpop.f32.mrb[36].mxu0 }
0x137a   :  { %v2469_v56 = vadd.f32 %v4911_v55, %v2468_v57  ;;  %v5352_v58 = vpop.f32.mrb[37].mxu0 }
0x137b   :  { %v2471_v60 = vpop.f32.mrb[38].mxu0 }
0x137c   :  { %v6448_v59 = vadd.f32 %v2469_v56, %v6405_v24  ;;  %v2472_v61 = vadd.f32 %v4911_v55, %v2471_v60  ;;  %v5353_v62 = vpop.f32.mrb[39].mxu0 }
0x137e   :  { %v6451_v63 = vadd.f32 %v2472_v61, %v6408_v52  ;;  %v2481_v1 = vsel %vm235_vm1, %v6448_v59, 0.0 }
0x137f   :  { %2482 = vadd.xlane.f32.xlu0 %v2481_v1 }
0x1380   :  { %v2484_v2 = vsel %vm235_vm1, %v6451_v63, 0.0 }
0x1383   :  { %2485 = vadd.xlane.f32.xlu0 %v2484_v2 }
0x140c   :  { %v2483_v3 = vpop.xlane.xlu0 %2482 }
0x140d   :  { %v2487_v4 = vmul.f32 0.03125, %v2483_v3 }
0x140f   :  { %v2489_v24 = vsub.f32 %v6448_v59, %v2487_v4 }
0x1410   :  { %v2486_v5 = vpop.xlane.xlu0 %2485 }
0x1411   :  { %v2488_v6 = vmul.f32 0.03125, %v2486_v5  ;;  %v2491_v7 = vmul.f32 %v2489_v24, %v2489_v24 }
0x1413   :  { %v2490_v52 = vsub.f32 %v6451_v63, %v2488_v6  ;;  %v2493_v8 = vsel %vm235_vm1, %v2491_v7, 0.0 }
0x1414   :  { %2494 = vadd.xlane.f32.xlu1 %v2493_v8 }
0x1415   :  { %v2492_v9 = vmul.f32 %v2490_v52, %v2490_v52 }
0x1417   :  { %v2496_v10 = vsel %vm235_vm1, %v2492_v9, 0.0 }
0x1418   :  { %2497 = vadd.xlane.f32.xlu0 %v2496_v10 }
0x14a1   :  { %v2495_v14 = vpop.xlane.xlu1 %2494 }
0x14a2   :  { %v2499_v15 = vmul.f32 0.03125, %v2495_v14  ;;  %v6528_v14 = vld [vmem:[%s6779_s25] sm:$0xff] }
0x14a4   :  { %v2501_v16 = vadd.f32 1e-05, %v2499_v15 }
0x14a5   :  { %v2498_v17 = vpop.xlane.xlu0 %2497 }
0x14a6   :  { %5689 = vrsqrt.f32 %v2501_v16  ;;  %v2500_v18 = vmul.f32 0.03125, %v2498_v17 }
0x14a8   :  { %v2502_v19 = vadd.f32 1e-05, %v2500_v18 }
0x14aa   :  { %5691 = vrsqrt.f32 %v2502_v19 }
0x14b0   :  { %v5690_v20 = vpop.eup %5689 }
0x14b1   :  { %v2505_v22 = vmul.f32 %v5690_v20, %v2489_v24 }
0x14b3   :  { %v2513_v25 = vmul.f32 %v4922_v38, %v2505_v22 }
0x14b4   :  { %v5692_v23 = vpop.eup %5691 }
0x14b5   :  { %v2506_v26 = vmul.f32 %v5692_v23, %v2490_v52  ;;  %v2521_v29 = vadd.f32 %v4923_v27, %v2513_v25 }
0x14b7   :  { %v2514_v28 = vmul.f32 %v4922_v38, %v2506_v26 }
0x14b9   :  { %v2522_v30 = vadd.f32 %v4923_v27, %v2514_v28 }
0x14bb   :  { %v2530_v32 = vpack.c.bf16 %v2522_v30, %v2521_v29 }
0x14bd   :  { %5359 = vmatmul.mubr.msk.bf16.vlgmr.msra.gmra.mrb[40].mxu1 %vm235_vm1, %v2530_v32 }
0x14be   :  { %5364 = vmatprep.mubr.msk.f32.mxu1 %vm5902_vm0, %v5901_v0 }
0x1590   :  { %v2586_v35 = vpop.f32.mrb[40].mxu1 }
0x1591   :  { %v6471_v37 = vadd.f32 %v4929_v33, %v2586_v35  ;;  %v5360_v39 = vpop.f32.mrb[41].mxu1 }
0x1592   :  { %v2589_v40 = vpop.f32.mrb[42].mxu1 }
0x1593   :  { %v6473_v41 = vadd.f32 %v4929_v33, %v2589_v40  ;;  %2594 = vrot.lane.b32.xlu1 %v6471_v37, %s5904_s21  ;;  %v5361_v43 = vpop.f32.mrb[43].mxu1 }
0x1595   :  { %2671 = vrot.lane.b32.xlu0 %v6473_v41, %s5904_s21 }
0x1605   :  { %v2595_v44 = vpop.permute.xlu1 %2594 }
0x1606   :  { %5363 = vmatpush3.xpose.msk.msra.mxu1 %vm703_vm6, %v2595_v44 }
0x1607   :  { %5367 = vmatprep.subr.mxu1 %v5901_v0  ;;  %v2672_v46 = vpop.permute.xlu0 %2671 }
0x1609   :  { %5365 = vmatmul.mubr.msk.f32.vlgmr.msra.gmra.mrb[44].mxu1 %vm703_vm6, %v6471_v37 }
0x160a   :  { %5368 = vmatpush3.xpose.msk.msra.mxu1 %vm703_vm6, %v2672_v46  ;;  %5369 = vmatprep.mubr.msk.f32.mxu1 %vm5902_vm0, %v5901_v0 }
0x160b   :  { %5372 = vmatprep.subr.mxu1 %v5901_v0 }
0x160d   :  { %5370 = vmatmul.mubr.msk.f32.vlgmr.msra.gmra.mrb[46].mxu1 %vm703_vm6, %v6473_v41 }
0x160e   :  { %5374 = vmatprep.mubr.msk.f32.mxu1 %vm5902_vm0, %v5901_v0 }
0x16dc   :  { %v2666_v47 = vpop.f32.mrb[44].mxu1 }
0x16dd   :  { %v2667_v21 = vadd.f32 %v2666_v47, %v6236_v45  ;;  %v5366_v48 = vpop.f32.mrb[45].mxu1 }
0x16df   :  { %v2747_v49 = vsel %vm703_vm6, %v2667_v21, -inf }
0x16e0   :  { %2748 = vmax.xlane.f32.xlu1 %v2747_v49  ;;  %v2743_v50 = vpop.f32.mrb[46].mxu1  ;;  %v4939_v49 = vld [vmem:[%s6780_s18 + $0x10] sm:$0xf] }
0x16e1   :  { %v2744_v51 = vadd.f32 %v2743_v50, %v6236_v45  ;;  %v5371_v53 = vpop.f32.mrb[47].mxu1 }
0x16e2   :  { %v3308_v53 = vsel %vm1367_vm7, %v4939_v49, 0 }
0x16e3   :  { %v2750_v54 = vsel %vm703_vm6, %v2744_v51, -inf }
0x16e4   :  { %2751 = vmax.xlane.f32.xlu0 %v2750_v54 }
0x16f1   :  { %2769 = vrot.lane.b32.xlu1 %v6471_v37, %s5905_s3 }
0x16f5   :  { %2926 = vrot.lane.b32.xlu1 %v6471_v37, %s5907_s19 }
0x16fa   :  { %2845 = vrot.lane.b32.xlu0 %v6473_v41, %s5905_s3 }
0x176d   :  { %v2749_v42 = vpop.xlane.xlu1 %2748 }
0x176e   :  { %v2753_v55 = vsub.f32 %v2667_v21, %v2749_v42 }
0x1770   :  { %v2755_v57 = vmul.f32 1.442695, %v2753_v55 }
0x1771   :  { %v2770_v56 = vpop.permute.xlu1 %2769  ;;  %v2752_v58 = vpop.xlane.xlu0 %2751 }
0x1772   :  { %5693 = vpow2.f32 %v2755_v57  ;;  %v2754_v45 = vsub.f32 %v2744_v51, %v2752_v58  ;;  %5373 = vmatpush3.msra.mxu1 %v2770_v56  ;;  %v4946_v56 = vld [vmem:[%s6780_s18 + $0x14] sm:$0xf] }
0x1773   :  { %5377 = vmatprep.subr.mxu1 %v5901_v0  ;;  %v3261_v58 = vsel %vm1367_vm7, %v4946_v56, 0 }
0x1774   :  { %v2757_v60 = vmul.f32 1.442695, %v2754_v45 }
0x1775   :  { %v2927_v3 = vpop.permute.xlu1 %2926  ;;  %v2846_v4 = vpop.permute.xlu0 %2845 }
0x1776   :  { %5695 = vpow2.f32 %v2757_v60 }
0x177c   :  { %v5694_v61 = vpop.eup %5693 }
0x177d   :  { %v2759_v62 = vsel %vm703_vm6, %v5694_v61, 0.0 }
0x177e   :  { %2760 = vadd.xlane.f32.xlu1 %v2759_v62 }
0x1780   :  { %v5696_v1 = vpop.eup %5695 }
0x1781   :  { %v2762_v2 = vsel %vm703_vm6, %v5696_v1, 0.0 }
0x1782   :  { %2763 = vadd.xlane.f32.xlu0 %v2762_v2 }
0x178f   :  { %3004 = vrot.lane.b32.xlu1 %v6473_v41, %s5907_s19 }
0x1793   :  { %3002 = vrot.lane.b32.xlu1 %v6473_v41, %s5906_s14 }
0x1798   :  { %2924 = vrot.lane.b32.xlu0 %v6471_v37, %s5906_s14 }
0x180b   :  { %v2761_v24 = vpop.xlane.xlu1 %2760 }
0x180c   :  { %5697 = vrcp.f32 %v2761_v24 }
0x180f   :  { %v3005_v5 = vpop.permute.xlu1 %3004  ;;  %v2764_v6 = vpop.xlane.xlu0 %2763 }
0x1810   :  { %5699 = vrcp.f32 %v2764_v6  ;;  %5388 = vmatpush3.xpose.msk.msra.mxu0 %vm703_vm6, %v3005_v5 }
0x1811   :  { %5397 = vmatprep.subr.mxu0 %v5901_v0 }
0x1813   :  { %v3003_v7 = vpop.permute.xlu1 %3002  ;;  %v2925_v11 = vpop.permute.xlu0 %2924 }
0x1814   :  { %5390 = vmatmul.mubr.msk.f32.vlgmr.msra.gmra.mrb[40].mxu0 %vm703_vm6, %v3003_v7 }
0x1815   :  { %5399 = vmatprep.mubr.msk.f32.mxu0 %vm5902_vm0, %v5901_v0 }
0x1816   :  { %v5698_v52 = vpop.eup %5697 }
0x1817   :  { %v2767_v8 = vmul.f32 %v5698_v52, %v5694_v61 }
0x1819   :  { %5375 = vmatmul.mubr.msk.f32.vlgmr.msra.gmra.mrb[48].mxu1 %vm703_vm6, %v2767_v8 }
0x181a   :  { %v5700_v9 = vpop.eup %5699  ;;  %5378 = vmatpush3.msra.mxu1 %v2846_v4  ;;  %5379 = vmatprep.mubr.msk.f32.mxu1 %vm5902_vm0, %v5901_v0 }
0x181b   :  { %v2768_v10 = vmul.f32 %v5700_v9, %v5696_v1  ;;  %5382 = vmatprep.subr.mxu1 %v5901_v0 }
0x181d   :  { %5380 = vmatmul.mubr.msk.f32.vlgmr.msra.gmra.mrb[50].mxu1 %vm703_vm6, %v2768_v10 }
0x181e   :  { %5384 = vmatprep.mubr.msk.f32.mxu1 %vm5902_vm0, %v5901_v0 }
0x1821   :  { %5383 = vmatpush3.xpose.msk.msra.mxu1 %vm703_vm6, %v2927_v3 }
0x1822   :  { %5392 = vmatprep.subr.mxu1 %v5901_v0 }
0x1824   :  { %5385 = vmatmul.mubr.msk.f32.vlgmr.msra.gmra.mrb[52].mxu1 %vm703_vm6, %v2925_v11 }
0x1825   :  { %5394 = vmatprep.mubr.msk.f32.mxu1 %vm5902_vm0, %v5901_v0 }
0x18e7   :  { %v3076_v13 = vpop.f32.mrb[40].mxu0 }
0x18e8   :  { %v3077_v15 = vadd.f32 %v6528_v14, %v3076_v13  ;;  %v5391_v16 = vpop.f32.mrb[41].mxu0 }
0x18ea   :  { %v3083_v17 = vsel %vm703_vm6, %v3077_v15, -inf }
0x18eb   :  { %3084 = vmax.xlane.f32.xlu1 %v3083_v17 }
0x18ec   :  { %v2841_v18 = vpop.f32.mrb[48].mxu1 }
0x18ed   :  { %v5376_v19 = vpop.f32.mrb[49].mxu1 }
0x18f0   :  { %v2917_v20 = vpop.f32.mrb[50].mxu1 }
0x18f1   :  { %v2921_v22 = vpack.c.bf16 %v2917_v20, %v2841_v18  ;;  %v5381_v38 = vpop.f32.mrb[51].mxu1 }
0x18f7   :  { %v2998_v23 = vpop.f32.mrb[52].mxu1 }
0x18f8   :  { %v2999_v25 = vadd.f32 %v6528_v14, %v2998_v23  ;;  %v5386_v26 = vpop.f32.mrb[53].mxu1 }
0x18fa   :  { %v3080_v27 = vsel %vm703_vm6, %v2999_v25, -inf }
0x18fb   :  { %3081 = vmax.xlane.f32.xlu0 %v3080_v27 }
0x18fc   :  { %3102 = vrot.lane.b32.xlu1 %v6471_v37, %s5908_s24 }
0x1900   :  { %3431 = vrot.lane.b32.xlu1 %v6473_v41, %s5909_s6 }
0x1904   :  { %3429 = vrot.lane.b32.xlu1 %v6473_v41, %s5910_s12 }
0x1908   :  { %3351 = vrot.lane.b32.xlu1 %v6471_v37, %s5910_s12 }
0x190c   :  { %3735 = vrot.lane.b32.xlu1 %v6471_v37, %s5911_s27 }
0x1978   :  { %v3085_v28 = vpop.xlane.xlu1 %3084 }
0x1979   :  { %v3087_v29 = vsub.f32 %v3077_v15, %v3085_v28 }
0x197b   :  { %v3090_v30 = vmul.f32 1.442695, %v3087_v29 }
0x197c   :  { %v3103_v32 = vpop.permute.xlu1 %3102 }
0x197d   :  { %5701 = vpow2.f32 %v3090_v30  ;;  %5393 = vmatpush3.msra.mxu1 %v3103_v32 }
0x197e   :  { %5402 = vmatprep.subr.bf16.mxu1 %v5901_v0 }
0x1980   :  { %v3432_v42 = vpop.permute.xlu1 %3431 }
0x1984   :  { %v3430_v57 = vpop.permute.xlu1 %3429 }
0x1987   :  { %v5702_v33 = vpop.eup %5701 }
0x1988   :  { %v3082_v35 = vpop.xlane.xlu0 %3081  ;;  %v3095_v39 = vsel %vm703_vm6, %v5702_v33, 0.0  ;;  %v3352_v9 = vpop.permute.xlu1 %3351 }
0x1989   :  { %v3086_v40 = vsub.f32 %v2999_v25, %v3082_v35  ;;  %3096 = vadd.xlane.f32.xlu0 %v3095_v39 }
0x198b   :  { %v3088_v43 = vmul.f32 1.442695, %v3086_v40 }
0x198c   :  { %v3736_v29 = vpop.permute.xlu1 %3735 }
0x198d   :  { %5703 = vpow2.f32 %v3088_v43 }
0x1997   :  { %v5704_v44 = vpop.eup %5703 }
0x1998   :  { %v3092_v46 = vsel %vm703_vm6, %v5704_v44, 0.0 }
0x1999   :  { %3093 = vadd.xlane.f32.xlu0 %v3092_v46 }
0x19af   :  { %3178 = vrot.lane.b32.xlu0 %v6473_v41, %s5908_s24 }
0x19b3   :  { %3353 = vrot.lane.b32.xlu0 %v6471_v37, %s5909_s6 }
0x1a16   :  { %v3097_v47 = vpop.xlane.xlu0 %3096 }
0x1a17   :  { %5705 = vrcp.f32 %v3097_v47 }
0x1a21   :  { %v5706_v48 = vpop.eup %5705 }
0x1a22   :  { %v3101_v50 = vmul.f32 %v5706_v48, %v5702_v33 }
0x1a26   :  { %v3094_v21 = vpop.xlane.xlu0 %3093 }
0x1a27   :  { %5707 = vrcp.f32 %v3094_v21 }
0x1a2a   :  { %v3179_v51 = vpop.permute.xlu0 %3178 }
0x1a2b   :  { %5398 = vmatpush3.msra.mxu0 %v3179_v51 }
0x1a2c   :  { %5400 = vmatmul.mubr.msk.f32.vlgmr.msra.gmra.mrb[42].mxu0 %vm703_vm6, %v3101_v50  ;;  %5408 = vmatprep.subr.bf16.mxu0 %v5901_v0 }
0x1a2d   :  { %5409 = vmatpush3.bf16.msra.mxu0 %v3308_v53  ;;  %5410 = vmatprep.mubr.msk.bf16.mxu0 %vm5902_vm0, %v5901_v0 }
0x1a2e   :  { %5419 = vmatprep.subr.mxu0 %v5901_v0  ;;  %v3354_v5 = vpop.permute.xlu0 %3353 }
0x1a30   :  { %5411 = vmatmul.mubr.msk.bf16.vlgmr.msra.gmra.mrb[44].mxu0 %vm703_vm6, %v2921_v22 }
0x1a31   :  { %v5708_v54 = vpop.eup %5707  ;;  %5421 = vmatprep.mubr.msk.f32.mxu0 %vm5902_vm0, %v5901_v0 }
0x1a32   :  { %v3100_v55 = vmul.f32 %v5708_v54, %v5704_v44 }
0x1a34   :  { %5395 = vmatmul.mubr.msk.f32.vlgmr.msra.gmra.mrb[54].mxu1 %vm703_vm6, %v3100_v55 }
0x1a35   :  { %5404 = vmatprep.mubr.msk.bf16.mxu1 %vm5902_vm0, %v5901_v0  ;;  %5403 = vmatpush3.bf16.msra.mxu1 %v3261_v58 }
0x1a36   :  { %5420 = vmatpush3.xpose.msk.msra.mxu0 %vm703_vm6, %v3432_v42  ;;  %5414 = vmatprep.subr.mxu1 %v5901_v0 }
0x1a37   :  { %5429 = vmatprep.subr.mxu0 %v5901_v0 }
0x1a39   :  { %5422 = vmatmul.mubr.msk.f32.vlgmr.msra.gmra.mrb[48].mxu0 %vm703_vm6, %v3430_v57 }
0x1a3a   :  { %5431 = vmatprep.mubr.msk.f32.mxu0 %vm5902_vm0, %v5901_v0 }
0x1aff   :  { %v3250_v45 = vpop.f32.mrb[42].mxu0 }
0x1b00   :  { %v5401_v60 = vpop.f32.mrb[43].mxu0 }
0x1b03   :  { %v3344_v61 = vpop.f32.mrb[44].mxu0 }
0x1b04   :  { %v5412_v62 = vpop.f32.mrb[45].mxu0 }
0x1b05   :  { %v3347_v1 = vpop.f32.mrb[46].mxu0  ;;  %v4955_v62 = vld [vmem:[%s6780_s18 + $0x18] sm:$0xf] }
0x1b06   :  { %v5413_v2 = vpop.f32.mrb[47].mxu0 }
0x1b07   :  { %v3174_v3 = vpop.f32.mrb[54].mxu1 }
0x1b08   :  { %v3254_v4 = vpack.c.bf16 %v3250_v45, %v3174_v3  ;;  %v5396_v24 = vpop.f32.mrb[55].mxu1 }
0x1b0a   :  { %5405 = vmatmul.mubr.msk.bf16.vlgmr.msra.gmra.mrb[56].mxu1 %vm703_vm6, %v3254_v4 }
0x1b0b   :  { %5415 = vmatpush3.xpose.msk.msra.mxu1 %vm703_vm6, %v3354_v5  ;;  %5416 = vmatprep.mubr.msk.f32.mxu1 %vm5902_vm0, %v5901_v0 }
0x1b0c   :  { %v3503_v6 = vpop.f32.mrb[48].mxu0  ;;  %5424 = vmatprep.subr.mxu1 %v5901_v0 }
0x1b0d   :  { %v3504_v7 = vadd.f32 %v6528_v14, %v3503_v6  ;;  %v5423_v52 = vpop.f32.mrb[49].mxu0 }
0x1b0f   :  { %v3510_v8 = vsel %vm703_vm6, %v3504_v7, -inf }
0x1b10   :  { %3511 = vmax.xlane.f32.xlu0 %v3510_v8 }
0x1b12   :  { %5417 = vmatmul.mubr.msk.f32.vlgmr.msra.gmra.mrb[60].mxu1 %vm703_vm6, %v3352_v9 }
0x1b13   :  { %5426 = vmatprep.mubr.msk.f32.mxu1 %vm5902_vm0, %v5901_v0 }
0x1b26   :  { %3605 = vrot.lane.b32.xlu0 %v6473_v41, %s5912_s22 }
0x1b2a   :  { %3733 = vrot.lane.b32.xlu0 %v6471_v37, %s5913_s4 }
0x1b2e   :  { %3811 = vrot.lane.b32.xlu0 %v6473_v41, %s5913_s4 }
0x1b9d   :  { %v3512_v10 = vpop.xlane.xlu0 %3511 }
0x1b9e   :  { %v3514_v11 = vsub.f32 %v3504_v7, %v3512_v10 }
0x1ba0   :  { %v3517_v13 = vmul.f32 1.442695, %v3514_v11 }
0x1ba1   :  { %v3606_v15 = vpop.permute.xlu0 %3605 }
0x1ba2   :  { %5709 = vpow2.f32 %v3517_v13  ;;  %5430 = vmatpush3.msra.mxu0 %v3606_v15 }
0x1ba3   :  { %5440 = vmatprep.subr.mxu0 %v5901_v0 }
0x1ba5   :  { %v3734_v35 = vpop.permute.xlu0 %3733 }
0x1ba9   :  { %v3812_v40 = vpop.permute.xlu0 %3811 }
0x1bac   :  { %v5710_v16 = vpop.eup %5709 }
0x1bad   :  { %v3522_v17 = vsel %vm703_vm6, %v5710_v16, 0.0 }
0x1bae   :  { %3523 = vadd.xlane.f32.xlu1 %v3522_v17 }
0x1bbf   :  { %3813 = vrot.lane.b32.xlu1 %v6473_v41, %s5911_s27 }
0x1bdd   :  { %v3297_v18 = vpop.f32.mrb[56].mxu1 }
0x1bde   :  { %v6592_v19 = vadd.f32 %v3344_v61, %v3297_v18  ;;  %v5406_v20 = vpop.f32.mrb[57].mxu1 }
0x1bdf   :  { %v3300_v22 = vpop.f32.mrb[58].mxu1 }
0x1be0   :  { %v6594_v38 = vadd.f32 %v3347_v1, %v3300_v22  ;;  %v5407_v23 = vpop.f32.mrb[59].mxu1  ;;  %v3688_v1 = vsel %vm1367_vm7, %v4955_v62, 0  ;;  %v4963_v22 = vld [vmem:[%s6780_s18 + $0x1c] sm:$0xf] }
0x1be1   :  { %v4070_v23 = vsel %vm1367_vm7, %v4963_v22, 0  ;;  %v5622_v62 = vld [vmem:[%s6782_s28 + $0x18] sm:$0xff]   ;;  %v5627_v22 = vld [vmem:[%s6785_s30 + $0x60] sm:$0xff]  }
0x1be5   :  { %v3425_v25 = vpop.f32.mrb[60].mxu1 }
0x1be6   :  { %v3426_v26 = vadd.f32 %v6528_v14, %v3425_v25  ;;  %v5418_v27 = vpop.f32.mrb[61].mxu1 }
0x1be8   :  { %v3507_v28 = vsel %vm703_vm6, %v3426_v26, -inf }
0x1be9   :  { %3508 = vmax.xlane.f32.xlu1 %v3507_v28 }
0x1c3b   :  { %v3524_v30 = vpop.xlane.xlu1 %3523 }
0x1c3c   :  { %5711 = vrcp.f32 %v3524_v30 }
0x1c3f   :  { %v3814_v39 = vpop.permute.xlu1 %3813 }
0x1c46   :  { %v5712_v32 = vpop.eup %5711 }
0x1c47   :  { %v3528_v33 = vmul.f32 %v5712_v32, %v5710_v16 }
0x1c49   :  { %5432 = vmatmul.mubr.msk.f32.vlgmr.msra.gmra.mrb[50].mxu0 %vm703_vm6, %v3528_v33 }
0x1c4a   :  { %5441 = vmatpush3.xpose.msk.msra.mxu0 %vm703_vm6, %v3736_v29  ;;  %5442 = vmatprep.mubr.msk.f32.mxu0 %vm5902_vm0, %v5901_v0 }
0x1c4b   :  { %5445 = vmatprep.subr.mxu0 %v5901_v0 }
0x1c4d   :  { %5443 = vmatmul.mubr.msk.f32.vlgmr.msra.gmra.mrb[52].mxu0 %vm703_vm6, %v3734_v35 }
0x1c4e   :  { %5446 = vmatpush3.xpose.msk.msra.mxu0 %vm703_vm6, %v3814_v39  ;;  %5447 = vmatprep.mubr.msk.f32.mxu0 %vm5902_vm0, %v5901_v0 }
0x1c4f   :  { %5455 = vmatprep.subr.mxu0 %v5901_v0 }
0x1c51   :  { %5448 = vmatmul.mubr.msk.f32.vlgmr.msra.gmra.mrb[54].mxu0 %vm703_vm6, %v3812_v40 }
0x1c52   :  { %5457 = vmatprep.mubr.msk.f32.mxu0 %vm5902_vm0, %v5901_v0 }
0x1c76   :  { %v3509_v43 = vpop.xlane.xlu1 %3508 }
0x1c77   :  { %v3513_v44 = vsub.f32 %v3426_v26, %v3509_v43 }
0x1c79   :  { %v3515_v46 = vmul.f32 1.442695, %v3513_v44  ;;  %v4966_v44 = vld [vmem:[%s6781_s26 + $0x1] ss:$0 sm:$0xff] }
0x1c7b   :  { %5713 = vpow2.f32 %v3515_v46 }
0x1c85   :  { %v5714_v47 = vpop.eup %5713 }
0x1c86   :  { %v3519_v21 = vsel %vm703_vm6, %v5714_v47, 0.0 }
0x1c87   :  { %3520 = vadd.xlane.f32.xlu0 %v3519_v21 }
0x1c9d   :  { %3529 = vrot.lane.b32.xlu0 %v6471_v37, %s5912_s22 }
0x1ca1   :  { %3987 = vrot.lane.b32.xlu0 %v6473_v41, %s5914_s23 }
0x1d14   :  { %v3521_v48 = vpop.xlane.xlu0 %3520 }
0x1d15   :  { %5715 = vrcp.f32 %v3521_v48 }
0x1d18   :  { %v3530_v49 = vpop.permute.xlu0 %3529 }
0x1d19   :  { %5425 = vmatpush3.msra.mxu1 %v3530_v49 }
0x1d1a   :  { %5434 = vmatprep.subr.bf16.mxu1 %v5901_v0 }
0x1d1c   :  { %v3677_v50 = vpop.f32.mrb[50].mxu0  ;;  %v3988_v51 = vpop.permute.xlu0 %3987 }
0x1d1d   :  { %v5433_v53 = vpop.f32.mrb[51].mxu0  ;;  %5456 = vmatpush3.msra.mxu0 %v3988_v51 }
0x1d1e   :  { %5466 = vmatprep.subr.bf16.mxu0 %v5901_v0 }
0x1d1f   :  { %v5716_v54 = vpop.eup %5715 }
0x1d20   :  { %v3527_v42 = vmul.f32 %v5716_v54, %v5714_v47  ;;  %v3807_v55 = vpop.f32.mrb[52].mxu0 }
0x1d21   :  { %v3808_v57 = vadd.f32 %v6528_v14, %v3807_v55  ;;  %v5444_v56 = vpop.f32.mrb[53].mxu0 }
0x1d22   :  { %5427 = vmatmul.mubr.msk.f32.vlgmr.msra.gmra.mrb[62].mxu1 %vm703_vm6, %v3527_v42 }
0x1d23   :  { %v3889_v41 = vsel %vm703_vm6, %v3808_v57, -inf  ;;  %5436 = vmatprep.mubr.msk.bf16.mxu1 %vm5902_vm0, %v5901_v0  ;;  %5435 = vmatpush3.bf16.msra.mxu1 %v3688_v1 }
0x1d24   :  { %v3885_v58 = vpop.f32.mrb[54].mxu0  ;;  %3890 = vmax.xlane.f32.xlu1 %v3889_v41  ;;  %5450 = vmatprep.subr.mxu1 %v5901_v0 }
0x1d25   :  { %v3886_v45 = vadd.f32 %v6528_v14, %v3885_v58  ;;  %v5449_v60 = vpop.f32.mrb[55].mxu0 }
0x1d27   :  { %v3892_v61 = vsel %vm703_vm6, %v3886_v45, -inf }
0x1d28   :  { %3893 = vmax.xlane.f32.xlu1 %v3892_v61  ;;  %v5621_v61 = vld [vmem:[%s6782_s28 + $0x10] sm:$0xff]  }
0x1db1   :  { %v3891_v2 = vpop.xlane.xlu1 %3890 }
0x1db2   :  { %v3895_v3 = vsub.f32 %v3808_v57, %v3891_v2 }
0x1db4   :  { %v3897_v4 = vmul.f32 1.442695, %v3895_v3 }
0x1db5   :  { %v3894_v24 = vpop.xlane.xlu1 %3893 }
0x1db6   :  { %5717 = vpow2.f32 %v3897_v4  ;;  %v3896_v5 = vsub.f32 %v3886_v45, %v3894_v24 }
0x1db8   :  { %v3899_v6 = vmul.f32 1.442695, %v3896_v5 }
0x1dba   :  { %5719 = vpow2.f32 %v3899_v6 }
0x1dc0   :  { %v5718_v7 = vpop.eup %5717 }
0x1dc1   :  { %v3901_v14 = vsel %vm703_vm6, %v5718_v7, 0.0 }
0x1dc2   :  { %3902 = vadd.xlane.f32.xlu1 %v3901_v14  ;;  %v4969_v14 = vld [vmem:[%s6783_s1 + $0x1] ss:$0 sm:$0xff] }
0x1dc4   :  { %v5720_v52 = vpop.eup %5719 }
0x1dc5   :  { %v3904_v8 = vsel %vm703_vm6, %v5720_v52, 0.0 }
0x1dc6   :  { %3905 = vadd.xlane.f32.xlu1 %v3904_v8 }
0x1dd7   :  { %3911 = vrot.lane.b32.xlu1 %v6471_v37, %s5914_s23 }
0x1df5   :  { %v3601_v9 = vpop.f32.mrb[62].mxu1 }
0x1df6   :  { %v3681_v10 = vpack.c.bf16 %v3677_v50, %v3601_v9  ;;  %v5428_v11 = vpop.f32.mrb[63].mxu1 }
0x1df8   :  { %5437 = vmatmul.mubr.msk.bf16.vlgmr.msra.gmra.mrb[64].mxu1 %vm703_vm6, %v3681_v10  ;;  %v4970_v10 = vld [vmem:[%s6784_s2 + $0x1] ss:$0 sm:$0xff] }
0x1df9   :  { %5452 = vmatprep.mubr.msk.f32.mxu1 %vm5902_vm0, %v5901_v0 }
0x1e4f   :  { %v3903_v13 = vpop.xlane.xlu1 %3902 }
0x1e50   :  { %5721 = vrcp.f32 %v3903_v13 }
0x1e53   :  { %v3906_v15 = vpop.xlane.xlu1 %3905 }
0x1e54   :  { %5723 = vrcp.f32 %v3906_v15 }
0x1e57   :  { %v3912_v16 = vpop.permute.xlu1 %3911 }
0x1e58   :  { %5451 = vmatpush3.msra.mxu1 %v3912_v16 }
0x1e59   :  { %5460 = vmatprep.subr.bf16.mxu1 %v5901_v0 }
0x1e5a   :  { %v5722_v17 = vpop.eup %5721 }
0x1e5b   :  { %v3909_v18 = vmul.f32 %v5722_v17, %v5718_v7  ;;  %v5623_v17 = vld [vmem:[%s6785_s30 + $0x40] sm:$0xff]  }
0x1e5d   :  { %5453 = vmatmul.mubr.msk.f32.vlgmr.msra.gmra.mrb[68].mxu1 %vm703_vm6, %v3909_v18  ;;  %v5624_v18 = vld [vmem:[%s6785_s30 + $0x48] sm:$0xff]  }
0x1e5e   :  { %v5724_v37 = vpop.eup %5723  ;;  %5462 = vmatprep.mubr.msk.bf16.mxu1 %vm5902_vm0, %v5901_v0  ;;  %5461 = vmatpush3.bf16.msra.mxu1 %v4070_v23  ;;  %v5628_v23 = vld [vmem:[%s6785_s30 + $0x68] sm:$0xff]  }
0x1e5f   :  { %v3910_v20 = vmul.f32 %v5724_v37, %v5720_v52  ;;  %5474 = vmatprep.subr.bf16.mxu1 %v5901_v0  ;;  %v5625_v37 = vld [vmem:[%s6785_s30 + $0x50] sm:$0xff]  }
0x1e61   :  { %5458 = vmatmul.mubr.msk.f32.vlgmr.msra.gmra.mrb[56].mxu0 %vm703_vm6, %v3910_v20  ;;  %v5626_v20 = vld [vmem:[%s6785_s30 + $0x58] sm:$0xff]  }
0x1e62   :  { %5470 = vmatprep.mubr.msk.bf16.mxu0 %vm5902_vm0, %v5901_v0  ;;  %5467 = vmatpush3.bf16.msra.mxu0 %v5621_v61 }
0x1e63   :  { %5468 = vmatprep.subr.bf16.mxu0 %v5901_v0 }
0x1e66   :  { %5469 = vmatpush3.bf16.msra.mxu0 %v5622_v62 }
0x1ecb   :  { %v3724_v25 = vpop.f32.mrb[64].mxu1 }
0x1ecc   :  { %v3731_v26 = vadd.f32 %v3724_v25, %v6592_v19  ;;  %v5438_v27 = vpop.f32.mrb[65].mxu1  ;;  %v5629_v25 = vld [vmem:[%s6785_s30 + $0x70] sm:$0xff]  }
0x1ecd   :  { %v3727_v28 = vpop.f32.mrb[66].mxu1  ;;  %v4976_v27 = vld [vmem:[%s6786_s7 + $0x1] ss:$0 sm:$0xff] }
0x1ece   :  { %v3732_v29 = vadd.f32 %v3727_v28, %v6594_v38  ;;  %v5439_v30 = vpop.f32.mrb[67].mxu1 }
0x1f30   :  { %v3983_v32 = vpop.f32.mrb[68].mxu1 }
0x1f31   :  { %v5454_v33 = vpop.f32.mrb[69].mxu1 }
0x1f34   :  { %v4059_v35 = vpop.f32.mrb[56].mxu0 }
0x1f35   :  { %v4063_v39 = vpack.c.bf16 %v4059_v35, %v3983_v32  ;;  %v5459_v40 = vpop.f32.mrb[57].mxu0 }
0x1f37   :  { %5463 = vmatmul.mubr.msk.bf16.vlgmr.msra.gmra.mrb[72].mxu1 %vm703_vm6, %v4063_v39 }
0x1f38   :  { %5490 = vmatprep.mubr.msk.bf16.mxu1 %vm5902_vm0, %v5901_v0  ;;  %5475 = vmatpush3.bf16.msra.mxu1 %v5623_v17 }
0x1f39   :  { %5476 = vmatprep.subr.bf16.mxu1 %v5901_v0 }
0x1f3c   :  { %5477 = vmatpush3.bf16.msra.mxu1 %v5624_v18  ;;  %v4421_v18 = vshrl.u32 %v492_v34, 7 }
0x1f3d   :  { %5478 = vmatprep.subr.bf16.mxu1 %v5901_v0 }
0x1f40   :  { %5479 = vmatpush3.bf16.msra.mxu1 %v5625_v37 }
0x1f41   :  { %5480 = vmatprep.subr.bf16.mxu1 %v5901_v0 }
0x1f44   :  { %5481 = vmatpush3.bf16.msra.mxu1 %v5626_v20  ;;  %v5008_v20 = vld [vmem:[%s6789_s20] ss:$0 sm:$0xff] }
0x1f45   :  { %5482 = vmatprep.subr.bf16.mxu1 %v5901_v0 }
0x1f48   :  { %5483 = vmatpush3.bf16.msra.mxu1 %v5627_v22 }
0x1f49   :  { %5484 = vmatprep.subr.bf16.mxu1 %v5901_v0 }
0x1f4c   :  { %5485 = vmatpush3.bf16.msra.mxu1 %v5628_v23 }
0x1f4d   :  { %5486 = vmatprep.subr.bf16.mxu1 %v5901_v0 }
0x1f50   :  { %5487 = vmatpush3.bf16.msra.mxu1 %v5629_v25 }
0x1f51   :  { %5488 = vmatprep.subr.bf16.mxu1 %v5901_v0 }
0x200a   :  { %v4106_v43 = vpop.f32.mrb[72].mxu1 }
0x200b   :  { %v4113_v46 = vadd.f32 %v4106_v43, %v3731_v26  ;;  %v5464_v47 = vpop.f32.mrb[73].mxu1  ;;  %v5630_v26 = vld [vmem:[%s6785_s30 + $0x78] sm:$0xff]  }
0x200c   :  { %v4109_v19 = vpop.f32.mrb[74].mxu1  ;;  %5489 = vmatpush3.bf16.msra.mxu1 %v5630_v26 }
0x200d   :  { %v4123_v21 = vadd.f32 %v4966_v44, %v4113_v46  ;;  %v4114_v48 = vadd.f32 %v4109_v19, %v3732_v29  ;;  %v5465_v49 = vpop.f32.mrb[75].mxu1  ;;  %5525 = vmatprep.subr.bf16.mxu1 %v5901_v0 }
0x200f   :  { %v6652_v38 = vadd.f32 %v4123_v21, %v6448_v59  ;;  %v4124_v50 = vadd.f32 %v4966_v44, %v4114_v48 }
0x2011   :  { %v6655_v51 = vadd.f32 %v4124_v50, %v6451_v63  ;;  %v4131_v53 = vsel %vm235_vm1, %v6652_v38, 0.0 }
0x2012   :  { %4132 = vadd.xlane.f32.xlu0 %v4131_v53 }
0x2013   :  { %v4134_v54 = vsel %vm235_vm1, %v6655_v51, 0.0 }
0x2014   :  { %4135 = vadd.xlane.f32.xlu1 %v4134_v54 }
0x209f   :  { %v4133_v42 = vpop.xlane.xlu0 %4132 }
0x20a0   :  { %v4137_v55 = vmul.f32 0.03125, %v4133_v42  ;;  %v4999_v42 = vld [vmem:[%s6787_s10 + $0x1] ss:$0 sm:$0xff] }
0x20a1   :  { %v4136_v57 = vpop.xlane.xlu1 %4135 }
0x20a2   :  { %v4139_v59 = vsub.f32 %v6652_v38, %v4137_v55  ;;  %v4138_v56 = vmul.f32 0.03125, %v4136_v57 }
0x20a4   :  { %v4140_v41 = vsub.f32 %v6655_v51, %v4138_v56  ;;  %v4141_v63 = vmul.f32 %v4139_v59, %v4139_v59 }
0x20a6   :  { %v4143_v58 = vsel %vm235_vm1, %v4141_v63, 0.0  ;;  %v4142_v45 = vmul.f32 %v4140_v41, %v4140_v41 }
0x20a7   :  { %4144 = vadd.xlane.f32.xlu0 %v4143_v58 }
0x20a8   :  { %v4146_v60 = vsel %vm235_vm1, %v4142_v45, 0.0 }
0x20ab   :  { %4147 = vadd.xlane.f32.xlu0 %v4146_v60 }
0x2134   :  { %v4145_v1 = vpop.xlane.xlu0 %4144 }
0x2135   :  { %v4149_v2 = vmul.f32 0.03125, %v4145_v1 }
0x2137   :  { %v4151_v3 = vadd.f32 1e-05, %v4149_v2 }
0x2138   :  { %v4148_v4 = vpop.xlane.xlu0 %4147 }
0x2139   :  { %5725 = vrsqrt.f32 %v4151_v3  ;;  %v4150_v24 = vmul.f32 0.03125, %v4148_v4 }
0x213b   :  { %v4152_v5 = vadd.f32 1e-05, %v4150_v24 }
0x213d   :  { %5727 = vrsqrt.f32 %v4152_v5 }
0x2143   :  { %v5726_v6 = vpop.eup %5725 }
0x2144   :  { %v4155_v7 = vmul.f32 %v5726_v6, %v4139_v59 }
0x2146   :  { %v4163_v8 = vmul.f32 %v4969_v14, %v4155_v7  ;;  %v4423_v7 = vld [vmem:[%s6788_s11] sm:$0x3] }
0x2147   :  { %v5728_v52 = vpop.eup %5727 }
0x2148   :  { %v4156_v9 = vmul.f32 %v5728_v52, %v4140_v41  ;;  %v4171_v13 = vadd.f32 %v4970_v10, %v4163_v8  ;;  %v5915_v8 = vmov 0.0|0.0  }
0x2149   :  { %5533 = vmatprep.subr.bf16.mxu0 %v5915_v8 }
0x214a   :  { %v4164_v11 = vmul.f32 %v4969_v14, %v4156_v9  ;;  %v4854_v14 = vld [vmem:[%s6100_s29] ss:$0 sm:$0xff]  ;;  %s6790_s29 = sld [smem:[#allocation28_spill]] }
0x214b   :  { %v485_v52 = vadd.f32 %v4854_v14, %v6207_v12  ;;  %v4422_v12 = vmul.u32 8, %v4421_v18 }
0x214c   :  { %v4172_v15 = vadd.f32 %v4970_v10, %v4164_v11 }
0x214e   :  { %v4180_v16 = vpack.c.bf16 %v4172_v15, %v4171_v13 }
0x2150   :  { %5471 = vmatmul.mubr.msk.bf16.vlgmr.msra.gmra.mrb[60].mxu0 %vm235_vm1, %v4180_v16  ;;  %v5631_v34 = vld [vmem:[%s6790_s29] sm:$0xff]  }
0x2151   :  { %5498 = vmatprep.mubr.msk.f32.mxu0 %vm5902_vm0, %v5901_v0 }
0x2223   :  { %v4236_v28 = vpop.f32.mrb[60].mxu0 }
0x2224   :  { %v4237_v29 = vadd.f32 %v4976_v27, %v4236_v28  ;;  %v5472_v30 = vpop.f32.mrb[61].mxu0 }
0x2225   :  { %v4239_v32 = vpop.f32.mrb[62].mxu0 }
0x2226   :  { %v4980_v33 = vmul.f32 -1.702, %v4237_v29  ;;  %v4240_v35 = vadd.f32 %v4976_v27, %v4239_v32  ;;  %v5473_v39 = vpop.f32.mrb[63].mxu0  ;;  %v5009_v27 = vld [vmem:[#allocation2] ss:$0 sm:$0xff] }
0x2227   :  { %v5632_v39 = vld [vmem:[%s6790_s29 + $0x8] sm:$0xff]  }
0x2228   :  { %v4247_v40 = vmul.f32 1.442695, %v4980_v33  ;;  %v4981_v43 = vmul.f32 -1.702, %v4240_v35 }
0x222a   :  { %5729 = vpow2.f32 %v4247_v40  ;;  %v4249_v44 = vmul.f32 1.442695, %v4981_v43 }
0x222c   :  { %5731 = vpow2.f32 %v4249_v44  ;;  %v5633_v44 = vld [vmem:[%s6791_s0] sm:$0xff]  }
0x2234   :  { %v5730_v46 = vpop.eup %5729 }
0x2235   :  { %v4251_v47 = vadd.f32 1.0, %v5730_v46  ;;  %v5634_v46 = vld [vmem:[%s6791_s0 + $0x8] sm:$0xff]  }
0x2236   :  { %v5732_v19 = vpop.eup %5731 }
0x2237   :  { %5733 = vrcp.f32 %v4251_v47  ;;  %v4252_v21 = vadd.f32 1.0, %v5732_v19  ;;  %v5012_v47 = vld [vmem:[#allocation4] ss:$0 sm:$0xff] }
0x2239   :  { %5735 = vrcp.f32 %v4252_v21 }
0x2241   :  { %v5734_v48 = vpop.eup %5733 }
0x2242   :  { %v4257_v50 = vmul.f32 %v5734_v48, %v4237_v29 }
0x2243   :  { %v5736_v49 = vpop.eup %5735 }
0x2244   :  { %v4258_v53 = vmul.f32 %v5736_v49, %v4240_v35 }
0x2246   :  { %v4278_v54 = vpack.c.bf16 %v4258_v53, %v4257_v50 }
0x2248   :  { %5491 = vmatmul.mubr.bf16.vlgmr.msra.gmra.mrb[76].mxu1 %v4278_v54 }
0x2249   :  { %5529 = vmatprep.mubr.msk.bf16.mxu1 %vm5902_vm0, %v5901_v0 }
0x231b   :  { %v4367_v55 = vpop.f32.mrb[76].mxu1 }
0x231c   :  { %v4368_v57 = vadd.f32 %v4999_v42, %v4367_v55  ;;  %v5492_v59 = vpop.f32.mrb[77].mxu1 }
0x231d   :  { %v4370_v56 = vpop.f32.mrb[78].mxu1 }
0x231e   :  { %v4371_v41 = vadd.f32 %v4999_v42, %v4370_v56  ;;  %v5493_v63 = vpop.f32.mrb[79].mxu1  ;;  %v4374_v58 = vadd.f32 %v4368_v57, %v6652_v38  ;;  %v5016_v42 = vld [vmem:[#allocation6] ss:$0 sm:$0xff] }
0x2320   :  { %v4375_v45 = vadd.f32 %v4371_v41, %v6655_v51  ;;  %v4378_v60 = vsel %vm235_vm1, %v4374_v58, 0.0 }
0x2321   :  { %4379 = vadd.xlane.f32.xlu0 %v4378_v60  ;;  %v5636_v60 = vld [vmem:[%s6792_s15 + $0x8] sm:$0xff]  }
0x2322   :  { %v4381_v61 = vsel %vm235_vm1, %v4375_v45, 0.0 }
0x2325   :  { %4382 = vadd.xlane.f32.xlu0 %v4381_v61 }
0x23ae   :  { %v4380_v62 = vpop.xlane.xlu0 %4379 }
0x23af   :  { %v4384_v1 = vmul.f32 0.03125, %v4380_v62 }
0x23b1   :  { %v4386_v2 = vsub.f32 %v4374_v58, %v4384_v1 }
0x23b2   :  { %v4383_v3 = vpop.xlane.xlu0 %4382 }
0x23b3   :  { %v4385_v4 = vmul.f32 0.03125, %v4383_v3  ;;  %v4388_v24 = vmul.f32 %v4386_v2, %v4386_v2 }
0x23b5   :  { %v4387_v5 = vsub.f32 %v4375_v45, %v4385_v4  ;;  %v4390_v6 = vsel %vm235_vm1, %v4388_v24, 0.0  ;;  %v5635_v45 = vld [vmem:[%s6792_s15] sm:$0xff]   ;;  %v5638_v24 = vld [vmem:[%s6793_s16 + $0x8] sm:$0xff]  }
0x23b6   :  { %4391 = vadd.xlane.f32.xlu1 %v4390_v6  ;;  %v5637_v4 = vld [vmem:[%s6793_s16] sm:$0xff]  }
0x23b7   :  { %v4389_v38 = vmul.f32 %v4387_v5, %v4387_v5  ;;  %5526 = vmatpush3.bf16.msra.mxu1 %v5637_v4 }
0x23b8   :  { %5527 = vmatprep.subr.bf16.mxu1 %v5901_v0 }
0x23b9   :  { %v4393_v51 = vsel %vm235_vm1, %v4389_v38, 0.0 }
0x23ba   :  { %4394 = vadd.xlane.f32.xlu0 %v4393_v51 }
0x23bb   :  { %5528 = vmatpush3.bf16.msra.mxu1 %v5638_v24 }
0x23c7   :  { %4425 = vperm.xlu1 %5594, %v4423_v7  }
0x23cb   :  { %4787 = vrot.lane.b32.xlu1 %v485_v52, %s5905_s3 }
0x2443   :  { %v4392_v9 = vpop.xlane.xlu1 %4391 }
0x2444   :  { %v4396_v10 = vmul.f32 0.03125, %v4392_v9  ;;  %v5024_v9 = vld [vmem:[#allocation9] ss:$0 sm:$0xff] }
0x2446   :  { %v4398_v11 = vadd.f32 1e-05, %v4396_v10 }
0x2447   :  { %v4395_v13 = vpop.xlane.xlu0 %4394  ;;  %v4426_v23 = vpop.permute.xlu1 %4425 }
0x2448   :  { %5737 = vrsqrt.f32 %v4398_v11  ;;  %v4397_v15 = vmul.f32 0.03125, %v4395_v13  ;;  %v4427_v29 = vadd.s32 %v4426_v23, %v4422_v12 }
0x244a   :  { %v4399_v16 = vadd.f32 1e-05, %v4397_v15  ;;  %vm4428_vm8 = vcmp.eq.s32.totalorder %v6168_v36, %v4427_v29 }
0x244b   :  { %v5010_v35 = vsel %vm4428_vm8, 1.0, %v5901_v0 }
0x244c   :  { %5739 = vrsqrt.f32 %v4399_v16 }
0x2452   :  { %v5738_v17 = vpop.eup %5737 }
0x2453   :  { %v4402_v37 = vmul.f32 %v5738_v17, %v4386_v2  ;;  %v4788_v17 = vpop.permute.xlu1 %4787 }
0x2455   :  { %v4410_v26 = vmul.f32 %v5008_v20, %v4402_v37 }
0x2456   :  { %v5740_v22 = vpop.eup %5739 }
0x2457   :  { %v4403_v25 = vmul.f32 %v5740_v22, %v4387_v5  ;;  %v4418_v30 = vadd.f32 %v5009_v27, %v4410_v26  ;;  %v5020_v5 = vld [vmem:[#allocation7] ss:$0 sm:$0xff] }
0x2459   :  { %v4411_v28 = vmul.f32 %v5008_v20, %v4403_v25 }
0x245b   :  { %v4419_v32 = vadd.f32 %v5009_v27, %v4411_v28 }
0x245d   :  { %v5534_v33 = vpack.c.bf16 %v4419_v32, %v4418_v30 }
0x245f   :  { %5535 = vmatpush3.bf16.msra.mxu0 %v5534_v33 }
0x2460   :  { %5501 = vmatprep.subr.bf16.mxu0 %v5901_v0 }
0x2462   :  { %5499 = vmatmul.mubr.msk.f32.vlgmr.msra.gmra.mrb[58].mxu0 %vm4431_vm9, %v5010_v35 }
0x2463   :  { %5502 = vmatpush3.bf16.msra.mxu0 %v5631_v34  ;;  %5505 = vmatprep.mubr.msk.bf16.mxu0 %vm5902_vm0, %v5901_v0 }
0x2464   :  { %5503 = vmatprep.subr.bf16.mxu0 %v5901_v0 }
0x2467   :  { %5504 = vmatpush3.bf16.msra.mxu0 %v5632_v39 }
0x2468   :  { %5509 = vmatprep.subr.bf16.mxu0 %v5901_v0 }
0x2535   :  { %v4501_v36 = vpop.f32.mrb[58].mxu0 }
0x2536   :  { %v4510_v40 = vpack.c.bf16 %v4501_v36, %v4501_v36  ;;  %v5500_v43 = vpop.f32.mrb[59].mxu0 }
0x2538   :  { %5506 = vmatmul.mubr.msk.bf16.vlgmr.msra.gmra.mrb[64].mxu0 %vm235_vm1, %v4510_v40 }
0x2539   :  { %5513 = vmatprep.mubr.msk.bf16.mxu0 %vm5902_vm0, %v5901_v0  ;;  %5510 = vmatpush3.bf16.msra.mxu0 %v5633_v44 }
0x253a   :  { %5511 = vmatprep.subr.bf16.mxu0 %v5901_v0 }
0x253d   :  { %5512 = vmatpush3.bf16.msra.mxu0 %v5634_v46 }
0x253e   :  { %5517 = vmatprep.subr.bf16.mxu0 %v5901_v0 }
0x260b   :  { %v4566_v19 = vpop.f32.mrb[64].mxu0 }
0x260c   :  { %v4567_v21 = vadd.f32 %v5012_v47, %v4566_v19  ;;  %v5507_v48 = vpop.f32.mrb[65].mxu0 }
0x260d   :  { %v4569_v49 = vpop.f32.mrb[66].mxu0 }
0x260e   :  { %v4572_v50 = vmax.f32 %v4567_v21, 0.0  ;;  %v5508_v53 = vpop.f32.mrb[67].mxu0 }
0x2610   :  { %v4578_v54 = vpack.c.bf16 %v4572_v50, %v4572_v50 }
0x2612   :  { %5514 = vmatmul.mubr.msk.bf16.vlgmr.msra.gmra.mrb[68].mxu0 %vm235_vm1, %v4578_v54 }
0x2613   :  { %5521 = vmatprep.mubr.msk.bf16.mxu0 %vm5902_vm0, %v5901_v0  ;;  %5518 = vmatpush3.bf16.msra.mxu0 %v5635_v45 }
0x2614   :  { %5519 = vmatprep.subr.bf16.mxu0 %v5901_v0 }
0x2617   :  { %5520 = vmatpush3.bf16.msra.mxu0 %v5636_v60 }
0x26e5   :  { %v4634_v55 = vpop.f32.mrb[68].mxu0 }
0x26e6   :  { %v4635_v57 = vadd.f32 %v5016_v42, %v4634_v55  ;;  %v5515_v59 = vpop.f32.mrb[69].mxu0 }
0x26e7   :  { %v4637_v56 = vpop.f32.mrb[70].mxu0 }
0x26e8   :  { %v4640_v41 = vmul.f32 %v4635_v57, %v4635_v57  ;;  %v5516_v63 = vpop.f32.mrb[71].mxu0 }
0x26ea   :  { %v4641_v58 = vsel %vm348_vm2, %v4640_v41, 0.0 }
0x26eb   :  { %4642 = vadd.xlane.f32.xlu0 %v4641_v58 }
0x2778   :  { %v4643_v61 = vpop.xlane.xlu0 %4642 }
0x2779   :  { %v4644_v62 = vmax.f32 %v4643_v61, 1e-24 }
0x277b   :  { %5741 = vrsqrt.f32 %v4644_v62 }
0x2785   :  { %v5742_v1 = vpop.eup %5741 }
0x2786   :  { %v4646_v2 = vmul.f32 %v5742_v1, %v4635_v57 }
0x2788   :  { %4783 = vrot.lane.b32.xlu0 %v4646_v2, %s5916_s5  ;;  %v4652_v3 = vpack.c.bf16 %v4646_v2, %v4646_v2 }
0x278a   :  { %5522 = vmatmul.mubr.msk.bf16.vlgmr.msra.gmra.mrb[72].mxu0 %vm235_vm1, %v4652_v3 }
0x27fa   :  { %v4784_v16 = vpop.permute.xlu0 %4783 }
0x27fb   :  { %v4794_v18 = vsel %vm235_vm1, %v6157_v31, %v4784_v16 }
0x27fc   :  { %v4795_v37 = vsel %vm539_vm5, %v4794_v18, %v4788_v17 }
0x285d   :  { %v4708_v6 = vpop.f32.mrb[72].mxu0 }
0x285e   :  { %v4709_v38 = vadd.f32 %v5020_v5, %v4708_v6  ;;  %v5523_v51 = vpop.f32.mrb[73].mxu0 }
0x285f   :  { %v4711_v7 = vpop.f32.mrb[74].mxu0 }
0x2860   :  { %v4714_v14 = vmax.f32 %v4709_v38, 0.0  ;;  %v5524_v52 = vpop.f32.mrb[75].mxu0 }
0x2862   :  { %v4720_v8 = vpack.c.bf16 %v4714_v14, %v4714_v14 }
0x2864   :  { %5530 = vmatmul.mubr.msk.bf16.vlgmr.msra.gmra.mrb[80].mxu1 %vm235_vm1, %v4720_v8 }
0x2937   :  { %v4776_v10 = vpop.f32.mrb[80].mxu1 }
0x2938   :  { %v4777_v11 = vadd.f32 %v5024_v9, %v4776_v10  ;;  %v5531_v13 = vpop.f32.mrb[81].mxu1 }
0x2939   :  { %v4779_v15 = vpop.f32.mrb[82].mxu1 }
0x293a   :  { %4791 = vrot.lane.b32.xlu1 %v4777_v11, %s5904_s21  ;;  %v5532_v0 = vpop.f32.mrb[83].mxu1 }
0x29ac   :  { %v4792_v20 = vpop.permute.xlu1 %4791 }
0x29ad   :  { %v4797_v22 = vsel %vm4796_vm10, %v4795_v37, %v4792_v20 }
0x29ae   :  { %4798 = vst [vmem:[%s6105_s8] sm:$0x3] %v4797_v22 }
0x29af   :  { %4803 = vsyncpa [#allocation3], 1 }
0x29b0   :  { %4804 = vsyncpa [#allocation5], 1 }
0x29b1   :  { %4805 = vsyncpa [#allocation8], 1 }

</bundles_post_ra>
